<compile_context>
chip_gen: v5e
topology: v5e:2x2
jax: 0.10.0
libtpu: 0.0.40
codegen_flags: <defaults>
</compile_context>

<pallas_src>
import functools
import math

import jax
import jax.numpy as jnp
import numpy as np
from jax.experimental import pallas as pl
from jax.experimental.pallas import tpu as pltpu

KS1 = 15          # kernel size of the first conv block (fixed by the module)
BN_EPS = 1e-5


def _encoder_kernel(cols1_ref, w1_ref, b1_ref, w234_ref, b234_ref, o_ref,
                    hp_ref, cols_ref, y_ref, *, bb, L, hid, K, z):
    """Fused 4x(conv + BN + ReLU + avgpool) for `bb` batch elements (NLC)."""
    f32 = jnp.float32
    pad = K // 2

    def conv_relu(cols, w, bvec):
        y = jnp.dot(cols, w, preferred_element_type=f32)
        return jnp.maximum(y + bvec, 0.0)          # folded conv+BN bias, ReLU

    def pool(row0, half):
        # AvgPool1d(2) over y_ref rows [row0, row0 + 2*half):
        # two stride-2 sublane reads + a VPU average (no pooling matmul).
        even = y_ref[pl.ds(row0, half, stride=2), :]
        odd = y_ref[pl.ds(row0 + 1, half, stride=2), :]
        return 0.5 * (even + odd)

    zpad = jnp.zeros((pad, hid), f32)

    # ---- Block 1: Conv1d(1 -> hid, ks=15) + BN + ReLU (im2col built by XLA) --
    y_ref[pl.ds(0, bb * L), :] = conv_relu(cols1_ref[...], w1_ref[...],
                                           b1_ref[...])

    # AvgPool + zero-pad -> padded input of block 2 (all indices static).
    lh = L // 2
    lp = lh + 2 * pad
    for b in range(bb):
        hp_ref[pl.ds(b * lp, pad), :] = zpad
        hp_ref[pl.ds(b * lp + pad, lh), :] = pool(b * L, lh)
        hp_ref[pl.ds(b * lp + pad + lh, pad), :] = zpad

    # ---- Blocks 2..4: one im2col scatter + one MXU matmul each ---------------
    n_blocks = w234_ref.shape[0]
    for j in range(n_blocks):
        lin = lh                        # conv length of this block
        lp = lin + 2 * pad
        for b in range(bb):             # K shifted (lin, hid) windows, side by side
            for k in range(K):
                cols_ref[pl.ds(b * lin, lin), pl.ds(k * hid, hid)] = \
                    hp_ref[pl.ds(b * lp + k, lin), :]
        y_ref[pl.ds(0, bb * lin), :] = conv_relu(
            cols_ref[pl.ds(0, bb * lin), :], w234_ref[j], b234_ref[j])

        half = lin // 2
        if j + 1 < n_blocks:            # pool into the next block's padded input
            lp_next = half + 2 * pad
            for b in range(bb):
                hp_ref[pl.ds(b * lp_next, pad), :] = zpad
                hp_ref[pl.ds(b * lp_next + pad, half), :] = pool(b * lin, half)
                hp_ref[pl.ds(b * lp_next + pad + half, pad), :] = zpad
            lh = half
        else:                           # final block: pool straight to the output
            for b in range(bb):
                o_ref[b] = pool(b * lin, half)[:, 0:z]


def _pick_block_batch(B, cap=8):
    """Largest divisor of B that is <= cap while keeping >= 2 grid steps (v7x)."""
    bb = 1
    for cand in range(1, min(cap, B) + 1):
        if B % cand == 0 and (B == 1 or B // cand >= 2):
            bb = cand
    return bb


def embedding_forward(x, params, z_dim=8, ks1=KS1, block_batch=None):
    """x: (B, L) f32 -> (B, z_dim * L // 16) f32, matching the PyTorch module."""
    w1, b1, w234, b234 = params
    B, L = x.shape
    assert L % 16 == 0, L
    hid = w1.shape[1]
    kc = w234.shape[1]                  # K * hid (= 224 for the default config)
    K = kc // hid                       # 7
    pad = K // 2
    k1p = w1.shape[0]                   # block-1 taps, zero-padded (15 -> 16)
    assert k1p >= ks1
    lout = L // 16

    bb = block_batch if block_batch is not None else _pick_block_batch(B)
    assert B % bb == 0, (B, bb)
    nsteps = B // bb

    # Block-1 im2col built by XLA: lane-contiguous (B*L, 16) instead of (B, L, 1).
    pad1 = ks1 // 2
    xpad = jnp.pad(x.astype(jnp.float32), ((0, 0), (pad1, pad1)))
    cols1 = jnp.stack([xpad[:, t:t + L] for t in range(ks1)], axis=-1)
    cols1 = jnp.pad(cols1, ((0, 0), (0, 0), (0, k1p - ks1)))
    cols1 = cols1.reshape(B * L, k1p)

    kernel = functools.partial(_encoder_kernel, bb=bb, L=L, hid=hid, K=K, z=z_dim)

    out_nlc = pl.pallas_call(
        kernel,
        out_shape=jax.ShapeDtypeStruct((B, lout, z_dim), jnp.float32),
        grid=(nsteps,),
        in_specs=[
            pl.BlockSpec((bb * L, k1p), lambda i: (i, 0)),       # block-1 im2col
            pl.BlockSpec(w1.shape, lambda i: (0, 0)),
            pl.BlockSpec(b1.shape, lambda i: (0, 0)),
            pl.BlockSpec(w234.shape, lambda i: (0, 0, 0)),
            pl.BlockSpec(b234.shape, lambda i: (0, 0, 0)),
        ],
        out_specs=pl.BlockSpec((bb, lout, z_dim), lambda i: (i, 0, 0)),
        scratch_shapes=[
            pltpu.VMEM((bb * (L // 2 + 2 * pad), hid), jnp.float32),  # padded act
            pltpu.VMEM((bb * (L // 2), kc), jnp.float32),             # im2col cols
            pltpu.VMEM((bb * L, hid), jnp.float32),                   # pre-pool out
        ],
        compiler_params=pltpu.CompilerParams(
            dimension_semantics=("parallel",)),
    )(cols1, w1, b1, w234, b234)

    # Channel-major flatten (== torch.flatten of the NCL output); tiny XLA op.
    return jnp.transpose(out_nlc, (0, 2, 1)).reshape(B, -1)


def init_params(key, in_dim=1, hid_dim=32, z_dim=8):
    """Raw Conv1d weights/biases with PyTorch's default init (BN not folded)."""
    specs = [(in_dim, hid_dim, KS1), (hid_dim, hid_dim, 7),
             (hid_dim, hid_dim, 7), (hid_dim, z_dim, 7)]
    raw = []
    for (cin, cout, ks) in specs:
        key, kw, kb = jax.random.split(key, 3)
        bound = 1.0 / math.sqrt(cin * ks)
        w = jax.random.uniform(kw, (cout, cin, ks), jnp.float32, -bound, bound)
        b = jax.random.uniform(kb, (cout,), jnp.float32, -bound, bound)
        raw.append((w, b))
    return raw


def pack_params(raw_params):
    """Fold eval-mode BatchNorm, lay weights out for im2col, pack operands."""
    bn_scale = 1.0 / math.sqrt(1.0 + BN_EPS)    # gamma=1, beta=0, mean=0, var=1
    folded = []
    for (w, b) in raw_params:
        cout, cin, ks = w.shape
        # im2col weight layout: (K*Cin, Cout) with row index k*Cin + ci.
        w2d = (w * bn_scale).transpose(2, 1, 0).reshape(ks * cin, cout)
        b2d = (b * bn_scale)[None, :]
        folded.append((w2d, b2d))
    (w1, b1), (w2, b2), (w3, b3), (w4, b4) = folded
    hid = w2.shape[1]
    z = w4.shape[1]
    # Block 1: pad the tap dimension to a multiple of 8 (zero weight rows).
    k1p = -(-w1.shape[0] // 8) * 8
    w1 = jnp.pad(w1, ((0, k1p - w1.shape[0]), (0, 0)))
    # Blocks 2-4: pad block-4 output channels z -> hid and stack into one array.
    w4 = jnp.pad(w4, ((0, 0), (0, hid - z)))
    b4 = jnp.pad(b4, ((0, 0), (0, hid - z)))
    w234 = jnp.stack([w2, w3, w4], axis=0)      # (3, K*hid, hid)
    b234 = jnp.stack([b2, b3, b4], axis=0)      # (3, 1, hid)
    return (w1, b1, w234, b234)


def reference_forward(x, raw_params):
    """Pure-XLA forward matching the PyTorch module (eval-mode BatchNorm)."""
    h = x[:, None, :].astype(jnp.float32)                  # (B, 1, L) NCL
    for (w, b) in raw_params:
        p = w.shape[-1] // 2
        h = jax.lax.conv_general_dilated(
            h, w, window_strides=(1,), padding=[(p, p)],
            dimension_numbers=("NCH", "OIH", "NCH"))
        h = (h + b[None, :, None]) / jnp.sqrt(1.0 + BN_EPS)
        h = jnp.maximum(h, 0.0)
        bsz, c, l = h.shape
        h = h.reshape(bsz, c, l // 2, 2).mean(axis=-1)     # AvgPool1d(2)
    return h.reshape(h.shape[0], -1)                       # channel-major flatten


if __name__ == "__main__":
    key = jax.random.PRNGKey(0)
    kx, kp = jax.random.split(key)

    B, L = 2, 256                        # small shapes; L must be divisible by 16
    x = jax.random.normal(kx, (B, L), jnp.float32)
    raw_params = init_params(kp)         # in_dim=1, hid_dim=32, z_dim=8
    params = pack_params(raw_params)

    fwd = jax.jit(embedding_forward)
    out = jax.block_until_ready(fwd(x, params))

    z_dim = 8
    assert out.shape == (B, z_dim * (L // 16)), out.shape
    assert out.dtype == jnp.float32

    # Sanity-check against a pure-XLA reference of the same (eval-mode) module.
    ref = jax.block_until_ready(reference_forward(x, raw_params))
    rel_err = float(np.linalg.norm(np.asarray(out) - np.asarray(ref)) /
                    (np.linalg.norm(np.asarray(ref)) + 1e-12))
    assert rel_err < 2e-2, rel_err

    print("KERNEL_OK")
</pallas_src>

<mosaic_0001>
module attributes {stable_mosaic.version = 11 : i64} {
  func.func @_encoder_kernel(%arg0: i32, %arg1: memref<256x16xf32, #tpu.memory_space<vmem>>, %arg2: memref<16x32xf32, #tpu.memory_space<vmem>>, %arg3: memref<1x32xf32, #tpu.memory_space<vmem>>, %arg4: memref<3x224x32xf32, #tpu.memory_space<vmem>>, %arg5: memref<3x1x32xf32, #tpu.memory_space<vmem>>, %arg6: memref<1x16x8xf32, #tpu.memory_space<vmem>>, %arg7: memref<134x32xf32, #tpu.memory_space<vmem>>, %arg8: memref<128x224xf32, #tpu.memory_space<vmem>>, %arg9: memref<256x32xf32, #tpu.memory_space<vmem>>) attributes {dimension_semantics = [#tpu.dimension_semantics<parallel>], iteration_bounds = array<i64: 2>, scalar_prefetch = 0 : i64, scratch_operands = 3 : i64, tpu.core_type = #tpu.core_type<tc>, window_params = [{transform_indices = @transform_0, window_bounds = array<i64: 256, 16>}, {pipeline_mode = #tpu.pipeline_mode<synchronous>, transform_indices = @transform_1, window_bounds = array<i64: 16, 32>}, {pipeline_mode = #tpu.pipeline_mode<synchronous>, transform_indices = @transform_2, window_bounds = array<i64: 1, 32>}, {pipeline_mode = #tpu.pipeline_mode<synchronous>, transform_indices = @transform_3, window_bounds = array<i64: 3, 224, 32>}, {pipeline_mode = #tpu.pipeline_mode<synchronous>, transform_indices = @transform_4, window_bounds = array<i64: 3, 1, 32>}, {transform_indices = @transform_5, window_bounds = array<i64: 1, 16, 8>}]} {
    %cst = arith.constant 0.000000e+00 : f32
    %0 = vector.broadcast %cst : f32 to vector<3x32xf32>
    %c0 = arith.constant 0 : index
    %c0_0 = arith.constant 0 : index
    %1 = vector.load %arg1[%c0, %c0_0] : memref<256x16xf32, #tpu.memory_space<vmem>>, vector<256x16xf32>
    %c0_1 = arith.constant 0 : index
    %c0_2 = arith.constant 0 : index
    %2 = vector.load %arg2[%c0_1, %c0_2] : memref<16x32xf32, #tpu.memory_space<vmem>>, vector<16x32xf32>
    %c0_3 = arith.constant 0 : index
    %c0_4 = arith.constant 0 : index
    %3 = vector.load %arg3[%c0_3, %c0_4] : memref<1x32xf32, #tpu.memory_space<vmem>>, vector<1x32xf32>
    %cst_5 = arith.constant dense<0.000000e+00> : vector<256x32xf32>
    %4 = tpu.matmul %1, %2, %cst_5 {dimension_numbers = #tpu.dot_dimension_numbers<[1], [0], [0], [1], [0, 0, 1, 1], [], []>} : vector<256x16xf32>, vector<16x32xf32>, vector<256x32xf32> -> vector<256x32xf32>
    %5 = vector.broadcast %3 : vector<1x32xf32> to vector<256x32xf32>
    %6 = arith.addf %4, %5 : vector<256x32xf32>
    %cst_6 = arith.constant 0.000000e+00 : f32
    %7 = vector.broadcast %cst_6 : f32 to vector<256x32xf32>
    %8 = arith.maximumf %6, %7 : vector<256x32xf32>
    %c0_7 = arith.constant 0 : index
    %c0_8 = arith.constant 0 : index
    %9 = vector.load %arg9[%c0_7, %c0_8] : memref<256x32xf32, #tpu.memory_space<vmem>>, vector<256x32xf32>
    tpu.vector_store %arg9[%c0_7, %c0_8], %8 {strides = array<i32>} : memref<256x32xf32, #tpu.memory_space<vmem>>, vector<256x32xf32>,
    %c0_9 = arith.constant 0 : index
    %c0_10 = arith.constant 0 : index
    %10 = vector.load %arg7[%c0_9, %c0_10] : memref<134x32xf32, #tpu.memory_space<vmem>>, vector<3x32xf32>
    tpu.vector_store %arg7[%c0_9, %c0_10], %0 {strides = array<i32>} : memref<134x32xf32, #tpu.memory_space<vmem>>, vector<3x32xf32>,
    %c0_11 = arith.constant 0 : index
    %c0_12 = arith.constant 0 : index
    %11 = tpu.strided_load %arg9[%c0_11, %c0_12] {strides = array<i32: 2, 1>} : memref<256x32xf32, #tpu.memory_space<vmem>>, vector<128x32xf32>
    %c1 = arith.constant 1 : index
    %c0_13 = arith.constant 0 : index
    %12 = tpu.strided_load %arg9[%c1, %c0_13] {strides = array<i32: 2, 1>} : memref<256x32xf32, #tpu.memory_space<vmem>>, vector<128x32xf32>
    %13 = arith.addf %11, %12 : vector<128x32xf32>
    %cst_14 = arith.constant 5.000000e-01 : f32
    %14 = vector.broadcast %cst_14 : f32 to vector<128x32xf32>
    %15 = arith.mulf %14, %13 : vector<128x32xf32>
    %c3 = arith.constant 3 : index
    %c0_15 = arith.constant 0 : index
    %16 = vector.load %arg7[%c3, %c0_15] : memref<134x32xf32, #tpu.memory_space<vmem>>, vector<128x32xf32>
    tpu.vector_store %arg7[%c3, %c0_15], %15 {strides = array<i32>} : memref<134x32xf32, #tpu.memory_space<vmem>>, vector<128x32xf32>,
    %c131 = arith.constant 131 : index
    %c0_16 = arith.constant 0 : index
    %17 = vector.load %arg7[%c131, %c0_16] : memref<134x32xf32, #tpu.memory_space<vmem>>, vector<3x32xf32>
    tpu.vector_store %arg7[%c131, %c0_16], %0 {strides = array<i32>} : memref<134x32xf32, #tpu.memory_space<vmem>>, vector<3x32xf32>,
    %c0_17 = arith.constant 0 : index
    %c0_18 = arith.constant 0 : index
    %18 = vector.load %arg7[%c0_17, %c0_18] : memref<134x32xf32, #tpu.memory_space<vmem>>, vector<128x32xf32>
    %c0_19 = arith.constant 0 : index
    %c0_20 = arith.constant 0 : index
    %19 = vector.load %arg8[%c0_19, %c0_20] : memref<128x224xf32, #tpu.memory_space<vmem>>, vector<128x32xf32>
    tpu.vector_store %arg8[%c0_19, %c0_20], %18 {strides = array<i32>} : memref<128x224xf32, #tpu.memory_space<vmem>>, vector<128x32xf32>,
    %c1_21 = arith.constant 1 : index
    %c0_22 = arith.constant 0 : index
    %20 = vector.load %arg7[%c1_21, %c0_22] : memref<134x32xf32, #tpu.memory_space<vmem>>, vector<128x32xf32>
    %c0_23 = arith.constant 0 : index
    %c32 = arith.constant 32 : index
    %21 = vector.load %arg8[%c0_23, %c32] : memref<128x224xf32, #tpu.memory_space<vmem>>, vector<128x32xf32>
    tpu.vector_store %arg8[%c0_23, %c32], %20 {strides = array<i32>} : memref<128x224xf32, #tpu.memory_space<vmem>>, vector<128x32xf32>,
    %c2 = arith.constant 2 : index
    %c0_24 = arith.constant 0 : index
    %22 = vector.load %arg7[%c2, %c0_24] : memref<134x32xf32, #tpu.memory_space<vmem>>, vector<128x32xf32>
    %c0_25 = arith.constant 0 : index
    %c64 = arith.constant 64 : index
    %23 = vector.load %arg8[%c0_25, %c64] : memref<128x224xf32, #tpu.memory_space<vmem>>, vector<128x32xf32>
    tpu.vector_store %arg8[%c0_25, %c64], %22 {strides = array<i32>} : memref<128x224xf32, #tpu.memory_space<vmem>>, vector<128x32xf32>,
    %c3_26 = arith.constant 3 : index
    %c0_27 = arith.constant 0 : index
    %24 = vector.load %arg7[%c3_26, %c0_27] : memref<134x32xf32, #tpu.memory_space<vmem>>, vector<128x32xf32>
    %c0_28 = arith.constant 0 : index
    %c96 = arith.constant 96 : index
    %25 = vector.load %arg8[%c0_28, %c96] : memref<128x224xf32, #tpu.memory_space<vmem>>, vector<128x32xf32>
    tpu.vector_store %arg8[%c0_28, %c96], %24 {strides = array<i32>} : memref<128x224xf32, #tpu.memory_space<vmem>>, vector<128x32xf32>,
    %c4 = arith.constant 4 : index
    %c0_29 = arith.constant 0 : index
    %26 = vector.load %arg7[%c4, %c0_29] : memref<134x32xf32, #tpu.memory_space<vmem>>, vector<128x32xf32>
    %c0_30 = arith.constant 0 : index
    %c128 = arith.constant 128 : index
    %27 = vector.load %arg8[%c0_30, %c128] : memref<128x224xf32, #tpu.memory_space<vmem>>, vector<128x32xf32>
    tpu.vector_store %arg8[%c0_30, %c128], %26 {strides = array<i32>} : memref<128x224xf32, #tpu.memory_space<vmem>>, vector<128x32xf32>,
    %c5 = arith.constant 5 : index
    %c0_31 = arith.constant 0 : index
    %28 = vector.load %arg7[%c5, %c0_31] : memref<134x32xf32, #tpu.memory_space<vmem>>, vector<128x32xf32>
    %c0_32 = arith.constant 0 : index
    %c160 = arith.constant 160 : index
    %29 = vector.load %arg8[%c0_32, %c160] : memref<128x224xf32, #tpu.memory_space<vmem>>, vector<128x32xf32>
    tpu.vector_store %arg8[%c0_32, %c160], %28 {strides = array<i32>} : memref<128x224xf32, #tpu.memory_space<vmem>>, vector<128x32xf32>,
    %c6 = arith.constant 6 : index
    %c0_33 = arith.constant 0 : index
    %30 = vector.load %arg7[%c6, %c0_33] : memref<134x32xf32, #tpu.memory_space<vmem>>, vector<128x32xf32>
    %c0_34 = arith.constant 0 : index
    %c192 = arith.constant 192 : index
    %31 = vector.load %arg8[%c0_34, %c192] : memref<128x224xf32, #tpu.memory_space<vmem>>, vector<128x32xf32>
    tpu.vector_store %arg8[%c0_34, %c192], %30 {strides = array<i32>} : memref<128x224xf32, #tpu.memory_space<vmem>>, vector<128x32xf32>,
    %c0_35 = arith.constant 0 : index
    %c0_36 = arith.constant 0 : index
    %32 = vector.load %arg8[%c0_35, %c0_36] : memref<128x224xf32, #tpu.memory_space<vmem>>, vector<128x224xf32>
    %c0_37 = arith.constant 0 : index
    %c0_38 = arith.constant 0 : index
    %c0_39 = arith.constant 0 : index
    %33 = vector.load %arg4[%c0_37, %c0_38, %c0_39] : memref<3x224x32xf32, #tpu.memory_space<vmem>>, vector<1x224x32xf32>
    %34 = vector.shape_cast %33 : vector<1x224x32xf32> to vector<224x32xf32>
    %c0_40 = arith.constant 0 : index
    %c0_41 = arith.constant 0 : index
    %c0_42 = arith.constant 0 : index
    %35 = vector.load %arg5[%c0_40, %c0_41, %c0_42] : memref<3x1x32xf32, #tpu.memory_space<vmem>>, vector<1x1x32xf32>
    %36 = vector.shape_cast %35 : vector<1x1x32xf32> to vector<1x32xf32>
    %cst_43 = arith.constant dense<0.000000e+00> : vector<128x32xf32>
    %37 = tpu.matmul %32, %34, %cst_43 {dimension_numbers = #tpu.dot_dimension_numbers<[1], [0], [0], [1], [0, 0, 1, 1], [], []>} : vector<128x224xf32>, vector<224x32xf32>, vector<128x32xf32> -> vector<128x32xf32>
    %38 = vector.broadcast %36 : vector<1x32xf32> to vector<128x32xf32>
    %39 = arith.addf %37, %38 : vector<128x32xf32>
    %cst_44 = arith.constant 0.000000e+00 : f32
    %40 = vector.broadcast %cst_44 : f32 to vector<128x32xf32>
    %41 = arith.maximumf %39, %40 : vector<128x32xf32>
    %c0_45 = arith.constant 0 : index
    %c0_46 = arith.constant 0 : index
    %42 = vector.load %arg9[%c0_45, %c0_46] : memref<256x32xf32, #tpu.memory_space<vmem>>, vector<128x32xf32>
    tpu.vector_store %arg9[%c0_45, %c0_46], %41 {strides = array<i32>} : memref<256x32xf32, #tpu.memory_space<vmem>>, vector<128x32xf32>,
    %c0_47 = arith.constant 0 : index
    %c0_48 = arith.constant 0 : index
    %43 = vector.load %arg7[%c0_47, %c0_48] : memref<134x32xf32, #tpu.memory_space<vmem>>, vector<3x32xf32>
    tpu.vector_store %arg7[%c0_47, %c0_48], %0 {strides = array<i32>} : memref<134x32xf32, #tpu.memory_space<vmem>>, vector<3x32xf32>,
    %c0_49 = arith.constant 0 : index
    %c0_50 = arith.constant 0 : index
    %44 = tpu.strided_load %arg9[%c0_49, %c0_50] {strides = array<i32: 2, 1>} : memref<256x32xf32, #tpu.memory_space<vmem>>, vector<64x32xf32>
    %c1_51 = arith.constant 1 : index
    %c0_52 = arith.constant 0 : index
    %45 = tpu.strided_load %arg9[%c1_51, %c0_52] {strides = array<i32: 2, 1>} : memref<256x32xf32, #tpu.memory_space<vmem>>, vector<64x32xf32>
    %46 = arith.addf %44, %45 : vector<64x32xf32>
    %cst_53 = arith.constant 5.000000e-01 : f32
    %47 = vector.broadcast %cst_53 : f32 to vector<64x32xf32>
    %48 = arith.mulf %47, %46 : vector<64x32xf32>
    %c3_54 = arith.constant 3 : index
    %c0_55 = arith.constant 0 : index
    %49 = vector.load %arg7[%c3_54, %c0_55] : memref<134x32xf32, #tpu.memory_space<vmem>>, vector<64x32xf32>
    tpu.vector_store %arg7[%c3_54, %c0_55], %48 {strides = array<i32>} : memref<134x32xf32, #tpu.memory_space<vmem>>, vector<64x32xf32>,
    %c67 = arith.constant 67 : index
    %c0_56 = arith.constant 0 : index
    %50 = vector.load %arg7[%c67, %c0_56] : memref<134x32xf32, #tpu.memory_space<vmem>>, vector<3x32xf32>
    tpu.vector_store %arg7[%c67, %c0_56], %0 {strides = array<i32>} : memref<134x32xf32, #tpu.memory_space<vmem>>, vector<3x32xf32>,
    %c0_57 = arith.constant 0 : index
    %c0_58 = arith.constant 0 : index
    %51 = vector.load %arg7[%c0_57, %c0_58] : memref<134x32xf32, #tpu.memory_space<vmem>>, vector<64x32xf32>
    %c0_59 = arith.constant 0 : index
    %c0_60 = arith.constant 0 : index
    %52 = vector.load %arg8[%c0_59, %c0_60] : memref<128x224xf32, #tpu.memory_space<vmem>>, vector<64x32xf32>
    tpu.vector_store %arg8[%c0_59, %c0_60], %51 {strides = array<i32>} : memref<128x224xf32, #tpu.memory_space<vmem>>, vector<64x32xf32>,
    %c1_61 = arith.constant 1 : index
    %c0_62 = arith.constant 0 : index
    %53 = vector.load %arg7[%c1_61, %c0_62] : memref<134x32xf32, #tpu.memory_space<vmem>>, vector<64x32xf32>
    %c0_63 = arith.constant 0 : index
    %c32_64 = arith.constant 32 : index
    %54 = vector.load %arg8[%c0_63, %c32_64] : memref<128x224xf32, #tpu.memory_space<vmem>>, vector<64x32xf32>
    tpu.vector_store %arg8[%c0_63, %c32_64], %53 {strides = array<i32>} : memref<128x224xf32, #tpu.memory_space<vmem>>, vector<64x32xf32>,
    %c2_65 = arith.constant 2 : index
    %c0_66 = arith.constant 0 : index
    %55 = vector.load %arg7[%c2_65, %c0_66] : memref<134x32xf32, #tpu.memory_space<vmem>>, vector<64x32xf32>
    %c0_67 = arith.constant 0 : index
    %c64_68 = arith.constant 64 : index
    %56 = vector.load %arg8[%c0_67, %c64_68] : memref<128x224xf32, #tpu.memory_space<vmem>>, vector<64x32xf32>
    tpu.vector_store %arg8[%c0_67, %c64_68], %55 {strides = array<i32>} : memref<128x224xf32, #tpu.memory_space<vmem>>, vector<64x32xf32>,
    %c3_69 = arith.constant 3 : index
    %c0_70 = arith.constant 0 : index
    %57 = vector.load %arg7[%c3_69, %c0_70] : memref<134x32xf32, #tpu.memory_space<vmem>>, vector<64x32xf32>
    %c0_71 = arith.constant 0 : index
    %c96_72 = arith.constant 96 : index
    %58 = vector.load %arg8[%c0_71, %c96_72] : memref<128x224xf32, #tpu.memory_space<vmem>>, vector<64x32xf32>
    tpu.vector_store %arg8[%c0_71, %c96_72], %57 {strides = array<i32>} : memref<128x224xf32, #tpu.memory_space<vmem>>, vector<64x32xf32>,
    %c4_73 = arith.constant 4 : index
    %c0_74 = arith.constant 0 : index
    %59 = vector.load %arg7[%c4_73, %c0_74] : memref<134x32xf32, #tpu.memory_space<vmem>>, vector<64x32xf32>
    %c0_75 = arith.constant 0 : index
    %c128_76 = arith.constant 128 : index
    %60 = vector.load %arg8[%c0_75, %c128_76] : memref<128x224xf32, #tpu.memory_space<vmem>>, vector<64x32xf32>
    tpu.vector_store %arg8[%c0_75, %c128_76], %59 {strides = array<i32>} : memref<128x224xf32, #tpu.memory_space<vmem>>, vector<64x32xf32>,
    %c5_77 = arith.constant 5 : index
    %c0_78 = arith.constant 0 : index
    %61 = vector.load %arg7[%c5_77, %c0_78] : memref<134x32xf32, #tpu.memory_space<vmem>>, vector<64x32xf32>
    %c0_79 = arith.constant 0 : index
    %c160_80 = arith.constant 160 : index
    %62 = vector.load %arg8[%c0_79, %c160_80] : memref<128x224xf32, #tpu.memory_space<vmem>>, vector<64x32xf32>
    tpu.vector_store %arg8[%c0_79, %c160_80], %61 {strides = array<i32>} : memref<128x224xf32, #tpu.memory_space<vmem>>, vector<64x32xf32>,
    %c6_81 = arith.constant 6 : index
    %c0_82 = arith.constant 0 : index
    %63 = vector.load %arg7[%c6_81, %c0_82] : memref<134x32xf32, #tpu.memory_space<vmem>>, vector<64x32xf32>
    %c0_83 = arith.constant 0 : index
    %c192_84 = arith.constant 192 : index
    %64 = vector.load %arg8[%c0_83, %c192_84] : memref<128x224xf32, #tpu.memory_space<vmem>>, vector<64x32xf32>
    tpu.vector_store %arg8[%c0_83, %c192_84], %63 {strides = array<i32>} : memref<128x224xf32, #tpu.memory_space<vmem>>, vector<64x32xf32>,
    %c0_85 = arith.constant 0 : index
    %c0_86 = arith.constant 0 : index
    %65 = vector.load %arg8[%c0_85, %c0_86] : memref<128x224xf32, #tpu.memory_space<vmem>>, vector<64x224xf32>
    %c1_87 = arith.constant 1 : index
    %c0_88 = arith.constant 0 : index
    %c0_89 = arith.constant 0 : index
    %66 = vector.load %arg4[%c1_87, %c0_88, %c0_89] : memref<3x224x32xf32, #tpu.memory_space<vmem>>, vector<1x224x32xf32>
    %67 = vector.shape_cast %66 : vector<1x224x32xf32> to vector<224x32xf32>
    %c1_90 = arith.constant 1 : index
    %c0_91 = arith.constant 0 : index
    %c0_92 = arith.constant 0 : index
    %68 = vector.load %arg5[%c1_90, %c0_91, %c0_92] : memref<3x1x32xf32, #tpu.memory_space<vmem>>, vector<1x1x32xf32>
    %69 = vector.shape_cast %68 : vector<1x1x32xf32> to vector<1x32xf32>
    %cst_93 = arith.constant dense<0.000000e+00> : vector<64x32xf32>
    %70 = tpu.matmul %65, %67, %cst_93 {dimension_numbers = #tpu.dot_dimension_numbers<[1], [0], [0], [1], [0, 0, 1, 1], [], []>} : vector<64x224xf32>, vector<224x32xf32>, vector<64x32xf32> -> vector<64x32xf32>
    %71 = vector.broadcast %69 : vector<1x32xf32> to vector<64x32xf32>
    %72 = arith.addf %70, %71 : vector<64x32xf32>
    %cst_94 = arith.constant 0.000000e+00 : f32
    %73 = vector.broadcast %cst_94 : f32 to vector<64x32xf32>
    %74 = arith.maximumf %72, %73 : vector<64x32xf32>
    %c0_95 = arith.constant 0 : index
    %c0_96 = arith.constant 0 : index
    %75 = vector.load %arg9[%c0_95, %c0_96] : memref<256x32xf32, #tpu.memory_space<vmem>>, vector<64x32xf32>
    tpu.vector_store %arg9[%c0_95, %c0_96], %74 {strides = array<i32>} : memref<256x32xf32, #tpu.memory_space<vmem>>, vector<64x32xf32>,
    %c0_97 = arith.constant 0 : index
    %c0_98 = arith.constant 0 : index
    %76 = vector.load %arg7[%c0_97, %c0_98] : memref<134x32xf32, #tpu.memory_space<vmem>>, vector<3x32xf32>
    tpu.vector_store %arg7[%c0_97, %c0_98], %0 {strides = array<i32>} : memref<134x32xf32, #tpu.memory_space<vmem>>, vector<3x32xf32>,
    %c0_99 = arith.constant 0 : index
    %c0_100 = arith.constant 0 : index
    %77 = tpu.strided_load %arg9[%c0_99, %c0_100] {strides = array<i32: 2, 1>} : memref<256x32xf32, #tpu.memory_space<vmem>>, vector<32x32xf32>
    %c1_101 = arith.constant 1 : index
    %c0_102 = arith.constant 0 : index
    %78 = tpu.strided_load %arg9[%c1_101, %c0_102] {strides = array<i32: 2, 1>} : memref<256x32xf32, #tpu.memory_space<vmem>>, vector<32x32xf32>
    %79 = arith.addf %77, %78 : vector<32x32xf32>
    %cst_103 = arith.constant 5.000000e-01 : f32
    %80 = vector.broadcast %cst_103 : f32 to vector<32x32xf32>
    %81 = arith.mulf %80, %79 : vector<32x32xf32>
    %c3_104 = arith.constant 3 : index
    %c0_105 = arith.constant 0 : index
    %82 = vector.load %arg7[%c3_104, %c0_105] : memref<134x32xf32, #tpu.memory_space<vmem>>, vector<32x32xf32>
    tpu.vector_store %arg7[%c3_104, %c0_105], %81 {strides = array<i32>} : memref<134x32xf32, #tpu.memory_space<vmem>>, vector<32x32xf32>,
    %c35 = arith.constant 35 : index
    %c0_106 = arith.constant 0 : index
    %83 = vector.load %arg7[%c35, %c0_106] : memref<134x32xf32, #tpu.memory_space<vmem>>, vector<3x32xf32>
    tpu.vector_store %arg7[%c35, %c0_106], %0 {strides = array<i32>} : memref<134x32xf32, #tpu.memory_space<vmem>>, vector<3x32xf32>,
    %c0_107 = arith.constant 0 : index
    %c0_108 = arith.constant 0 : index
    %84 = vector.load %arg7[%c0_107, %c0_108] : memref<134x32xf32, #tpu.memory_space<vmem>>, vector<32x32xf32>
    %c0_109 = arith.constant 0 : index
    %c0_110 = arith.constant 0 : index
    %85 = vector.load %arg8[%c0_109, %c0_110] : memref<128x224xf32, #tpu.memory_space<vmem>>, vector<32x32xf32>
    tpu.vector_store %arg8[%c0_109, %c0_110], %84 {strides = array<i32>} : memref<128x224xf32, #tpu.memory_space<vmem>>, vector<32x32xf32>,
    %c1_111 = arith.constant 1 : index
    %c0_112 = arith.constant 0 : index
    %86 = vector.load %arg7[%c1_111, %c0_112] : memref<134x32xf32, #tpu.memory_space<vmem>>, vector<32x32xf32>
    %c0_113 = arith.constant 0 : index
    %c32_114 = arith.constant 32 : index
    %87 = vector.load %arg8[%c0_113, %c32_114] : memref<128x224xf32, #tpu.memory_space<vmem>>, vector<32x32xf32>
    tpu.vector_store %arg8[%c0_113, %c32_114], %86 {strides = array<i32>} : memref<128x224xf32, #tpu.memory_space<vmem>>, vector<32x32xf32>,
    %c2_115 = arith.constant 2 : index
    %c0_116 = arith.constant 0 : index
    %88 = vector.load %arg7[%c2_115, %c0_116] : memref<134x32xf32, #tpu.memory_space<vmem>>, vector<32x32xf32>
    %c0_117 = arith.constant 0 : index
    %c64_118 = arith.constant 64 : index
    %89 = vector.load %arg8[%c0_117, %c64_118] : memref<128x224xf32, #tpu.memory_space<vmem>>, vector<32x32xf32>
    tpu.vector_store %arg8[%c0_117, %c64_118], %88 {strides = array<i32>} : memref<128x224xf32, #tpu.memory_space<vmem>>, vector<32x32xf32>,
    %c3_119 = arith.constant 3 : index
    %c0_120 = arith.constant 0 : index
    %90 = vector.load %arg7[%c3_119, %c0_120] : memref<134x32xf32, #tpu.memory_space<vmem>>, vector<32x32xf32>
    %c0_121 = arith.constant 0 : index
    %c96_122 = arith.constant 96 : index
    %91 = vector.load %arg8[%c0_121, %c96_122] : memref<128x224xf32, #tpu.memory_space<vmem>>, vector<32x32xf32>
    tpu.vector_store %arg8[%c0_121, %c96_122], %90 {strides = array<i32>} : memref<128x224xf32, #tpu.memory_space<vmem>>, vector<32x32xf32>,
    %c4_123 = arith.constant 4 : index
    %c0_124 = arith.constant 0 : index
    %92 = vector.load %arg7[%c4_123, %c0_124] : memref<134x32xf32, #tpu.memory_space<vmem>>, vector<32x32xf32>
    %c0_125 = arith.constant 0 : index
    %c128_126 = arith.constant 128 : index
    %93 = vector.load %arg8[%c0_125, %c128_126] : memref<128x224xf32, #tpu.memory_space<vmem>>, vector<32x32xf32>
    tpu.vector_store %arg8[%c0_125, %c128_126], %92 {strides = array<i32>} : memref<128x224xf32, #tpu.memory_space<vmem>>, vector<32x32xf32>,
    %c5_127 = arith.constant 5 : index
    %c0_128 = arith.constant 0 : index
    %94 = vector.load %arg7[%c5_127, %c0_128] : memref<134x32xf32, #tpu.memory_space<vmem>>, vector<32x32xf32>
    %c0_129 = arith.constant 0 : index
    %c160_130 = arith.constant 160 : index
    %95 = vector.load %arg8[%c0_129, %c160_130] : memref<128x224xf32, #tpu.memory_space<vmem>>, vector<32x32xf32>
    tpu.vector_store %arg8[%c0_129, %c160_130], %94 {strides = array<i32>} : memref<128x224xf32, #tpu.memory_space<vmem>>, vector<32x32xf32>,
    %c6_131 = arith.constant 6 : index
    %c0_132 = arith.constant 0 : index
    %96 = vector.load %arg7[%c6_131, %c0_132] : memref<134x32xf32, #tpu.memory_space<vmem>>, vector<32x32xf32>
    %c0_133 = arith.constant 0 : index
    %c192_134 = arith.constant 192 : index
    %97 = vector.load %arg8[%c0_133, %c192_134] : memref<128x224xf32, #tpu.memory_space<vmem>>, vector<32x32xf32>
    tpu.vector_store %arg8[%c0_133, %c192_134], %96 {strides = array<i32>} : memref<128x224xf32, #tpu.memory_space<vmem>>, vector<32x32xf32>,
    %c0_135 = arith.constant 0 : index
    %c0_136 = arith.constant 0 : index
    %98 = vector.load %arg8[%c0_135, %c0_136] : memref<128x224xf32, #tpu.memory_space<vmem>>, vector<32x224xf32>
    %c2_137 = arith.constant 2 : index
    %c0_138 = arith.constant 0 : index
    %c0_139 = arith.constant 0 : index
    %99 = vector.load %arg4[%c2_137, %c0_138, %c0_139] : memref<3x224x32xf32, #tpu.memory_space<vmem>>, vector<1x224x32xf32>
    %100 = vector.shape_cast %99 : vector<1x224x32xf32> to vector<224x32xf32>
    %c2_140 = arith.constant 2 : index
    %c0_141 = arith.constant 0 : index
    %c0_142 = arith.constant 0 : index
    %101 = vector.load %arg5[%c2_140, %c0_141, %c0_142] : memref<3x1x32xf32, #tpu.memory_space<vmem>>, vector<1x1x32xf32>
    %102 = vector.shape_cast %101 : vector<1x1x32xf32> to vector<1x32xf32>
    %cst_143 = arith.constant dense<0.000000e+00> : vector<32x32xf32>
    %103 = tpu.matmul %98, %100, %cst_143 {dimension_numbers = #tpu.dot_dimension_numbers<[1], [0], [0], [1], [0, 0, 1, 1], [], []>} : vector<32x224xf32>, vector<224x32xf32>, vector<32x32xf32> -> vector<32x32xf32>
    %104 = vector.broadcast %102 : vector<1x32xf32> to vector<32x32xf32>
    %105 = arith.addf %103, %104 : vector<32x32xf32>
    %cst_144 = arith.constant 0.000000e+00 : f32
    %106 = vector.broadcast %cst_144 : f32 to vector<32x32xf32>
    %107 = arith.maximumf %105, %106 : vector<32x32xf32>
    %c0_145 = arith.constant 0 : index
    %c0_146 = arith.constant 0 : index
    %108 = vector.load %arg9[%c0_145, %c0_146] : memref<256x32xf32, #tpu.memory_space<vmem>>, vector<32x32xf32>
    tpu.vector_store %arg9[%c0_145, %c0_146], %107 {strides = array<i32>} : memref<256x32xf32, #tpu.memory_space<vmem>>, vector<32x32xf32>,
    %c0_147 = arith.constant 0 : index
    %c0_148 = arith.constant 0 : index
    %109 = tpu.strided_load %arg9[%c0_147, %c0_148] {strides = array<i32: 2, 1>} : memref<256x32xf32, #tpu.memory_space<vmem>>, vector<16x32xf32>
    %c1_149 = arith.constant 1 : index
    %c0_150 = arith.constant 0 : index
    %110 = tpu.strided_load %arg9[%c1_149, %c0_150] {strides = array<i32: 2, 1>} : memref<256x32xf32, #tpu.memory_space<vmem>>, vector<16x32xf32>
    %111 = arith.addf %109, %110 : vector<16x32xf32>
    %cst_151 = arith.constant 5.000000e-01 : f32
    %112 = vector.broadcast %cst_151 : f32 to vector<16x32xf32>
    %113 = arith.mulf %112, %111 : vector<16x32xf32>
    %114 = vector.extract_strided_slice %113 {offsets = [0, 0], sizes = [16, 8], strides = [1, 1]} : vector<16x32xf32> to vector<16x8xf32>
    %c0_152 = arith.constant 0 : index
    %c0_153 = arith.constant 0 : index
    %c0_154 = arith.constant 0 : index
    %115 = vector.load %arg6[%c0_152, %c0_153, %c0_154] : memref<1x16x8xf32, #tpu.memory_space<vmem>>, vector<1x16x8xf32>
    %116 = vector.shape_cast %115 : vector<1x16x8xf32> to vector<16x8xf32>
    %117 = vector.shape_cast %114 : vector<16x8xf32> to vector<1x16x8xf32>
    tpu.vector_store %arg6[%c0_152, %c0_153, %c0_154], %117 {strides = array<i32>} : memref<1x16x8xf32, #tpu.memory_space<vmem>>, vector<1x16x8xf32>,
    return
  }
  func.func @transform_0(%arg0: i32) -> (i32, i32) {
    %c0_i32 = arith.constant 0 : i32
    %c0_i32_0 = arith.constant 0 : i32
    return %arg0, %c0_i32 : i32, i32
  }
  func.func @transform_1(%arg0: i32) -> (i32, i32) {
    %c0_i32 = arith.constant 0 : i32
    %c0_i32_0 = arith.constant 0 : i32
    %c0_i32_1 = arith.constant 0 : i32
    return %c0_i32, %c0_i32_0 : i32, i32
  }
  func.func @transform_2(%arg0: i32) -> (i32, i32) {
    %c0_i32 = arith.constant 0 : i32
    %c0_i32_0 = arith.constant 0 : i32
    %c0_i32_1 = arith.constant 0 : i32
    return %c0_i32, %c0_i32_0 : i32, i32
  }
  func.func @transform_3(%arg0: i32) -> (i32, i32, i32) {
    %c0_i32 = arith.constant 0 : i32
    %c0_i32_0 = arith.constant 0 : i32
    %c0_i32_1 = arith.constant 0 : i32
    %c0_i32_2 = arith.constant 0 : i32
    return %c0_i32, %c0_i32_0, %c0_i32_1 : i32, i32, i32
  }
  func.func @transform_4(%arg0: i32) -> (i32, i32, i32) {
    %c0_i32 = arith.constant 0 : i32
    %c0_i32_0 = arith.constant 0 : i32
    %c0_i32_1 = arith.constant 0 : i32
    %c0_i32_2 = arith.constant 0 : i32
    return %c0_i32, %c0_i32_0, %c0_i32_1 : i32, i32, i32
  }
  func.func @transform_5(%arg0: i32) -> (i32, i32, i32) {
    %c0_i32 = arith.constant 0 : i32
    %c0_i32_0 = arith.constant 0 : i32
    %c0_i32_1 = arith.constant 0 : i32
    return %arg0, %c0_i32, %c0_i32_0 : i32, i32, i32
  }
}

</mosaic_0001>

<bundles_post_ra>
// kernel: embedding_forward.1
= control target key start
LH: loop header
LB: loop body
LE: loop exit
PB: predicated region body
PF: predicated region fallthrough
CT: control target
= control target key end

     0   :  { %s2496_s18 = smov 0   ;;  %s3404_s0 = inlined_call_operand.vmem [shape: f32[512,16], index: 0, kind: input, shape index: {}]   ;;  %s3405_s1 = inlined_call_operand.vmem [shape: f32[16,32], index: 1, kind: input, shape index: {}]   ;;  %s3406_s2 = inlined_call_operand.vmem [shape: f32[1,32], index: 2, kind: input, shape index: {}]   ;;  %s3407_s3 = inlined_call_operand.vmem [shape: f32[3,224,32], index: 3, kind: input, shape index: {}]   ;;  %s3408_s4 = inlined_call_operand.vmem [shape: f32[3,1,32], index: 4, kind: input, shape index: {}]   ;;  %s3409_s5 = inlined_call_operand.vmem [shape: f32[2,16,8], index: 5, kind: output, shape index: {}]  }
   0x1 LB: > { %s2502_s19 = sadd.s32 4294967295, %s2460_s18   ;;  %p2310_p0 = scmp.ge.s32.totalorder %s2460_s18, 1  ;;  %s2460_s18 = sphi %s2496_s18, %s15_s18  }
   0x2   : > { %p188_p1 = scmp.lt.s32.totalorder %s2460_s18, 3 }
   0x4   : > { %p189_p2 = pnand %p2310_p0, %p188_p1 }
   0x5   : > { %s2311_s24 = sshll.u32 (!%p189_p2), %s2502_s19, 5  ;;  %s2463_s6 = smov (!%p189_p2), 96  }
   0x6   : > { %192 = sbr.rel (%p189_p2) target bundleno = 1302 (0x516), region = 40  ;;  %p217_p3 = scmp.lt.s32.totalorder (!%p189_p2), %s2311_s24, 63 }
   0x7   : > { %s2464_s7 = smov (!%p189_p2), 32   ;;  %s2465_s8 = smov (!%p189_p2), 64  }
   0x8   : > { %p222_p4 = scmp.lt.s32.totalorder (!%p189_p2), %s2502_s19, 1 }
   0xb   : > { %v260_v0 = vld [vmem:[%s3405_s1 + $0x8] sm:$0xff]  ;;  %v259_v1 = vld [vmem:[%s3405_s1] sm:$0xff]  ;;  %s3411_s24 = smov (!%p217_p3, %s2311_s24), 63  ;;  %vm265_vm0 = vcmask 130048   ;;  %vm540_vm1 = vcmask 256000   ;;  %v2462_v26 = vmov 0.0  }
   0xc   : > { %376 = vmatpush.msra.mxu0 %v260_v0  ;;  %2436 = vmatpush.msra.mxu3 %v260_v0  ;;  %s2312_s25 = sshll.u32 %s3411_s24, 3  ;;  %541 = vst.msk [vmem:[#allocation2] sm:$0x7] %vm540_vm1, %v2462_v26  ;;  %v2573_v27 = vld [vmem:[%s3406_s2] ss:$0 sm:$0xff]  ;;  %vm507_vm2 = vcmask 261120  }
   0xd   : > { %s2516_s28 = scalar_lea.vmem %s3404_s0, %s2312_s25  ;;  %653 = vst.msk [vmem:[#allocation2 + $0x83] sm:$0x7] %vm540_vm1, %v2462_v26  ;;  %vm766_vm3 = vcmask 523520   ;;  %vm863_vm4 = vcmask 785920   ;;  %vm960_vm5 = vcmask 1048320   ;;  %vm1265_vm6 = vcmask 785408  }
   0xe   : > { %377 = vmatpush.msra.mxu0 %v259_v1  ;;  %2437 = vmatpush.msra.mxu3 %v259_v1  ;;  %v227_v2 = vld [vmem:[%s2516_s28] sm:$0xff]  ;;  %v228_v4 = vld [vmem:[%s2516_s28 + $0x8] sm:$0xff]  ;;  %v229_v6 = vld [vmem:[%s2516_s28 + $0x10] sm:$0xff]  ;;  %s3413_s19 = smov (!%p222_p4, %s2502_s19), 1  ;;  %vm2248_vm7 = vcmask 64512  }
   0xf   : > { %v251_v3 = vld [vmem:[%s2516_s28 + $0xc0] sm:$0xff]  ;;  %2315 = vmatmul.msk.f32.vlgmr.msra.gmra.mxu0 %vm265_vm0, %v227_v2  ;;  %v252_v5 = vld [vmem:[%s2516_s28 + $0xc8] sm:$0xff]  ;;  %v253_v7 = vld [vmem:[%s2516_s28 + $0xd0] sm:$0xff] }
  0x10   : > { %2339 = vmatmul.msk.f32.vlgmr.msra.gmra.mxu3 %vm265_vm0, %v251_v3  ;;  %v230_v8 = vld [vmem:[%s2516_s28 + $0x18] sm:$0xff]  ;;  %v231_v10 = vld [vmem:[%s2516_s28 + $0x20] sm:$0xff]  ;;  %v232_v12 = vld [vmem:[%s2516_s28 + $0x28] sm:$0xff] }
  0x11   : > { %v254_v9 = vld [vmem:[%s2516_s28 + $0xd8] sm:$0xff]  ;;  %v255_v11 = vld [vmem:[%s2516_s28 + $0xe0] sm:$0xff]  ;;  %v256_v13 = vld [vmem:[%s2516_s28 + $0xe8] sm:$0xff] }
  0x12   : > { %v233_v14 = vld [vmem:[%s2516_s28 + $0x30] sm:$0xff]  ;;  %v234_v16 = vld [vmem:[%s2516_s28 + $0x38] sm:$0xff]  ;;  %v235_v18 = vld [vmem:[%s2516_s28 + $0x40] sm:$0xff] }
  0x13   : > { %v257_v15 = vld [vmem:[%s2516_s28 + $0xf0] sm:$0xff]  ;;  %v258_v17 = vld [vmem:[%s2516_s28 + $0xf8] sm:$0xff]  ;;  %v236_v19 = vld [vmem:[%s2516_s28 + $0x48] sm:$0xff] }
  0x14   : > { %v237_v20 = vld [vmem:[%s2516_s28 + $0x50] sm:$0xff]  ;;  %v238_v21 = vld [vmem:[%s2516_s28 + $0x58] sm:$0xff]  ;;  %v239_v22 = vld [vmem:[%s2516_s28 + $0x60] sm:$0xff] }
  0x15   : > { %v240_v23 = vld [vmem:[%s2516_s28 + $0x68] sm:$0xff]  ;;  %v241_v24 = vld [vmem:[%s2516_s28 + $0x70] sm:$0xff]  ;;  %v242_v25 = vld [vmem:[%s2516_s28 + $0x78] sm:$0xff] }
  0x16   : > { %v243_v29 = vld [vmem:[%s2516_s28 + $0x80] sm:$0xff]  ;;  %v244_v35 = vld [vmem:[%s2516_s28 + $0x88] sm:$0xff]  ;;  %v245_v42 = vld [vmem:[%s2516_s28 + $0x90] sm:$0xff] }
  0x17   : > { %2316 = vmatmul.msk.f32.gmra.mxu0 %vm265_vm0, %v228_v4  ;;  %v246_v53 = vld [vmem:[%s2516_s28 + $0x98] sm:$0xff]  ;;  %v247_v2 = vld [vmem:[%s2516_s28 + $0xa0] sm:$0xff] }
  0x18   : > { %2340 = vmatmul.msk.f32.gmra.mxu3 %vm265_vm0, %v252_v5 }
  0x1f   : > { %2317 = vmatmul.msk.f32.gmra.mxu0 %vm265_vm0, %v229_v6 }
  0x20   : > { %2341 = vmatmul.msk.f32.gmra.mxu3 %vm265_vm0, %v253_v7 }
  0x27   : > { %2318 = vmatmul.msk.f32.gmra.mxu0 %vm265_vm0, %v230_v8 }
  0x28   : > { %2342 = vmatmul.msk.f32.gmra.mxu3 %vm265_vm0, %v254_v9 }
  0x2f   : > { %2319 = vmatmul.msk.f32.gmra.mxu0 %vm265_vm0, %v231_v10 }
  0x30   : > { %2343 = vmatmul.msk.f32.gmra.mxu3 %vm265_vm0, %v255_v11 }
  0x37   : > { %2320 = vmatmul.msk.f32.gmra.mxu0 %vm265_vm0, %v232_v12 }
  0x38   : > { %2344 = vmatmul.msk.f32.gmra.mxu3 %vm265_vm0, %v256_v13 }
  0x3f   : > { %2321 = vmatmul.msk.f32.gmra.mxu0 %vm265_vm0, %v233_v14 }
  0x40   : > { %2345 = vmatmul.msk.f32.gmra.mxu3 %vm265_vm0, %v257_v15  ;;  %v248_v15 = vld [vmem:[%s2516_s28 + $0xa8] sm:$0xff] }
  0x47   : > { %2322 = vmatmul.msk.f32.gmra.mxu0 %vm265_vm0, %v234_v16 }
  0x48   : > { %2346 = vmatmul.msk.f32.gmra.mxu3 %vm265_vm0, %v258_v17 }
  0x4f   : > { %2323 = vmatmul.msk.f32.gmra.mxu0 %vm265_vm0, %v235_v18 }
  0x57   : > { %2324 = vmatmul.msk.f32.gmra.mxu0 %vm265_vm0, %v236_v19 }
  0x5f   : > { %2325 = vmatmul.msk.f32.gmra.mxu0 %vm265_vm0, %v237_v20 }
  0x67   : > { %2326 = vmatmul.msk.f32.gmra.mxu0 %vm265_vm0, %v238_v21 }
  0x6f   : > { %2327 = vmatmul.msk.f32.gmra.mxu0 %vm265_vm0, %v239_v22 }
  0x77   : > { %2328 = vmatmul.msk.f32.gmra.mxu0 %vm265_vm0, %v240_v23 }
  0x7f   : > { %2329 = vmatmul.msk.f32.gmra.mxu0 %vm265_vm0, %v241_v24 }
  0x87   : > { %2330 = vmatmul.msk.f32.gmra.mxu0 %vm265_vm0, %v242_v25 }
  0x8c   : > { %v379_v28 = vpop.f32.mrf.mxu0 }
  0x8d   : > { %v380_v30 = vadd.f32 %v2573_v27, %v379_v28 }
  0x8f   : > { %v475_v31 = vmax.f32 %v380_v30, 0.0  ;;  %2331 = vmatmul.msk.f32.gmra.mxu0 %vm265_vm0, %v243_v29 }
  0x91   : > { %508 = vst.msk [vmem:[#allocation4] sm:$0xff] %vm507_vm2, %v475_v31  ;;  %v249_v31 = vld [vmem:[%s2516_s28 + $0xb0] sm:$0xff] }
  0x93   : > { %v451_v32 = vpop.f32.mrf.mxu3 }
  0x94   : > { %v452_v33 = vadd.f32 %v2573_v27, %v451_v32  ;;  %v382_v34 = vpop.f32.mrf.mxu0 }
  0x95   : > { %v383_v37 = vadd.f32 %v2573_v27, %v382_v34 }
  0x96   : > { %v499_v36 = vmax.f32 %v452_v33, 0.0 }
  0x97   : > { %v476_v38 = vmax.f32 %v383_v37, 0.0  ;;  %2332 = vmatmul.msk.f32.gmra.mxu0 %vm265_vm0, %v244_v35 }
  0x98   : > { %532 = vst.msk [vmem:[#allocation4 + $0xc0] sm:$0xff] %vm507_vm2, %v499_v36 }
  0x99   : > { %509 = vst.msk [vmem:[#allocation4 + $0x8] sm:$0xff] %vm507_vm2, %v476_v38 }
  0x9b   : > { %v454_v39 = vpop.f32.mrf.mxu3 }
  0x9c   : > { %v455_v40 = vadd.f32 %v2573_v27, %v454_v39  ;;  %v385_v41 = vpop.f32.mrf.mxu0 }
  0x9d   : > { %v386_v44 = vadd.f32 %v2573_v27, %v385_v41 }
  0x9e   : > { %v500_v43 = vmax.f32 %v455_v40, 0.0 }
  0x9f   : > { %v477_v45 = vmax.f32 %v386_v44, 0.0  ;;  %2333 = vmatmul.msk.f32.gmra.mxu0 %vm265_vm0, %v245_v42 }
  0xa0   : > { %533 = vst.msk [vmem:[#allocation4 + $0xc8] sm:$0xff] %vm507_vm2, %v500_v43  ;;  %v542_v46 = vld [vmem:[#allocation4] ss:$2 sm:$0xff]  ;;  %v574_v47 = vld [vmem:[#allocation4 + $0x1] ss:$2 sm:$0xff] }
  0xa1   : > { %510 = vst.msk [vmem:[#allocation4 + $0x10] sm:$0xff] %vm507_vm2, %v477_v45  ;;  %v605_v48 = vadd.f32 %v574_v47, %v542_v46  ;;  %v250_v46 = vld [vmem:[%s2516_s28 + $0xb8] sm:$0xff] }
  0xa3   : > { %v457_v49 = vpop.f32.mrf.mxu3  ;;  %v621_v51 = vmul.f32 0.5, %v605_v48 }
  0xa4   : > { %v458_v50 = vadd.f32 %v2573_v27, %v457_v49  ;;  %v388_v52 = vpop.f32.mrf.mxu0 }
  0xa5   : > { %v389_v55 = vadd.f32 %v2573_v27, %v388_v52  ;;  %637 = vst.msk [vmem:[#allocation2 + $0x3] sm:$0xff] %vm507_vm2, %v621_v51 }
  0xa6   : > { %v501_v54 = vmax.f32 %v458_v50, 0.0 }
  0xa7   : > { %v566_v56 = vld [vmem:[#allocation4 + $0xc0] ss:$2 sm:$0xff]  ;;  %v598_v57 = vld [vmem:[#allocation4 + $0xc1] ss:$2 sm:$0xff]  ;;  %v478_v59 = vmax.f32 %v389_v55, 0.0  ;;  %2334 = vmatmul.msk.f32.gmra.mxu0 %vm265_vm0, %v246_v53 }
  0xa8   : > { %v617_v58 = vadd.f32 %v598_v57, %v566_v56  ;;  %534 = vst.msk [vmem:[#allocation4 + $0xd0] sm:$0xff] %vm507_vm2, %v501_v54 }
  0xa9   : > { %511 = vst.msk [vmem:[#allocation4 + $0x18] sm:$0xff] %vm507_vm2, %v478_v59 }
  0xaa   : > { %v633_v60 = vmul.f32 0.5, %v617_v58 }
  0xab   : > { %v460_v61 = vpop.f32.mrf.mxu3 }
  0xac   : > { %v461_v62 = vadd.f32 %v2573_v27, %v460_v61  ;;  %649 = vst.msk [vmem:[#allocation2 + $0x63] sm:$0xff] %vm507_vm2, %v633_v60  ;;  %v391_v63 = vpop.f32.mrf.mxu0  ;;  %v880_v0 = vld [vmem:[#allocation2 + $0x3] sm:$0xff] }
  0xad   : > { %v686_v1 = vld [vmem:[#allocation2 + $0x1] sm:$0xff]  ;;  %v392_v4 = vadd.f32 %v2573_v27, %v391_v63  ;;  %912 = vrot.lane.b32.xlu2 %v880_v0, %s2463_s6 }
  0xae   : > { %v502_v3 = vmax.f32 %v461_v62, 0.0  ;;  %718 = vrot.lane.b32.xlu1 %v686_v1, %s2464_s7  ;;  %v654_v5 = vld [vmem:[#allocation2] sm:$0xff] }
  0xaf   : > { %670 = vst.msk [vmem:[#allocation3] sm:$0xff] %vm507_vm2, %v654_v5  ;;  %v479_v6 = vmax.f32 %v392_v4, 0.0  ;;  %2335 = vmatmul.msk.f32.gmra.mxu0 %vm265_vm0, %v247_v2  ;;  %v783_v7 = vld [vmem:[#allocation2 + $0x2] sm:$0xff] }
  0xb0   : > { %535 = vst.msk [vmem:[#allocation4 + $0xd8] sm:$0xff] %vm507_vm2, %v502_v3  ;;  %v544_v8 = vld [vmem:[#allocation4 + $0x10] ss:$2 sm:$0xff]  ;;  %v576_v9 = vld [vmem:[#allocation4 + $0x11] ss:$2 sm:$0xff] }
  0xb1   : > { %1476 = vst.msk [vmem:[#allocation2] sm:$0x7] %vm540_vm1, %v2462_v26  ;;  %v606_v10 = vadd.f32 %v576_v9, %v544_v8 }
  0xb2   : > { %512 = vst.msk [vmem:[#allocation4 + $0x20] sm:$0xff] %vm507_vm2, %v479_v6 }
  0xb3   : > { %v463_v11 = vpop.f32.mrf.mxu3  ;;  %v622_v13 = vmul.f32 0.5, %v606_v10  ;;  %v892_v25 = vld [vmem:[#allocation2 + $0x63] sm:$0xff] }
  0xb4   : > { %v464_v12 = vadd.f32 %v2573_v27, %v463_v11  ;;  %v394_v14 = vpop.f32.mrf.mxu0 }
  0xb5   : > { %v395_v17 = vadd.f32 %v2573_v27, %v394_v14  ;;  %638 = vst.msk [vmem:[#allocation2 + $0xb] sm:$0xff] %vm507_vm2, %v622_v13 }
  0xb6   : > { %v503_v16 = vmax.f32 %v464_v12, 0.0  ;;  %815 = vrot.lane.b32.xlu1 %v783_v7, %s2465_s8 }
  0xb7   : > { %v568_v18 = vld [vmem:[#allocation4 + $0xd0] ss:$2 sm:$0xff]  ;;  %v600_v19 = vld [vmem:[#allocation4 + $0xd1] ss:$2 sm:$0xff]  ;;  %v480_v21 = vmax.f32 %v395_v17, 0.0  ;;  %2336 = vmatmul.msk.f32.gmra.mxu0 %vm265_vm0, %v248_v15 }
  0xb8   : > { %v618_v20 = vadd.f32 %v600_v19, %v568_v18  ;;  %536 = vst.msk [vmem:[#allocation4 + $0xe0] sm:$0xff] %vm507_vm2, %v503_v16 }
  0xb9   : > { %513 = vst.msk [vmem:[#allocation4 + $0x28] sm:$0xff] %vm507_vm2, %v480_v21 }
  0xba   : > { %v634_v22 = vmul.f32 0.5, %v618_v20 }
  0xbb   : > { %v466_v23 = vpop.f32.mrf.mxu3 }
  0xbc   : > { %v467_v24 = vadd.f32 %v2573_v27, %v466_v23  ;;  %650 = vst.msk [vmem:[#allocation2 + $0x6b] sm:$0xff] %vm507_vm2, %v634_v22  ;;  %v397_v28 = vpop.f32.mrf.mxu0  ;;  %v1009_v29 = vld [vmem:[#allocation2 + $0x5] sm:$0xff] }
  0xbd   : > { %v784_v30 = vld [vmem:[#allocation2 + $0xa] sm:$0xff]  ;;  %v398_v33 = vadd.f32 %v2573_v27, %v397_v28  ;;  %1041 = vrot.lane.b32.xlu0 %v1009_v29, %s2464_s7 }
  0xbe   : > { %v504_v32 = vmax.f32 %v467_v24, 0.0  ;;  %817 = vrot.lane.b32.xlu2 %v784_v30, %s2465_s8  ;;  %v977_v34 = vld [vmem:[#allocation2 + $0x4] sm:$0xff]  ;;  %936 = vrot.lane.b32.xlu1 %v892_v25, %s2463_s6 }
  0xbf   : > { %993 = vst.msk [vmem:[#allocation3 + $0x8] sm:$0xff] %vm507_vm2, %v977_v34  ;;  %v655_v35 = vld [vmem:[#allocation2 + $0x8] sm:$0xff]  ;;  %v481_v36 = vmax.f32 %v398_v33, 0.0  ;;  %2337 = vmatmul.msk.f32.gmra.mxu0 %vm265_vm0, %v249_v31 }
  0xc0   : > { %537 = vst.msk [vmem:[#allocation4 + $0xe8] sm:$0xff] %vm507_vm2, %v504_v32  ;;  %v546_v37 = vld [vmem:[#allocation4 + $0x20] ss:$2 sm:$0xff]  ;;  %v578_v38 = vld [vmem:[#allocation4 + $0x21] ss:$2 sm:$0xff] }
  0xc1   : > { %671 = vst.msk [vmem:[#allocation3 + $0x10] sm:$0xff] %vm507_vm2, %v655_v35  ;;  %v607_v39 = vadd.f32 %v578_v38, %v546_v37  ;;  %v1105_v45 = vld [vmem:[#allocation2 + $0x6] sm:$0xff] }
  0xc2   : > { %514 = vst.msk [vmem:[#allocation4 + $0x30] sm:$0xff] %vm507_vm2, %v481_v36  ;;  %v687_v50 = vld [vmem:[#allocation2 + $0x9] sm:$0xff] }
  0xc3   : > { %v469_v40 = vpop.f32.mrf.mxu3  ;;  %v989_v41 = vld [vmem:[#allocation2 + $0x64] sm:$0xff]  ;;  %v623_v43 = vmul.f32 0.5, %v607_v39 }
  0xc4   : > { %v470_v42 = vadd.f32 %v2573_v27, %v469_v40  ;;  %1005 = vst.msk [vmem:[#allocation3 + $0xc8] sm:$0xff] %vm507_vm2, %v989_v41  ;;  %v400_v44 = vpop.f32.mrf.mxu0  ;;  %v667_v47 = vld [vmem:[#allocation2 + $0x68] sm:$0xff] }
  0xc5   : > { %v401_v48 = vadd.f32 %v2573_v27, %v400_v44  ;;  %1137 = vrot.lane.b32.xlu0 %v1105_v45, %s2465_s8  ;;  %639 = vst.msk [vmem:[#allocation2 + $0x13] sm:$0xff] %vm507_vm2, %v623_v43  ;;  %v881_v59 = vld [vmem:[#allocation2 + $0xb] sm:$0xff] }
  0xc6   : > { %v505_v49 = vmax.f32 %v470_v42, 0.0  ;;  %720 = vrot.lane.b32.xlu1 %v687_v50, %s2464_s7  ;;  %683 = vst.msk [vmem:[#allocation3 + $0xd0] sm:$0xff] %vm507_vm2, %v667_v47  ;;  %v1117_v63 = vld [vmem:[#allocation2 + $0x66] sm:$0xff] }
  0xc7   : > { %v570_v51 = vld [vmem:[#allocation4 + $0xe0] ss:$2 sm:$0xff]  ;;  %v602_v52 = vld [vmem:[#allocation4 + $0xe1] ss:$2 sm:$0xff]  ;;  %v482_v54 = vmax.f32 %v401_v48, 0.0  ;;  %2338 = vmatmul.msk.f32.gmra.mxu0 %vm265_vm0, %v250_v46 }
  0xc8   : > { %v619_v53 = vadd.f32 %v602_v52, %v570_v51  ;;  %538 = vst.msk [vmem:[#allocation4 + $0xf0] sm:$0xff] %vm507_vm2, %v505_v49  ;;  %v1021_v9 = vld [vmem:[#allocation2 + $0x65] sm:$0xff]  ;;  %v1248_v52 = vld [vmem:[%s3407_s3 + $0x78] sm:$0xff] }
  0xc9   : > { %515 = vst.msk [vmem:[#allocation4 + $0x38] sm:$0xff] %vm507_vm2, %v482_v54  ;;  %1314 = vmatpush.msra.mxu1 %v1248_v52 }
  0xca   : > { %v635_v55 = vmul.f32 0.5, %v619_v53 }
  0xcb   : > { %v472_v56 = vpop.f32.mrf.mxu3 }
  0xcc   : > { %v473_v57 = vadd.f32 %v2573_v27, %v472_v56  ;;  %651 = vst.msk [vmem:[#allocation2 + $0x73] sm:$0xff] %vm507_vm2, %v635_v55  ;;  %v403_v58 = vpop.f32.mrf.mxu0  ;;  %v1010_v60 = vld [vmem:[#allocation2 + $0xd] sm:$0xff] }
  0xcd   : > { %v404_v61 = vadd.f32 %v2573_v27, %v403_v58  ;;  %914 = vrot.lane.b32.xlu0 %v881_v59, %s2463_s6  ;;  %1043 = vrot.lane.b32.xlu2 %v1010_v60, %s2464_s7  ;;  %v978_v0 = vld [vmem:[#allocation2 + $0xc] sm:$0xff] }
  0xce   : > { %v506_v62 = vmax.f32 %v473_v57, 0.0  ;;  %1161 = vrot.lane.b32.xlu1 %v1117_v63, %s2465_s8  ;;  %994 = vst.msk [vmem:[#allocation3 + $0x18] sm:$0xff] %vm507_vm2, %v978_v0  ;;  %v656_v1 = vld [vmem:[#allocation2 + $0x10] sm:$0xff]  ;;  %v1246_v60 = vld [vmem:[%s3407_s3 + $0x68] sm:$0xff]  ;;  %v1244_v63 = vld [vmem:[%s3407_s3 + $0x58] sm:$0xff] }
  0xcf   : > { %v483_v2 = vmax.f32 %v404_v61, 0.0  ;;  %672 = vst.msk [vmem:[#allocation3 + $0x20] sm:$0xff] %vm507_vm2, %v656_v1  ;;  %v882_v10 = vld [vmem:[#allocation2 + $0x13] sm:$0xff] }
  0xd0   : > { %539 = vst.msk [vmem:[#allocation4 + $0xf8] sm:$0xff] %vm507_vm2, %v506_v62  ;;  %v548_v3 = vld [vmem:[#allocation4 + $0x30] ss:$2 sm:$0xff]  ;;  %v580_v4 = vld [vmem:[#allocation4 + $0x31] ss:$2 sm:$0xff]  ;;  %v1106_v20 = vld [vmem:[#allocation2 + $0xe] sm:$0xff] }
  0xd1   : > { %516 = vst.msk [vmem:[#allocation4 + $0x40] sm:$0xff] %vm507_vm2, %v483_v2  ;;  %v608_v5 = vadd.f32 %v580_v4, %v548_v3  ;;  %v785_v13 = vld [vmem:[#allocation2 + $0x12] sm:$0xff]  ;;  %v1245_v62 = vld [vmem:[%s3407_s3 + $0x60] sm:$0xff] }
  0xd2   : > { %v688_v36 = vld [vmem:[#allocation2 + $0x11] sm:$0xff] }
  0xd3   : > { %v990_v6 = vld [vmem:[#allocation2 + $0x6c] sm:$0xff]  ;;  %v624_v7 = vmul.f32 0.5, %v608_v5 }
  0xd4   : > { %1006 = vst.msk [vmem:[#allocation3 + $0xd8] sm:$0xff] %vm507_vm2, %v990_v6  ;;  %v406_v8 = vpop.f32.mrf.mxu0  ;;  %v668_v11 = vld [vmem:[#allocation2 + $0x70] sm:$0xff]  ;;  %v1242_v6 = vld [vmem:[%s3407_s3 + $0x48] sm:$0xff] }
  0xd5   : > { %v407_v12 = vadd.f32 %v2573_v27, %v406_v8  ;;  %1065 = vrot.lane.b32.xlu0 %v1021_v9, %s2464_s7  ;;  %916 = vrot.lane.b32.xlu2 %v882_v10, %s2463_s6  ;;  %640 = vst.msk [vmem:[#allocation2 + $0x1b] sm:$0xff] %vm507_vm2, %v624_v7  ;;  %v1022_v21 = vld [vmem:[#allocation2 + $0x6d] sm:$0xff] }
  0xd6   : > { %819 = vrot.lane.b32.xlu1 %v785_v13, %s2465_s8  ;;  %684 = vst.msk [vmem:[#allocation3 + $0xe0] sm:$0xff] %vm507_vm2, %v668_v11  ;;  %v1118_v42 = vld [vmem:[#allocation2 + $0x6e] sm:$0xff] }
  0xd7   : > { %v572_v14 = vld [vmem:[#allocation4 + $0xf0] ss:$2 sm:$0xff]  ;;  %v604_v15 = vld [vmem:[#allocation4 + $0xf1] ss:$2 sm:$0xff]  ;;  %v484_v17 = vmax.f32 %v407_v12, 0.0  ;;  %v1247_v57 = vld [vmem:[%s3407_s3 + $0x70] sm:$0xff] }
  0xd8   : > { %v620_v16 = vadd.f32 %v604_v15, %v572_v14  ;;  %1315 = vmatpush.msra.mxu1 %v1247_v57  ;;  %v1243_v5 = vld [vmem:[%s3407_s3 + $0x50] sm:$0xff]  ;;  %v1241_v12 = vld [vmem:[%s3407_s3 + $0x40] sm:$0xff]  ;;  %v1240_v14 = vld [vmem:[%s3407_s3 + $0x38] sm:$0xff] }
  0xd9   : > { %517 = vst.msk [vmem:[#allocation4 + $0x48] sm:$0xff] %vm507_vm2, %v484_v17  ;;  %v1252_v57 = vld [vmem:[%s3407_s3 + $0x98] sm:$0xff] }
  0xda   : > { %v636_v18 = vmul.f32 0.5, %v620_v16  ;;  %1316 = vmatpush.msra.mxu1 %v1246_v60 }
  0xdc   : > { %652 = vst.msk [vmem:[#allocation2 + $0x7b] sm:$0xff] %vm507_vm2, %v636_v18  ;;  %v409_v19 = vpop.f32.mrf.mxu0  ;;  %v1011_v22 = vld [vmem:[#allocation2 + $0x15] sm:$0xff]  ;;  %1317 = vmatpush.msra.mxu1 %v1245_v62 }
  0xdd   : > { %v410_v23 = vadd.f32 %v2573_v27, %v409_v19  ;;  %1139 = vrot.lane.b32.xlu0 %v1106_v20, %s2465_s8  ;;  %1067 = vrot.lane.b32.xlu2 %v1022_v21, %s2464_s7  ;;  %v657_v24 = vld [vmem:[#allocation2 + $0x18] sm:$0xff]  ;;  %v1239_v19 = vld [vmem:[%s3407_s3 + $0x30] sm:$0xff]  ;;  %v1238_v21 = vld [vmem:[%s3407_s3 + $0x28] sm:$0xff] }
  0xde   : > { %1045 = vrot.lane.b32.xlu1 %v1011_v22, %s2464_s7  ;;  %673 = vst.msk [vmem:[#allocation3 + $0x30] sm:$0xff] %vm507_vm2, %v657_v24  ;;  %v979_v25 = vld [vmem:[#allocation2 + $0x14] sm:$0xff]  ;;  %1318 = vmatpush.msra.mxu1 %v1244_v63 }
  0xdf   : > { %v485_v28 = vmax.f32 %v410_v23, 0.0  ;;  %995 = vst.msk [vmem:[#allocation3 + $0x28] sm:$0xff] %vm507_vm2, %v979_v25  ;;  %v1107_v37 = vld [vmem:[#allocation2 + $0x16] sm:$0xff]  ;;  %v1237_v23 = vld [vmem:[%s3407_s3 + $0x20] sm:$0xff] }
  0xe0   : > { %v550_v29 = vld [vmem:[#allocation4 + $0x40] ss:$2 sm:$0xff]  ;;  %v582_v30 = vld [vmem:[#allocation4 + $0x41] ss:$2 sm:$0xff]  ;;  %v883_v39 = vld [vmem:[#allocation2 + $0x1b] sm:$0xff]  ;;  %1319 = vmatpush.msra.mxu1 %v1243_v5 }
  0xe1   : > { %v609_v31 = vadd.f32 %v582_v30, %v550_v29  ;;  %518 = vst.msk [vmem:[#allocation4 + $0x50] sm:$0xff] %vm507_vm2, %v485_v28  ;;  %v689_v43 = vld [vmem:[#allocation2 + $0x19] sm:$0xff]  ;;  %v1251_v63 = vld [vmem:[%s3407_s3 + $0x90] sm:$0xff] }
  0xe2   : > { %v786_v55 = vld [vmem:[#allocation2 + $0x1a] sm:$0xff]  ;;  %1320 = vmatpush.msra.mxu1 %v1242_v6 }
  0xe3   : > { %v625_v32 = vmul.f32 0.5, %v609_v31  ;;  %v991_v33 = vld [vmem:[#allocation2 + $0x74] sm:$0xff] }
  0xe4   : > { %v669_v34 = vld [vmem:[#allocation2 + $0x78] sm:$0xff]  ;;  %v412_v35 = vpop.f32.mrf.mxu0  ;;  %1007 = vst.msk [vmem:[#allocation3 + $0xe8] sm:$0xff] %vm507_vm2, %v991_v33  ;;  %1321 = vmatpush.msra.mxu1 %v1241_v12  ;;  %v1259_v33 = vld [vmem:[%s3407_s3 + $0xd0] sm:$0xff] }
  0xe5   : > { %641 = vst.msk [vmem:[#allocation2 + $0x23] sm:$0xff] %vm507_vm2, %v625_v32  ;;  %v413_v38 = vadd.f32 %v2573_v27, %v412_v35  ;;  %722 = vrot.lane.b32.xlu0 %v688_v36, %s2464_s7  ;;  %1141 = vrot.lane.b32.xlu2 %v1107_v37, %s2465_s8  ;;  %v1260_v24 = vld [vmem:[%s3407_s3 + $0xd8] sm:$0xff]  ;;  %v1258_v35 = vld [vmem:[%s3407_s3 + $0xc8] sm:$0xff] }
  0xe6   : > { %918 = vrot.lane.b32.xlu1 %v883_v39, %s2463_s6  ;;  %685 = vst.msk [vmem:[#allocation3 + $0xf0] sm:$0xff] %vm507_vm2, %v669_v34  ;;  %1322 = vmatpush.msra.mxu1 %v1240_v14  ;;  %v1236_v25 = vld [vmem:[%s3407_s3 + $0x18] sm:$0xff]  ;;  %v1235_v34 = vld [vmem:[%s3407_s3 + $0x10] sm:$0xff] }
  0xe7   : > { %v486_v40 = vmax.f32 %v413_v38, 0.0  ;;  %1383 = vmatpush.msra.mxu2 %v1260_v24  ;;  %v1234_v38 = vld [vmem:[%s3407_s3 + $0x8] sm:$0xff] }
  0xe8   : > { %1323 = vmatpush.msra.mxu1 %v1239_v19 }
  0xe9   : > { %519 = vst.msk [vmem:[#allocation4 + $0x58] sm:$0xff] %vm507_vm2, %v486_v40  ;;  %1384 = vmatpush.msra.mxu2 %v1259_v33 }
  0xea   : > { %1324 = vmatpush.msra.mxu1 %v1238_v21 }
  0xeb   : > { %1385 = vmatpush.msra.mxu2 %v1258_v35 }
  0xec   : > { %v415_v41 = vpop.f32.mrf.mxu0  ;;  %v1108_v44 = vld [vmem:[#allocation2 + $0x1e] sm:$0xff]  ;;  %1325 = vmatpush.msra.mxu1 %v1237_v23 }
  0xed   : > { %v416_v45 = vadd.f32 %v2573_v27, %v415_v41  ;;  %1163 = vrot.lane.b32.xlu0 %v1118_v42, %s2465_s8  ;;  %724 = vrot.lane.b32.xlu2 %v689_v43, %s2464_s7  ;;  %v658_v46 = vld [vmem:[#allocation2 + $0x20] sm:$0xff] }
  0xee   : > { %1143 = vrot.lane.b32.xlu1 %v1108_v44, %s2465_s8  ;;  %674 = vst.msk [vmem:[#allocation3 + $0x40] sm:$0xff] %vm507_vm2, %v658_v46  ;;  %v980_v47 = vld [vmem:[#allocation2 + $0x1c] sm:$0xff]  ;;  %1326 = vmatpush.msra.mxu1 %v1236_v25 }
  0xef   : > { %v487_v48 = vmax.f32 %v416_v45, 0.0  ;;  %996 = vst.msk [vmem:[#allocation3 + $0x38] sm:$0xff] %vm507_vm2, %v980_v47  ;;  %v787_v56 = vld [vmem:[#allocation2 + $0x22] sm:$0xff]  ;;  %v1256_v45 = vld [vmem:[%s3407_s3 + $0xb8] sm:$0xff]  ;;  %v1255_v47 = vld [vmem:[%s3407_s3 + $0xb0] sm:$0xff] }
  0xf0   : > { %v552_v49 = vld [vmem:[#allocation4 + $0x50] ss:$2 sm:$0xff]  ;;  %v584_v50 = vld [vmem:[#allocation4 + $0x51] ss:$2 sm:$0xff]  ;;  %1327 = vmatpush.msra.mxu1 %v1235_v34 }
  0xf1   : > { %v610_v51 = vadd.f32 %v584_v50, %v552_v49  ;;  %520 = vst.msk [vmem:[#allocation4 + $0x60] sm:$0xff] %vm507_vm2, %v487_v48  ;;  %v690_v59 = vld [vmem:[#allocation2 + $0x21] sm:$0xff] }
  0xf2   : > { %v1012_v1 = vld [vmem:[#allocation2 + $0x1d] sm:$0xff]  ;;  %1328 = vmatpush.msra.mxu1 %v1234_v38 }
  0xf3   : > { %v626_v53 = vmul.f32 0.5, %v610_v51  ;;  %v884_v17 = vld [vmem:[#allocation2 + $0x23] sm:$0xff] }
  0xf4   : > { %v418_v54 = vpop.f32.mrf.mxu0  ;;  %v1257_v42 = vld [vmem:[%s3407_s3 + $0xc0] sm:$0xff] }
  0xf5   : > { %v419_v58 = vadd.f32 %v2573_v27, %v418_v54  ;;  %821 = vrot.lane.b32.xlu0 %v786_v55, %s2465_s8  ;;  %823 = vrot.lane.b32.xlu2 %v787_v56, %s2465_s8  ;;  %642 = vst.msk [vmem:[#allocation2 + $0x2b] sm:$0xff] %vm507_vm2, %v626_v53  ;;  %v1233_v44 = vld [vmem:[%s3407_s3] sm:$0xff]  ;;  %v1254_v53 = vld [vmem:[%s3407_s3 + $0xa8] sm:$0xff] }
  0xf6   : > { %726 = vrot.lane.b32.xlu1 %v690_v59, %s2464_s7  ;;  %1386 = vmatpush.msra.mxu2 %v1257_v42  ;;  %v1253_v56 = vld [vmem:[%s3407_s3 + $0xa0] sm:$0xff] }
  0xf7   : > { %v488_v61 = vmax.f32 %v419_v58, 0.0  ;;  %1329 = vmatpush.msra.mxu1 %v1233_v44 }
  0xf8   : > { %1387 = vmatpush.msra.mxu2 %v1256_v45 }
  0xf9   : > { %521 = vst.msk [vmem:[#allocation4 + $0x68] sm:$0xff] %vm507_vm2, %v488_v61 }
  0xfa   : > { %1388 = vmatpush.msra.mxu2 %v1255_v47 }
  0xfc   : > { %v421_v0 = vpop.f32.mrf.mxu0  ;;  %v1013_v2 = vld [vmem:[#allocation2 + $0x25] sm:$0xff]  ;;  %1389 = vmatpush.msra.mxu2 %v1254_v53 }
  0xfd   : > { %v788_v3 = vld [vmem:[#allocation2 + $0x2a] sm:$0xff]  ;;  %v422_v4 = vadd.f32 %v2573_v27, %v421_v0  ;;  %1047 = vrot.lane.b32.xlu0 %v1012_v1, %s2464_s7  ;;  %1049 = vrot.lane.b32.xlu2 %v1013_v2, %s2464_s7 }
  0xfe   : > { %825 = vrot.lane.b32.xlu1 %v788_v3, %s2465_s8  ;;  %v981_v7 = vld [vmem:[#allocation2 + $0x24] sm:$0xff]  ;;  %1390 = vmatpush.msra.mxu2 %v1253_v56 }
  0xff   : > { %v489_v8 = vmax.f32 %v422_v4, 0.0  ;;  %997 = vst.msk [vmem:[#allocation3 + $0x48] sm:$0xff] %vm507_vm2, %v981_v7  ;;  %v659_v9 = vld [vmem:[#allocation2 + $0x28] sm:$0xff] }
 0x100   : > { %v554_v10 = vld [vmem:[#allocation4 + $0x60] ss:$2 sm:$0xff]  ;;  %v586_v11 = vld [vmem:[#allocation4 + $0x61] ss:$2 sm:$0xff]  ;;  %675 = vst.msk [vmem:[#allocation3 + $0x50] sm:$0xff] %vm507_vm2, %v659_v9  ;;  %1391 = vmatpush.msra.mxu2 %v1252_v57  ;;  %v1249_v9 = vld [vmem:[%s3407_s3 + $0x80] sm:$0xff] }
 0x101   : > { %522 = vst.msk [vmem:[#allocation4 + $0x70] sm:$0xff] %vm507_vm2, %v489_v8  ;;  %v611_v13 = vadd.f32 %v586_v11, %v554_v10  ;;  %v885_v18 = vld [vmem:[#allocation2 + $0x2b] sm:$0xff] }
 0x102   : > { %v1109_v29 = vld [vmem:[#allocation2 + $0x26] sm:$0xff]  ;;  %1392 = vmatpush.msra.mxu2 %v1251_v63 }
 0x103   : > { %v627_v15 = vmul.f32 0.5, %v611_v13  ;;  %v691_v49 = vld [vmem:[#allocation2 + $0x29] sm:$0xff] }
 0x104   : > { %v424_v16 = vpop.f32.mrf.mxu0  ;;  %v1250_v4 = vld [vmem:[%s3407_s3 + $0x88] sm:$0xff] }
 0x105   : > { %v425_v20 = vadd.f32 %v2573_v27, %v424_v16  ;;  %920 = vrot.lane.b32.xlu0 %v884_v17, %s2463_s6  ;;  %922 = vrot.lane.b32.xlu2 %v885_v18, %s2463_s6  ;;  %643 = vst.msk [vmem:[#allocation2 + $0x33] sm:$0xff] %vm507_vm2, %v627_v15 }
 0x106   : > { %1393 = vmatpush.msra.mxu2 %v1250_v4 }
 0x107   : > { %v490_v22 = vmax.f32 %v425_v20, 0.0  ;;  %v913_v54 = vpop.permute.xlu2 %912 }
 0x108   : > { %1394 = vmatpush.msra.mxu2 %v1249_v9 }
 0x109   : > { %523 = vst.msk [vmem:[#allocation4 + $0x78] sm:$0xff] %vm507_vm2, %v490_v22 }
 0x10c   : > { %v427_v28 = vpop.f32.mrf.mxu0  ;;  %v1110_v30 = vld [vmem:[#allocation2 + $0x2e] sm:$0xff] }
 0x10d   : > { %v1014_v31 = vld [vmem:[#allocation2 + $0x2d] sm:$0xff]  ;;  %v428_v32 = vadd.f32 %v2573_v27, %v427_v28  ;;  %1145 = vrot.lane.b32.xlu0 %v1109_v29, %s2465_s8  ;;  %1147 = vrot.lane.b32.xlu2 %v1110_v30, %s2465_s8 }
 0x10e   : > { %1051 = vrot.lane.b32.xlu1 %v1014_v31, %s2464_s7  ;;  %v660_v36 = vld [vmem:[#allocation2 + $0x30] sm:$0xff] }
 0x10f   : > { %v491_v37 = vmax.f32 %v428_v32, 0.0  ;;  %676 = vst.msk [vmem:[#allocation3 + $0x60] sm:$0xff] %vm507_vm2, %v660_v36  ;;  %v982_v39 = vld [vmem:[#allocation2 + $0x2c] sm:$0xff] }
 0x110   : > { %v556_v40 = vld [vmem:[#allocation4 + $0x70] ss:$2 sm:$0xff]  ;;  %v588_v41 = vld [vmem:[#allocation4 + $0x71] ss:$2 sm:$0xff]  ;;  %998 = vst.msk [vmem:[#allocation3 + $0x58] sm:$0xff] %vm507_vm2, %v982_v39 }
 0x111   : > { %524 = vst.msk [vmem:[#allocation4 + $0x80] sm:$0xff] %vm507_vm2, %v491_v37  ;;  %v612_v43 = vadd.f32 %v588_v41, %v556_v40  ;;  %v692_v50 = vld [vmem:[#allocation2 + $0x31] sm:$0xff] }
 0x112   : > { %v886_v52 = vld [vmem:[#allocation2 + $0x33] sm:$0xff] }
 0x113   : > { %v628_v46 = vmul.f32 0.5, %v612_v43  ;;  %v789_v59 = vld [vmem:[#allocation2 + $0x32] sm:$0xff] }
 0x114   : > { %v430_v48 = vpop.f32.mrf.mxu0 }
 0x115   : > { %v431_v51 = vadd.f32 %v2573_v27, %v430_v48  ;;  %728 = vrot.lane.b32.xlu0 %v691_v49, %s2464_s7  ;;  %730 = vrot.lane.b32.xlu2 %v692_v50, %s2464_s7  ;;  %644 = vst.msk [vmem:[#allocation2 + $0x3b] sm:$0xff] %vm507_vm2, %v628_v46 }
 0x116   : > { %924 = vrot.lane.b32.xlu1 %v886_v52, %s2463_s6 }
 0x117   : > { %v492_v55 = vmax.f32 %v431_v51, 0.0 }
 0x118   : > { %v2795_v1 = vpop.permute.xlu2 %817 }
 0x119   : > { %525 = vst.msk [vmem:[#allocation4 + $0x88] sm:$0xff] %vm507_vm2, %v492_v55 }
 0x11c   : > { %v433_v58 = vpop.f32.mrf.mxu0  ;;  %v790_v60 = vld [vmem:[#allocation2 + $0x3a] sm:$0xff] }
 0x11d   : > { %v1111_v61 = vld [vmem:[#allocation2 + $0x36] sm:$0xff]  ;;  %v434_v62 = vadd.f32 %v2573_v27, %v433_v58  ;;  %827 = vrot.lane.b32.xlu0 %v789_v59, %s2465_s8  ;;  %829 = vrot.lane.b32.xlu2 %v790_v60, %s2465_s8 }
 0x11e   : > { %1149 = vrot.lane.b32.xlu1 %v1111_v61, %s2465_s8  ;;  %v983_v0 = vld [vmem:[#allocation2 + $0x34] sm:$0xff] }
 0x11f   : > { %v493_v2 = vmax.f32 %v434_v62, 0.0  ;;  %999 = vst.msk [vmem:[#allocation3 + $0x68] sm:$0xff] %vm507_vm2, %v983_v0  ;;  %v661_v5 = vld [vmem:[#allocation2 + $0x38] sm:$0xff] }
 0x120   : > { %v719_v3 = vpop.permute.xlu1 %718  ;;  %v558_v6 = vld [vmem:[#allocation4 + $0x80] ss:$2 sm:$0xff]  ;;  %v590_v7 = vld [vmem:[#allocation4 + $0x81] ss:$2 sm:$0xff]  ;;  %677 = vst.msk [vmem:[#allocation3 + $0x70] sm:$0xff] %vm507_vm2, %v661_v5  ;;  %v693_v14 = vld [vmem:[#allocation2 + $0x39] sm:$0xff] }
 0x121   : > { %767 = vst.msk [vmem:[#allocation3] sm:$0xff] %vm766_vm3, %v719_v3  ;;  %v613_v8 = vadd.f32 %v590_v7, %v558_v6  ;;  %v1015_v12 = vld [vmem:[#allocation2 + $0x35] sm:$0xff] }
 0x122   : > { %526 = vst.msk [vmem:[#allocation4 + $0x90] sm:$0xff] %vm507_vm2, %v493_v2  ;;  %v887_v19 = vld [vmem:[#allocation2 + $0x3b] sm:$0xff] }
 0x123   : > { %v629_v10 = vmul.f32 0.5, %v613_v8 }
 0x124   : > { %v436_v11 = vpop.f32.mrf.mxu0 }
 0x125   : > { %v437_v13 = vadd.f32 %v2573_v27, %v436_v11  ;;  %1053 = vrot.lane.b32.xlu0 %v1015_v12, %s2464_s7  ;;  %645 = vst.msk [vmem:[#allocation2 + $0x43] sm:$0xff] %vm507_vm2, %v629_v10 }
 0x126   : > { %732 = vrot.lane.b32.xlu1 %v693_v14, %s2464_s7 }
 0x127   : > { %v494_v15 = vmax.f32 %v437_v13, 0.0  ;;  %v1044_v16 = vpop.permute.xlu2 %1043 }
 0x128   : > { %v816_v17 = vpop.permute.xlu1 %815  ;;  %1090 = vst.msk [vmem:[#allocation3 + $0x18] sm:$0xff] %vm766_vm3, %v1044_v16 }
 0x129   : > { %527 = vst.msk [vmem:[#allocation4 + $0x98] sm:$0xff] %vm507_vm2, %v494_v15 }
 0x12a   : > { %864 = vst.msk [vmem:[#allocation3] sm:$0xff] %vm863_vm4, %v816_v17 }
 0x12b   : > { %961 = vst.msk [vmem:[#allocation3] sm:$0xff] %vm960_vm5, %v913_v54 }
 0x12c   : > { %v439_v18 = vpop.f32.mrf.mxu0  ;;  %v1016_v20 = vld [vmem:[#allocation2 + $0x3d] sm:$0xff] }
 0x12d   : > { %v791_v21 = vld [vmem:[#allocation2 + $0x42] sm:$0xff]  ;;  %v440_v22 = vadd.f32 %v2573_v27, %v439_v18  ;;  %926 = vrot.lane.b32.xlu0 %v887_v19, %s2463_s6  ;;  %1055 = vrot.lane.b32.xlu2 %v1016_v20, %s2464_s7 }
 0x12e   : > { %v984_v23 = vld [vmem:[#allocation2 + $0x3c] sm:$0xff]  ;;  %831 = vrot.lane.b32.xlu1 %v791_v21, %s2465_s8 }
 0x12f   : > { %1000 = vst.msk [vmem:[#allocation3 + $0x78] sm:$0xff] %vm507_vm2, %v984_v23  ;;  %v662_v24 = vld [vmem:[#allocation2 + $0x40] sm:$0xff]  ;;  %v495_v25 = vmax.f32 %v440_v22, 0.0  ;;  %v1042_v28 = vpop.permute.xlu0 %1041  ;;  %v2820_v29 = vpop.permute.xlu2 %916 }
 0x130   : > { %678 = vst.msk [vmem:[#allocation3 + $0x80] sm:$0xff] %vm507_vm2, %v662_v24  ;;  %v560_v30 = vld [vmem:[#allocation4 + $0x90] ss:$2 sm:$0xff]  ;;  %v592_v31 = vld [vmem:[#allocation4 + $0x91] ss:$2 sm:$0xff]  ;;  %v2824_v32 = vpop.permute.xlu1 %936 }
 0x131   : > { %1089 = vst.msk [vmem:[#allocation3 + $0x8] sm:$0xff] %vm766_vm3, %v1042_v28  ;;  %v614_v33 = vadd.f32 %v592_v31, %v560_v30  ;;  %v1112_v37 = vld [vmem:[#allocation2 + $0x3e] sm:$0xff] }
 0x132   : > { %528 = vst.msk [vmem:[#allocation4 + $0xa0] sm:$0xff] %vm507_vm2, %v495_v25  ;;  %v1201_v34 = vld [vmem:[#allocation3] sm:$0xff]  ;;  %v992_v18 = vld [vmem:[#allocation2 + $0x7c] sm:$0xff] }
 0x133   : > { %1330 = vmatmul.f32.vlgmr.msra.gmra.mxu1 %v1201_v34  ;;  %v630_v35 = vmul.f32 0.5, %v614_v33  ;;  %v888_v38 = vld [vmem:[#allocation2 + $0x43] sm:$0xff]  ;;  %1008 = vst.msk [vmem:[#allocation3 + $0xf8] sm:$0xff] %vm507_vm2, %v992_v18 }
 0x134   : > { %v442_v36 = vpop.f32.mrf.mxu0  ;;  %v694_v45 = vld [vmem:[#allocation2 + $0x41] sm:$0xff] }
 0x135   : > { %v443_v39 = vadd.f32 %v2573_v27, %v442_v36  ;;  %1151 = vrot.lane.b32.xlu0 %v1112_v37, %s2465_s8  ;;  %928 = vrot.lane.b32.xlu2 %v888_v38, %s2463_s6  ;;  %646 = vst.msk [vmem:[#allocation2 + $0x4b] sm:$0xff] %vm507_vm2, %v630_v35 }
 0x137   : > { %v496_v40 = vmax.f32 %v443_v39, 0.0  ;;  %v1138_v41 = vpop.permute.xlu0 %1137  ;;  %v1068_v42 = vpop.permute.xlu2 %1067 }
 0x138   : > { %1185 = vst.msk [vmem:[#allocation3 + $0x8] sm:$0xff] %vm863_vm4, %v1138_v41  ;;  %v721_v43 = vpop.permute.xlu1 %720 }
 0x139   : > { %529 = vst.msk [vmem:[#allocation4 + $0xa8] sm:$0xff] %vm507_vm2, %v496_v40 }
 0x13a   : > { %1102 = vst.msk [vmem:[#allocation3 + $0xd8] sm:$0xff] %vm766_vm3, %v1068_v42 }
 0x13b   : > { %768 = vst.msk [vmem:[#allocation3 + $0x10] sm:$0xff] %vm766_vm3, %v721_v43 }
 0x13c   : > { %865 = vst.msk [vmem:[#allocation3 + $0x10] sm:$0xff] %vm863_vm4, %v2795_v1  ;;  %v445_v44 = vpop.f32.mrf.mxu0  ;;  %v1113_v46 = vld [vmem:[#allocation2 + $0x46] sm:$0xff] }
 0x13d   : > { %v1017_v47 = vld [vmem:[#allocation2 + $0x45] sm:$0xff]  ;;  %v446_v48 = vadd.f32 %v2573_v27, %v445_v44  ;;  %734 = vrot.lane.b32.xlu0 %v694_v45, %s2464_s7  ;;  %1153 = vrot.lane.b32.xlu2 %v1113_v46, %s2465_s8 }
 0x13e   : > { %v663_v49 = vld [vmem:[#allocation2 + $0x48] sm:$0xff]  ;;  %1057 = vrot.lane.b32.xlu1 %v1017_v47, %s2464_s7 }
 0x13f   : > { %679 = vst.msk [vmem:[#allocation3 + $0x90] sm:$0xff] %vm507_vm2, %v663_v49  ;;  %v985_v50 = vld [vmem:[#allocation2 + $0x44] sm:$0xff]  ;;  %v497_v51 = vmax.f32 %v446_v48, 0.0  ;;  %v915_v52 = vpop.permute.xlu0 %914  ;;  %v1142_v53 = vpop.permute.xlu2 %1141  ;;  %v1202_v54 = vld [vmem:[#allocation3 + $0x8] sm:$0xff] }
 0x140   : > { %1001 = vst.msk [vmem:[#allocation3 + $0x88] sm:$0xff] %vm507_vm2, %v985_v50  ;;  %v562_v55 = vld [vmem:[#allocation4 + $0xa0] ss:$2 sm:$0xff]  ;;  %v594_v56 = vld [vmem:[#allocation4 + $0xa1] ss:$2 sm:$0xff]  ;;  %v1162_v57 = vpop.permute.xlu1 %1161  ;;  %2347 = vmatmul.msk.f32.vlgmr.msra.gmra.mxu2 %vm1265_vm6, %v1202_v54 }
 0x141   : > { %962 = vst.msk [vmem:[#allocation3 + $0x10] sm:$0xff] %vm960_vm5, %v915_v52  ;;  %v615_v58 = vadd.f32 %v594_v56, %v562_v55  ;;  %v792_v61 = vld [vmem:[#allocation2 + $0x4a] sm:$0xff] }
 0x142   : > { %530 = vst.msk [vmem:[#allocation4 + $0xb0] sm:$0xff] %vm507_vm2, %v497_v51  ;;  %v695_v62 = vld [vmem:[#allocation2 + $0x49] sm:$0xff] }
 0x143   : > { %1517 = vst.msk [vmem:[#allocation2 + $0x43] sm:$0x7] %vm540_vm1, %v2462_v26  ;;  %v631_v59 = vmul.f32 0.5, %v615_v58  ;;  %v889_v0 = vld [vmem:[#allocation2 + $0x4b] sm:$0xff] }
 0x144   : > { %v448_v60 = vpop.f32.mrf.mxu0  ;;  %v893_v45 = vld [vmem:[#allocation2 + $0x6b] sm:$0xff] }
 0x145   : > { %v449_v63 = vadd.f32 %v2573_v27, %v448_v60  ;;  %833 = vrot.lane.b32.xlu0 %v792_v61, %s2465_s8  ;;  %736 = vrot.lane.b32.xlu2 %v695_v62, %s2464_s7  ;;  %647 = vst.msk [vmem:[#allocation2 + $0x53] sm:$0xff] %vm507_vm2, %v631_v59  ;;  %v796_v46 = vld [vmem:[#allocation2 + $0x6a] sm:$0xff]  ;;  %v797_v59 = vld [vmem:[#allocation2 + $0x72] sm:$0xff] }
 0x146   : > { %930 = vrot.lane.b32.xlu1 %v889_v0, %s2463_s6  ;;  %v699_v47 = vld [vmem:[#allocation2 + $0x69] sm:$0xff]  ;;  %v1024_v0 = vld [vmem:[#allocation2 + $0x7d] sm:$0xff] }
 0x147   : > { %v498_v1 = vmax.f32 %v449_v63, 0.0  ;;  %v1066_v2 = vpop.permute.xlu0 %1065  ;;  %v725_v3 = vpop.permute.xlu2 %724 }
 0x148   : > { %v1203_v4 = vld [vmem:[#allocation3 + $0x10] sm:$0xff]  ;;  %1101 = vst.msk [vmem:[#allocation3 + $0xc8] sm:$0xff] %vm766_vm3, %v1066_v2  ;;  %v820_v5 = vpop.permute.xlu1 %819 }
 0x149   : > { %1333 = vmatmul.f32.gmra.mxu1 %v1203_v4  ;;  %531 = vst.msk [vmem:[#allocation4 + $0xb8] sm:$0xff] %vm507_vm2, %v498_v1  ;;  %v1119_v1 = vld [vmem:[#allocation2 + $0x76] sm:$0xff]  ;;  %v1120_v2 = vld [vmem:[#allocation2 + $0x7e] sm:$0xff] }
 0x14a   : > { %1197 = vst.msk [vmem:[#allocation3 + $0xc8] sm:$0xff] %vm863_vm4, %v1162_v57  ;;  %v700_v57 = vld [vmem:[#allocation2 + $0x71] sm:$0xff] }
 0x14b   : > { %770 = vst.msk [vmem:[#allocation3 + $0x30] sm:$0xff] %vm766_vm3, %v725_v3 }
 0x14c   : > { %v1018_v27 = vld [vmem:[#allocation2 + $0x4d] sm:$0xff] }
 0x14d   : > { %v793_v6 = vld [vmem:[#allocation2 + $0x52] sm:$0xff]  ;;  %1059 = vrot.lane.b32.xlu0 %v1018_v27, %s2464_s7 }
 0x14e   : > { %v1114_v7 = vld [vmem:[#allocation2 + $0x4e] sm:$0xff]  ;;  %835 = vrot.lane.b32.xlu2 %v793_v6, %s2465_s8  ;;  %v798_v6 = vld [vmem:[#allocation2 + $0x7a] sm:$0xff] }
 0x14f   : > { %v986_v8 = vld [vmem:[#allocation2 + $0x4c] sm:$0xff]  ;;  %1155 = vrot.lane.b32.xlu1 %v1114_v7, %s2465_s8  ;;  %v1140_v10 = vpop.permute.xlu0 %1139  ;;  %v824_v11 = vpop.permute.xlu2 %823 }
 0x150   : > { %1002 = vst.msk [vmem:[#allocation3 + $0x98] sm:$0xff] %vm507_vm2, %v986_v8  ;;  %v664_v9 = vld [vmem:[#allocation2 + $0x50] sm:$0xff]  ;;  %v564_v12 = vld [vmem:[#allocation4 + $0xb0] ss:$2 sm:$0xff]  ;;  %v596_v13 = vld [vmem:[#allocation4 + $0xb1] ss:$2 sm:$0xff]  ;;  %v1046_v14 = vpop.permute.xlu1 %1045 }
 0x151   : > { %680 = vst.msk [vmem:[#allocation3 + $0xa0] sm:$0xff] %vm507_vm2, %v664_v9  ;;  %v616_v15 = vadd.f32 %v596_v13, %v564_v12  ;;  %v890_v17 = vld [vmem:[#allocation2 + $0x53] sm:$0xff]  ;;  %v895_v8 = vld [vmem:[#allocation2 + $0x7b] sm:$0xff] }
 0x152   : > { %1186 = vst.msk [vmem:[#allocation3 + $0x18] sm:$0xff] %vm863_vm4, %v1140_v10  ;;  %v696_v19 = vld [vmem:[#allocation2 + $0x51] sm:$0xff] }
 0x153   : > { %1091 = vst.msk [vmem:[#allocation3 + $0x28] sm:$0xff] %vm766_vm3, %v1046_v14  ;;  %v632_v16 = vmul.f32 0.5, %v616_v15  ;;  %v894_v7 = vld [vmem:[#allocation2 + $0x73] sm:$0xff] }
 0x154   : > { %1187 = vst.msk [vmem:[#allocation3 + $0x28] sm:$0xff] %vm863_vm4, %v1142_v53  ;;  %v1023_v53 = vld [vmem:[#allocation2 + $0x75] sm:$0xff] }
 0x155   : > { %932 = vrot.lane.b32.xlu0 %v890_v17, %s2463_s6  ;;  %648 = vst.msk [vmem:[#allocation2 + $0x5b] sm:$0xff] %vm507_vm2, %v632_v16  ;;  %v701_v14 = vld [vmem:[#allocation2 + $0x79] sm:$0xff] }
 0x157   : > { %738 = vrot.lane.b32.xlu1 %v696_v19, %s2464_s7  ;;  %v723_v20 = vpop.permute.xlu0 %722  ;;  %v1050_v21 = vpop.permute.xlu2 %1049 }
 0x158   : > { %769 = vst.msk [vmem:[#allocation3 + $0x20] sm:$0xff] %vm766_vm3, %v723_v20  ;;  %v919_v23 = vpop.permute.xlu1 %918 }
 0x159   : > { %v1204_v22 = vld [vmem:[#allocation3 + $0x18] sm:$0xff]  ;;  %866 = vst.msk [vmem:[#allocation3 + $0x20] sm:$0xff] %vm863_vm4, %v820_v5 }
 0x15a   : > { %2348 = vmatmul.msk.f32.gmra.mxu2 %vm1265_vm6, %v1204_v22  ;;  %963 = vst.msk [vmem:[#allocation3 + $0x20] sm:$0xff] %vm960_vm5, %v2820_v29 }
 0x15b   : > { %1093 = vst.msk [vmem:[#allocation3 + $0x48] sm:$0xff] %vm766_vm3, %v1050_v21  ;;  %v1206_v33 = vld [vmem:[#allocation3 + $0x28] sm:$0xff] }
 0x15c   : > { %v1115_v24 = vld [vmem:[#allocation2 + $0x56] sm:$0xff]  ;;  %v666_v38 = vld [vmem:[#allocation2 + $0x60] sm:$0xff] }
 0x15d   : > { %v1019_v25 = vld [vmem:[#allocation2 + $0x55] sm:$0xff]  ;;  %v1020_v28 = vld [vmem:[#allocation2 + $0x5d] sm:$0xff]  ;;  %1157 = vrot.lane.b32.xlu0 %v1115_v24, %s2465_s8  ;;  %682 = vst.msk [vmem:[#allocation3 + $0xc0] sm:$0xff] %vm507_vm2, %v666_v38 }
 0x15e   : > { %1061 = vrot.lane.b32.xlu2 %v1019_v25, %s2464_s7  ;;  %v987_v34 = vld [vmem:[#allocation2 + $0x54] sm:$0xff]  ;;  %v988_v35 = vld [vmem:[#allocation2 + $0x5c] sm:$0xff] }
 0x15f   : > { %1063 = vrot.lane.b32.xlu1 %v1020_v28, %s2464_s7  ;;  %v1164_v30 = vpop.permute.xlu0 %1163  ;;  %v2878_v31 = vpop.permute.xlu2 %922  ;;  %v665_v36 = vld [vmem:[#allocation2 + $0x58] sm:$0xff]  ;;  %1003 = vst.msk [vmem:[#allocation3 + $0xa8] sm:$0xff] %vm507_vm2, %v987_v34  ;;  %v795_v51 = vld [vmem:[#allocation2 + $0x62] sm:$0xff] }
 0x160   : > { %1198 = vst.msk [vmem:[#allocation3 + $0xd8] sm:$0xff] %vm863_vm4, %v1164_v30  ;;  %v1144_v29 = vpop.permute.xlu1 %1143  ;;  %v697_v39 = vld [vmem:[#allocation2 + $0x59] sm:$0xff]  ;;  %v698_v58 = vld [vmem:[#allocation2 + $0x61] sm:$0xff] }
 0x161   : > { %v1205_v37 = vld [vmem:[#allocation3 + $0x20] sm:$0xff]  ;;  %1004 = vst.msk [vmem:[#allocation3 + $0xb8] sm:$0xff] %vm507_vm2, %v988_v35  ;;  %v1116_v40 = vld [vmem:[#allocation2 + $0x5e] sm:$0xff] }
 0x162   : > { %2349 = vmatmul.msk.f32.gmra.mxu2 %vm1265_vm6, %v1206_v33  ;;  %1336 = vmatmul.f32.gmra.mxu1 %v1205_v37  ;;  %681 = vst.msk [vmem:[#allocation3 + $0xb0] sm:$0xff] %vm507_vm2, %v665_v36  ;;  %v794_v41 = vld [vmem:[#allocation2 + $0x5a] sm:$0xff] }
 0x163   : > { %v891_v52 = vld [vmem:[#allocation2 + $0x5b] sm:$0xff] }
 0x164   : > { %v2947_v37 = vld [vmem:[%s3408_s4] ss:$0 sm:$0xff] }
 0x165   : > { %740 = vrot.lane.b32.xlu0 %v697_v39, %s2464_s7 }
 0x166   : > { %1159 = vrot.lane.b32.xlu2 %v1116_v40, %s2465_s8 }
 0x167   : > { %837 = vrot.lane.b32.xlu1 %v794_v41, %s2465_s8  ;;  %v822_v42 = vpop.permute.xlu0 %821  ;;  %v1148_v43 = vpop.permute.xlu2 %1147 }
 0x168   : > { %867 = vst.msk [vmem:[#allocation3 + $0x30] sm:$0xff] %vm863_vm4, %v822_v42  ;;  %v727_v44 = vpop.permute.xlu1 %726 }
 0x169   : > { %964 = vst.msk [vmem:[#allocation3 + $0x30] sm:$0xff] %vm960_vm5, %v919_v23 }
 0x16a   : > { %771 = vst.msk [vmem:[#allocation3 + $0x40] sm:$0xff] %vm766_vm3, %v727_v44 }
 0x16b   : > { %868 = vst.msk [vmem:[#allocation3 + $0x40] sm:$0xff] %vm863_vm4, %v824_v11 }
 0x16d   : > { %938 = vrot.lane.b32.xlu0 %v893_v45, %s2463_s6 }
 0x16e   : > { %841 = vrot.lane.b32.xlu2 %v796_v46, %s2465_s8 }
 0x16f   : > { %744 = vrot.lane.b32.xlu1 %v699_v47, %s2464_s7  ;;  %v1048_v48 = vpop.permute.xlu0 %1047  ;;  %v731_v49 = vpop.permute.xlu2 %730 }
 0x170   : > { %1092 = vst.msk [vmem:[#allocation3 + $0x38] sm:$0xff] %vm766_vm3, %v1048_v48  ;;  %v1207_v50 = vld [vmem:[#allocation3 + $0x30] sm:$0xff]  ;;  %v826_v55 = vpop.permute.xlu1 %825 }
 0x171   : > { %1188 = vst.msk [vmem:[#allocation3 + $0x38] sm:$0xff] %vm863_vm4, %v1144_v29  ;;  %1339 = vmatmul.f32.gmra.mxu1 %v1207_v50 }
 0x172   : > { %773 = vst.msk [vmem:[#allocation3 + $0x60] sm:$0xff] %vm766_vm3, %v731_v49 }
 0x175   : > { %839 = vrot.lane.b32.xlu0 %v795_v51, %s2465_s8 }
 0x176   : > { %934 = vrot.lane.b32.xlu2 %v891_v52, %s2463_s6 }
 0x177   : > { %1069 = vrot.lane.b32.xlu1 %v1023_v53, %s2464_s7  ;;  %v921_v54 = vpop.permute.xlu0 %920  ;;  %v830_v60 = vpop.permute.xlu2 %829 }
 0x178   : > { %965 = vst.msk [vmem:[#allocation3 + $0x40] sm:$0xff] %vm960_vm5, %v921_v54  ;;  %v1208_v56 = vld [vmem:[#allocation3 + $0x38] sm:$0xff] }
 0x179   : > { %2350 = vmatmul.msk.f32.gmra.mxu2 %vm1265_vm6, %v1208_v56 }
 0x17d   : > { %746 = vrot.lane.b32.xlu0 %v700_v57, %s2464_s7 }
 0x17e   : > { %742 = vrot.lane.b32.xlu2 %v698_v58, %s2464_s7 }
 0x17f   : > { %843 = vrot.lane.b32.xlu1 %v797_v59, %s2465_s8  ;;  %v1146_v61 = vpop.permute.xlu0 %1145  ;;  %v1209_v62 = vld [vmem:[#allocation3 + $0x40] sm:$0xff] }
 0x180   : > { %1189 = vst.msk [vmem:[#allocation3 + $0x48] sm:$0xff] %vm863_vm4, %v1146_v61  ;;  %v1052_v63 = vpop.permute.xlu1 %1051  ;;  %1342 = vmatmul.f32.gmra.mxu1 %v1209_v62 }
 0x181   : > { %1094 = vst.msk [vmem:[#allocation3 + $0x58] sm:$0xff] %vm766_vm3, %v1052_v63 }
 0x182   : > { %1190 = vst.msk [vmem:[#allocation3 + $0x58] sm:$0xff] %vm863_vm4, %v1148_v43 }
 0x185   : > { %1071 = vrot.lane.b32.xlu0 %v1024_v0, %s2464_s7 }
 0x186   : > { %1165 = vrot.lane.b32.xlu2 %v1119_v1, %s2465_s8 }
 0x187   : > { %1167 = vrot.lane.b32.xlu1 %v1120_v2, %s2465_s8  ;;  %v729_v3 = vpop.permute.xlu0 %728  ;;  %v1056_v4 = vpop.permute.xlu2 %1055  ;;  %v1210_v5 = vld [vmem:[#allocation3 + $0x48] sm:$0xff] }
 0x188   : > { %772 = vst.msk [vmem:[#allocation3 + $0x50] sm:$0xff] %vm766_vm3, %v729_v3  ;;  %v925_v27 = vpop.permute.xlu1 %924  ;;  %2351 = vmatmul.msk.f32.gmra.mxu2 %vm1265_vm6, %v1210_v5 }
 0x189   : > { %869 = vst.msk [vmem:[#allocation3 + $0x50] sm:$0xff] %vm863_vm4, %v826_v55  ;;  %v1212_v11 = vld [vmem:[#allocation3 + $0x58] sm:$0xff] }
 0x18a   : > { %966 = vst.msk [vmem:[#allocation3 + $0x50] sm:$0xff] %vm960_vm5, %v2878_v31 }
 0x18b   : > { %1096 = vst.msk [vmem:[#allocation3 + $0x78] sm:$0xff] %vm766_vm3, %v1056_v4 }
 0x18d   : > { %845 = vrot.lane.b32.xlu0 %v798_v6, %s2465_s8 }
 0x18e   : > { %940 = vrot.lane.b32.xlu2 %v894_v7, %s2463_s6 }
 0x18f   : > { %942 = vrot.lane.b32.xlu1 %v895_v8, %s2463_s6  ;;  %v828_v9 = vpop.permute.xlu0 %827  ;;  %v929_v10 = vpop.permute.xlu2 %928 }
 0x190   : > { %870 = vst.msk [vmem:[#allocation3 + $0x60] sm:$0xff] %vm863_vm4, %v828_v9  ;;  %v1150_v12 = vpop.permute.xlu1 %1149  ;;  %2352 = vmatmul.msk.f32.gmra.mxu2 %vm1265_vm6, %v1212_v11 }
 0x191   : > { %967 = vst.msk [vmem:[#allocation3 + $0x60] sm:$0xff] %vm960_vm5, %v925_v27  ;;  %v1211_v13 = vld [vmem:[#allocation3 + $0x50] sm:$0xff] }
 0x192   : > { %1345 = vmatmul.f32.gmra.mxu1 %v1211_v13  ;;  %v1226_v13 = vld [vmem:[#allocation3 + $0xc8] sm:$0xff] }
 0x196   : > { %748 = vrot.lane.b32.xlu2 %v701_v14, %s2464_s7 }
 0x197   : > { %v1054_v15 = vpop.permute.xlu0 %1053  ;;  %v1154_v16 = vpop.permute.xlu2 %1153 }
 0x198   : > { %1095 = vst.msk [vmem:[#allocation3 + $0x68] sm:$0xff] %vm766_vm3, %v1054_v15  ;;  %v733_v17 = vpop.permute.xlu1 %732  ;;  %v1213_v18 = vld [vmem:[#allocation3 + $0x60] sm:$0xff] }
 0x199   : > { %1191 = vst.msk [vmem:[#allocation3 + $0x68] sm:$0xff] %vm863_vm4, %v1150_v12 }
 0x19a   : > { %774 = vst.msk [vmem:[#allocation3 + $0x70] sm:$0xff] %vm766_vm3, %v733_v17  ;;  %1348 = vmatmul.f32.gmra.mxu1 %v1213_v18 }
 0x19b   : > { %871 = vst.msk [vmem:[#allocation3 + $0x70] sm:$0xff] %vm863_vm4, %v830_v60 }
 0x19f   : > { %v927_v19 = vpop.permute.xlu0 %926  ;;  %v737_v20 = vpop.permute.xlu2 %736 }
 0x1a0   : > { %968 = vst.msk [vmem:[#allocation3 + $0x70] sm:$0xff] %vm960_vm5, %v927_v19  ;;  %v1214_v21 = vld [vmem:[#allocation3 + $0x68] sm:$0xff]  ;;  %v832_v24 = vpop.permute.xlu1 %831  ;;  %v1228_v19 = vld [vmem:[#allocation3 + $0xd8] sm:$0xff] }
 0x1a1   : > { %776 = vst.msk [vmem:[#allocation3 + $0x90] sm:$0xff] %vm766_vm3, %v737_v20  ;;  %2353 = vmatmul.msk.f32.gmra.mxu2 %vm1265_vm6, %v1214_v21 }
 0x1a7   : > { %v1152_v22 = vpop.permute.xlu0 %1151  ;;  %v1215_v23 = vld [vmem:[#allocation3 + $0x70] sm:$0xff] }
 0x1a8   : > { %1192 = vst.msk [vmem:[#allocation3 + $0x78] sm:$0xff] %vm863_vm4, %v1152_v22  ;;  %1351 = vmatmul.f32.gmra.mxu1 %v1215_v23  ;;  %v836_v25 = vpop.permute.xlu2 %835 }
 0x1af   : > { %v735_v28 = vpop.permute.xlu0 %734  ;;  %v1216_v30 = vld [vmem:[#allocation3 + $0x78] sm:$0xff] }
 0x1b0   : > { %775 = vst.msk [vmem:[#allocation3 + $0x80] sm:$0xff] %vm766_vm3, %v735_v28  ;;  %v1058_v31 = vpop.permute.xlu1 %1057  ;;  %2354 = vmatmul.msk.f32.gmra.mxu2 %vm1265_vm6, %v1216_v30  ;;  %v1331_v38 = vpop.f32.mrf.mxu1 }
 0x1b1   : > { %872 = vst.msk [vmem:[#allocation3 + $0x80] sm:$0xff] %vm863_vm4, %v832_v24  ;;  %v1332_v43 = vadd.f32 %v2947_v37, %v1331_v38 }
 0x1b2   : > { %969 = vst.msk [vmem:[#allocation3 + $0x80] sm:$0xff] %vm960_vm5, %v929_v10 }
 0x1b3   : > { %1097 = vst.msk [vmem:[#allocation3 + $0x88] sm:$0xff] %vm766_vm3, %v1058_v31 }
 0x1b4   : > { %1193 = vst.msk [vmem:[#allocation3 + $0x88] sm:$0xff] %vm863_vm4, %v1154_v16 }
 0x1b7   : > { %v834_v33 = vpop.permute.xlu0 %833 }
 0x1b8   : > { %v1062_v34 = vpop.permute.xlu2 %1061  ;;  %873 = vst.msk [vmem:[#allocation3 + $0x90] sm:$0xff] %vm863_vm4, %v834_v33  ;;  %v931_v35 = vpop.permute.xlu1 %930 }
 0x1b9   : > { %1099 = vst.msk [vmem:[#allocation3 + $0xa8] sm:$0xff] %vm766_vm3, %v1062_v34  ;;  %v1217_v29 = vld [vmem:[#allocation3 + $0x80] sm:$0xff] }
 0x1ba   : > { %970 = vst.msk [vmem:[#allocation3 + $0x90] sm:$0xff] %vm960_vm5, %v931_v35  ;;  %1354 = vmatmul.f32.gmra.mxu1 %v1217_v29 }
 0x1bb   : > { %v1218_v36 = vld [vmem:[#allocation3 + $0x88] sm:$0xff] }
 0x1bc   : > { %2355 = vmatmul.msk.f32.gmra.mxu2 %vm1265_vm6, %v1218_v36 }
 0x1bf   : > { %v1060_v39 = vpop.permute.xlu0 %1059 }
 0x1c0   : > { %v1160_v40 = vpop.permute.xlu2 %1159  ;;  %1098 = vst.msk [vmem:[#allocation3 + $0x98] sm:$0xff] %vm766_vm3, %v1060_v39 }
 0x1c1   : > { %v1156_v41 = vpop.permute.xlu1 %1155  ;;  %v1219_v42 = vld [vmem:[#allocation3 + $0x90] sm:$0xff] }
 0x1c2   : > { %1194 = vst.msk [vmem:[#allocation3 + $0x98] sm:$0xff] %vm863_vm4, %v1156_v41  ;;  %1357 = vmatmul.f32.gmra.mxu1 %v1219_v42 }
 0x1c3   : > { %v1396_v44 = vpop.f32.mrf.mxu2 }
 0x1c4   : > { %v1397_v45 = vadd.f32 %v1396_v44, %v1332_v43 }
 0x1c6   : > { %v1444_v46 = vmax.f32 %v1397_v45, 0.0  ;;  %v1334_v55 = vpop.f32.mrf.mxu1 }
 0x1c7   : > { %v933_v47 = vpop.permute.xlu0 %932  ;;  %v1335_v60 = vadd.f32 %v2947_v37, %v1334_v55 }
 0x1c8   : > { %v842_v48 = vpop.permute.xlu2 %841  ;;  %1460 = vst.msk [vmem:[#allocation4] sm:$0xff] %vm507_vm2, %v1444_v46 }
 0x1c9   : > { %v739_v49 = vpop.permute.xlu1 %738  ;;  %v1220_v50 = vld [vmem:[#allocation3 + $0x98] sm:$0xff] }
 0x1ca   : > { %777 = vst.msk [vmem:[#allocation3 + $0xa0] sm:$0xff] %vm766_vm3, %v739_v49  ;;  %2356 = vmatmul.msk.f32.gmra.mxu2 %vm1265_vm6, %v1220_v50 }
 0x1cb   : > { %874 = vst.msk [vmem:[#allocation3 + $0xa0] sm:$0xff] %vm863_vm4, %v836_v25 }
 0x1cc   : > { %971 = vst.msk [vmem:[#allocation3 + $0xa0] sm:$0xff] %vm960_vm5, %v933_v47 }
 0x1cf   : > { %v1158_v51 = vpop.permute.xlu0 %1157 }
 0x1d0   : > { %v935_v52 = vpop.permute.xlu2 %934  ;;  %1195 = vst.msk [vmem:[#allocation3 + $0xa8] sm:$0xff] %vm863_vm4, %v1158_v51 }
 0x1d1   : > { %v1064_v53 = vpop.permute.xlu1 %1063 }
 0x1d2   : > { %1100 = vst.msk [vmem:[#allocation3 + $0xb8] sm:$0xff] %vm766_vm3, %v1064_v53 }
 0x1d3   : > { %1196 = vst.msk [vmem:[#allocation3 + $0xb8] sm:$0xff] %vm863_vm4, %v1160_v40  ;;  %v1221_v54 = vld [vmem:[#allocation3 + $0xa0] sm:$0xff] }
 0x1d4   : > { %1360 = vmatmul.f32.gmra.mxu1 %v1221_v54 }
 0x1d7   : > { %v741_v56 = vpop.permute.xlu0 %740  ;;  %v1222_v58 = vld [vmem:[#allocation3 + $0xa8] sm:$0xff] }
 0x1d8   : > { %v743_v57 = vpop.permute.xlu2 %742  ;;  %778 = vst.msk [vmem:[#allocation3 + $0xb0] sm:$0xff] %vm766_vm3, %v741_v56  ;;  %2357 = vmatmul.msk.f32.gmra.mxu2 %vm1265_vm6, %v1222_v58 }
 0x1d9   : > { %v838_v59 = vpop.permute.xlu1 %837  ;;  %779 = vst.msk [vmem:[#allocation3 + $0xc0] sm:$0xff] %vm766_vm3, %v743_v57 }
 0x1da   : > { %875 = vst.msk [vmem:[#allocation3 + $0xb0] sm:$0xff] %vm863_vm4, %v838_v59  ;;  %v1224_v2 = vld [vmem:[#allocation3 + $0xb8] sm:$0xff] }
 0x1db   : > { %972 = vst.msk [vmem:[#allocation3 + $0xb0] sm:$0xff] %vm960_vm5, %v935_v52 }
 0x1dd   : > { %v1399_v61 = vpop.f32.mrf.mxu2 }
 0x1de   : > { %v1400_v62 = vadd.f32 %v1399_v61, %v1335_v60 }
 0x1df   : > { %v939_v0 = vpop.permute.xlu0 %938  ;;  %v1337_v4 = vpop.f32.mrf.mxu1 }
 0x1e0   : > { %v1445_v63 = vmax.f32 %v1400_v62, 0.0  ;;  %v1166_v1 = vpop.permute.xlu2 %1165  ;;  %2358 = vmatmul.msk.f32.gmra.mxu2 %vm1265_vm6, %v1224_v2  ;;  %v1338_v5 = vadd.f32 %v2947_v37, %v1337_v4 }
 0x1e1   : > { %v745_v3 = vpop.permute.xlu1 %744 }
 0x1e2   : > { %1461 = vst.msk [vmem:[#allocation4 + $0x8] sm:$0xff] %vm507_vm2, %v1445_v63  ;;  %v1223_v27 = vld [vmem:[#allocation3 + $0xb0] sm:$0xff] }
 0x1e3   : > { %780 = vst.msk [vmem:[#allocation3 + $0xd0] sm:$0xff] %vm766_vm3, %v745_v3  ;;  %1363 = vmatmul.f32.gmra.mxu1 %v1223_v27 }
 0x1e4   : > { %877 = vst.msk [vmem:[#allocation3 + $0xd0] sm:$0xff] %vm863_vm4, %v842_v48 }
 0x1e5   : > { %974 = vst.msk [vmem:[#allocation3 + $0xd0] sm:$0xff] %vm960_vm5, %v939_v0  ;;  %v1402_v6 = vpop.f32.mrf.mxu2 }
 0x1e6   : > { %v1403_v7 = vadd.f32 %v1402_v6, %v1338_v5 }
 0x1e7   : > { %v840_v11 = vpop.permute.xlu0 %839 }
 0x1e8   : > { %v1446_v8 = vmax.f32 %v1403_v7, 0.0  ;;  %v941_v12 = vpop.permute.xlu2 %940  ;;  %2359 = vmatmul.msk.f32.gmra.mxu2 %vm1265_vm6, %v1226_v13  ;;  %876 = vst.msk [vmem:[#allocation3 + $0xc0] sm:$0xff] %vm863_vm4, %v840_v11 }
 0x1e9   : > { %v1477_v9 = vld [vmem:[#allocation4] ss:$2 sm:$0xff]  ;;  %v1485_v10 = vld [vmem:[#allocation4 + $0x1] ss:$2 sm:$0xff]  ;;  %v1070_v15 = vpop.permute.xlu1 %1069  ;;  %973 = vst.msk [vmem:[#allocation3 + $0xc0] sm:$0xff] %vm960_vm5, %v2824_v32 }
 0x1ea   : > { %v1493_v14 = vadd.f32 %v1485_v10, %v1477_v9  ;;  %1462 = vst.msk [vmem:[#allocation4 + $0x10] sm:$0xff] %vm507_vm2, %v1446_v8 }
 0x1eb   : > { %1103 = vst.msk [vmem:[#allocation3 + $0xe8] sm:$0xff] %vm766_vm3, %v1070_v15 }
 0x1ec   : > { %v1501_v16 = vmul.f32 0.5, %v1493_v14  ;;  %1199 = vst.msk [vmem:[#allocation3 + $0xe8] sm:$0xff] %vm863_vm4, %v1166_v1  ;;  %v1227_v33 = vld [vmem:[#allocation3 + $0xd0] sm:$0xff] }
 0x1ee   : > { %1509 = vst.msk [vmem:[#allocation2 + $0x3] sm:$0xff] %vm507_vm2, %v1501_v16  ;;  %v1340_v30 = vpop.f32.mrf.mxu1  ;;  %v2378_v16 = vld [vmem:[%s3407_s3 + $0x158] sm:$0xff] }
 0x1ef   : > { %v747_v17 = vpop.permute.xlu0 %746  ;;  %v1341_v34 = vadd.f32 %v2947_v37, %v1340_v30  ;;  %1864 = vmatpush.msrb.mxu3 %v2378_v16  ;;  %v2373_v30 = vld [vmem:[%s3407_s3 + $0x130] sm:$0xff] }
 0x1f0   : > { %v749_v18 = vpop.permute.xlu2 %748  ;;  %781 = vst.msk [vmem:[#allocation3 + $0xe0] sm:$0xff] %vm766_vm3, %v747_v17  ;;  %2360 = vmatmul.msk.f32.gmra.mxu2 %vm1265_vm6, %v1228_v19  ;;  %v1225_v21 = vld [vmem:[#allocation3 + $0xc0] sm:$0xff]  ;;  %v2377_v17 = vld [vmem:[%s3407_s3 + $0x150] sm:$0xff] }
 0x1f1   : > { %v844_v20 = vpop.permute.xlu1 %843  ;;  %782 = vst.msk [vmem:[#allocation3 + $0xf0] sm:$0xff] %vm766_vm3, %v749_v18  ;;  %1366 = vmatmul.f32.gmra.mxu1 %v1225_v21  ;;  %1865 = vmatpush.msrb.mxu3 %v2377_v17  ;;  %v2376_v19 = vld [vmem:[%s3407_s3 + $0x148] sm:$0xff]  ;;  %v2374_v21 = vld [vmem:[%s3407_s3 + $0x138] sm:$0xff] }
 0x1f2   : > { %878 = vst.msk [vmem:[#allocation3 + $0xe0] sm:$0xff] %vm863_vm4, %v844_v20  ;;  %v2375_v20 = vld [vmem:[%s3407_s3 + $0x140] sm:$0xff] }
 0x1f3   : > { %975 = vst.msk [vmem:[#allocation3 + $0xe0] sm:$0xff] %vm960_vm5, %v941_v12  ;;  %v1230_v28 = vld [vmem:[#allocation3 + $0xe8] sm:$0xff]  ;;  %1866 = vmatpush.msrb.mxu3 %v2376_v19 }
 0x1f5   : > { %v1630_v32 = vld [vmem:[#allocation2 + $0x3] sm:$0xff]  ;;  %1867 = vmatpush.msrb.mxu3 %v2375_v20 }
 0x1f6   : > { %v1582_v22 = vld [vmem:[#allocation2 + $0x2] sm:$0xff]  ;;  %1646 = vrot.lane.b32.xlu1 %v1630_v32, %s2463_s6 }
 0x1f7   : > { %v1534_v23 = vld [vmem:[#allocation2 + $0x1] sm:$0xff]  ;;  %1598 = vrot.lane.b32.xlu0 %v1582_v22, %s2465_s8  ;;  %v1072_v25 = vpop.permute.xlu0 %1071  ;;  %1868 = vmatpush.msrb.mxu3 %v2374_v21 }
 0x1f8   : > { %v1518_v24 = vld [vmem:[#allocation2] sm:$0xff]  ;;  %1550 = vrot.lane.b32.xlu2 %v1534_v23, %s2464_s7  ;;  %1104 = vst.msk [vmem:[#allocation3 + $0xf8] sm:$0xff] %vm766_vm3, %v1072_v25  ;;  %2361 = vmatmul.msk.f32.gmra.mxu2 %vm1265_vm6, %v1230_v28 }
 0x1f9   : > { %1526 = vst.msk [vmem:[#allocation3] sm:$0xff] %vm507_vm2, %v1518_v24  ;;  %v1168_v31 = vpop.permute.xlu1 %1167  ;;  %1369 = vmatmul.f32.gmra.mxu1 %v1227_v33  ;;  %1869 = vmatpush.msrb.mxu3 %v2373_v30 }
 0x1fa   : > { %1962 = vst.msk [vmem:[#allocation2] sm:$0x7] %vm540_vm1, %v2462_v26  ;;  %v1229_v41 = vld [vmem:[#allocation3 + $0xe0] sm:$0xff] }
 0x1fb   : > { %1200 = vst.msk [vmem:[#allocation3 + $0xf8] sm:$0xff] %vm863_vm4, %v1168_v31  ;;  %v2372_v31 = vld [vmem:[%s3407_s3 + $0x128] sm:$0xff] }
 0x1fc   : > { %v1405_v35 = vpop.f32.mrf.mxu2  ;;  %1870 = vmatpush.msrb.mxu3 %v2372_v31 }
 0x1fd   : > { %v1406_v29 = vadd.f32 %v1405_v35, %v1341_v34  ;;  %v1343_v42 = vpop.f32.mrf.mxu1  ;;  %v2371_v35 = vld [vmem:[%s3407_s3 + $0x120] sm:$0xff] }
 0x1fe   : > { %v1344_v47 = vadd.f32 %v2947_v37, %v1343_v42  ;;  %1871 = vmatpush.msrb.mxu3 %v2371_v35 }
 0x1ff   : > { %v1447_v36 = vmax.f32 %v1406_v29, 0.0  ;;  %v846_v38 = vpop.permute.xlu0 %845  ;;  %v2370_v29 = vld [vmem:[%s3407_s3 + $0x118] sm:$0xff] }
 0x200   : > { %879 = vst.msk [vmem:[#allocation3 + $0xf0] sm:$0xff] %vm863_vm4, %v846_v38  ;;  %1872 = vmatpush.msrb.mxu3 %v2370_v29  ;;  %v2369_v38 = vld [vmem:[%s3407_s3 + $0x110] sm:$0xff] }
 0x201   : > { %v943_v39 = vpop.permute.xlu1 %942  ;;  %1463 = vst.msk [vmem:[#allocation4 + $0x18] sm:$0xff] %vm507_vm2, %v1447_v36  ;;  %1372 = vmatmul.f32.gmra.mxu1 %v1229_v41 }
 0x202   : > { %v1232_v40 = vld [vmem:[#allocation3 + $0xf8] sm:$0xff]  ;;  %976 = vst.msk [vmem:[#allocation3 + $0xf0] sm:$0xff] %vm960_vm5, %v943_v39  ;;  %1873 = vmatpush.msrb.mxu3 %v2369_v38 }
 0x203   : > { %2362 = vmatmul.msk.f32.gmra.mxu2 %vm1265_vm6, %v1232_v40 }
 0x208   : > { %v1478_v43 = vld [vmem:[#allocation4 + $0x10] ss:$2 sm:$0xff]  ;;  %v1486_v44 = vld [vmem:[#allocation4 + $0x11] ss:$2 sm:$0xff] }
 0x209   : > { %v1494_v45 = vadd.f32 %v1486_v44, %v1478_v43  ;;  %v1231_v46 = vld [vmem:[#allocation3 + $0xf0] sm:$0xff]  ;;  %v2368_v44 = vld [vmem:[%s3407_s3 + $0x108] sm:$0xff] }
 0x20a   : > { %1375 = vmatmul.f32.gmra.mxu1 %v1231_v46  ;;  %1874 = vmatpush.msrb.mxu3 %v2368_v44 }
 0x20b   : > { %v1502_v48 = vmul.f32 0.5, %v1494_v45  ;;  %v1408_v49 = vpop.f32.mrf.mxu2 }
 0x20c   : > { %v1409_v50 = vadd.f32 %v1408_v49, %v1344_v47  ;;  %v2367_v47 = vld [vmem:[%s3407_s3 + $0x100] sm:$0xff] }
 0x20d   : > { %1510 = vst.msk [vmem:[#allocation2 + $0xb] sm:$0xff] %vm507_vm2, %v1502_v48  ;;  %1875 = vmatpush.msrb.mxu3 %v2367_v47 }
 0x20e   : > { %v1448_v51 = vmax.f32 %v1409_v50, 0.0 }
 0x20f   : > { %v1346_v52 = vpop.f32.mrf.mxu1 }
 0x210   : > { %1464 = vst.msk [vmem:[#allocation4 + $0x20] sm:$0xff] %vm507_vm2, %v1448_v51  ;;  %v1347_v53 = vadd.f32 %v2947_v37, %v1346_v52  ;;  %v2366_v51 = vld [vmem:[%s3407_s3 + $0xf8] sm:$0xff]  ;;  %v2365_v52 = vld [vmem:[%s3407_s3 + $0xf0] sm:$0xff] }
 0x211   : > { %1876 = vmatpush.msrb.mxu3 %v2366_v51 }
 0x213   : > { %v1411_v54 = vpop.f32.mrf.mxu2  ;;  %1877 = vmatpush.msrb.mxu3 %v2365_v52 }
 0x214   : > { %v1412_v55 = vadd.f32 %v1411_v54, %v1347_v53  ;;  %v1631_v56 = vld [vmem:[#allocation2 + $0xb] sm:$0xff]  ;;  %v2363_v54 = vld [vmem:[%s3407_s3 + $0xe0] sm:$0xff] }
 0x215   : > { %v1583_v57 = vld [vmem:[#allocation2 + $0xa] sm:$0xff]  ;;  %1648 = vrot.lane.b32.xlu1 %v1631_v56, %s2463_s6 }
 0x216   : > { %v1535_v58 = vld [vmem:[#allocation2 + $0x9] sm:$0xff]  ;;  %1600 = vrot.lane.b32.xlu0 %v1583_v57, %s2465_s8  ;;  %v1449_v60 = vmax.f32 %v1412_v55, 0.0 }
 0x217   : > { %v1519_v59 = vld [vmem:[#allocation2 + $0x8] sm:$0xff]  ;;  %1552 = vrot.lane.b32.xlu2 %v1535_v58, %s2464_s7  ;;  %v1349_v1 = vpop.f32.mrf.mxu1 }
 0x218   : > { %1527 = vst.msk [vmem:[#allocation3 + $0x10] sm:$0xff] %vm507_vm2, %v1519_v59  ;;  %v1678_v61 = vld [vmem:[#allocation2 + $0x4] sm:$0xff]  ;;  %v1350_v3 = vadd.f32 %v2947_v37, %v1349_v1 }
 0x219   : > { %1686 = vst.msk [vmem:[#allocation3 + $0x8] sm:$0xff] %vm507_vm2, %v1678_v61  ;;  %v2364_v53 = vld [vmem:[%s3407_s3 + $0xe8] sm:$0xff] }
 0x21a   : > { %1465 = vst.msk [vmem:[#allocation4 + $0x28] sm:$0xff] %vm507_vm2, %v1449_v60  ;;  %1878 = vmatpush.msrb.mxu3 %v2364_v53 }
 0x21c   : > { %1879 = vmatpush.msrb.mxu3 %v2363_v54 }
 0x221   : > { %v1479_v62 = vld [vmem:[#allocation4 + $0x20] ss:$2 sm:$0xff]  ;;  %v1487_v63 = vld [vmem:[#allocation4 + $0x21] ss:$2 sm:$0xff] }
 0x222   : > { %v1495_v0 = vadd.f32 %v1487_v63, %v1479_v62 }
 0x224   : > { %v1503_v2 = vmul.f32 0.5, %v1495_v0  ;;  %v1414_v4 = vpop.f32.mrf.mxu2 }
 0x225   : > { %v1415_v5 = vadd.f32 %v1414_v4, %v1350_v3  ;;  %v1352_v11 = vpop.f32.mrf.mxu1 }
 0x226   : > { %1511 = vst.msk [vmem:[#allocation2 + $0x13] sm:$0xff] %vm507_vm2, %v1503_v2  ;;  %v1353_v12 = vadd.f32 %v2947_v37, %v1352_v11 }
 0x227   : > { %v1450_v27 = vmax.f32 %v1415_v5, 0.0 }
 0x229   : > { %1466 = vst.msk [vmem:[#allocation4 + $0x30] sm:$0xff] %vm507_vm2, %v1450_v27 }
 0x22d   : > { %v1632_v6 = vld [vmem:[#allocation2 + $0x13] sm:$0xff] }
 0x22e   : > { %v1584_v7 = vld [vmem:[#allocation2 + $0x12] sm:$0xff]  ;;  %1650 = vrot.lane.b32.xlu1 %v1632_v6, %s2463_s6 }
 0x22f   : > { %v1536_v8 = vld [vmem:[#allocation2 + $0x11] sm:$0xff]  ;;  %1602 = vrot.lane.b32.xlu0 %v1584_v7, %s2465_s8 }
 0x230   : > { %v1520_v9 = vld [vmem:[#allocation2 + $0x10] sm:$0xff]  ;;  %1554 = vrot.lane.b32.xlu2 %v1536_v8, %s2464_s7 }
 0x231   : > { %1528 = vst.msk [vmem:[#allocation3 + $0x20] sm:$0xff] %vm507_vm2, %v1520_v9  ;;  %v1679_v10 = vld [vmem:[#allocation2 + $0xc] sm:$0xff] }
 0x232   : > { %1687 = vst.msk [vmem:[#allocation3 + $0x18] sm:$0xff] %vm507_vm2, %v1679_v10 }
 0x233   : > { %v1417_v13 = vpop.f32.mrf.mxu2 }
 0x234   : > { %v1418_v14 = vadd.f32 %v1417_v13, %v1353_v12 }
 0x236   : > { %v1451_v15 = vmax.f32 %v1418_v14, 0.0 }
 0x237   : > { %v1355_v18 = vpop.f32.mrf.mxu1 }
 0x238   : > { %1467 = vst.msk [vmem:[#allocation4 + $0x38] sm:$0xff] %vm507_vm2, %v1451_v15  ;;  %v1356_v32 = vadd.f32 %v2947_v37, %v1355_v18 }
 0x23f   : > { %v1480_v22 = vld [vmem:[#allocation4 + $0x30] ss:$2 sm:$0xff]  ;;  %v1488_v23 = vld [vmem:[#allocation4 + $0x31] ss:$2 sm:$0xff]  ;;  %v1420_v24 = vpop.f32.mrf.mxu2  ;;  %v1358_v36 = vpop.f32.mrf.mxu1 }
 0x240   : > { %v1496_v25 = vadd.f32 %v1488_v23, %v1480_v22  ;;  %v1421_v28 = vadd.f32 %v1420_v24, %v1356_v32  ;;  %v1359_v39 = vadd.f32 %v2947_v37, %v1358_v36 }
 0x242   : > { %v1504_v33 = vmul.f32 0.5, %v1496_v25  ;;  %v1452_v34 = vmax.f32 %v1421_v28, 0.0 }
 0x244   : > { %1512 = vst.msk [vmem:[#allocation2 + $0x1b] sm:$0xff] %vm507_vm2, %v1504_v33 }
 0x245   : > { %1468 = vst.msk [vmem:[#allocation4 + $0x40] sm:$0xff] %vm507_vm2, %v1452_v34 }
 0x24b   : > { %v1633_v40 = vld [vmem:[#allocation2 + $0x1b] sm:$0xff] }
 0x24c   : > { %v1585_v41 = vld [vmem:[#allocation2 + $0x1a] sm:$0xff]  ;;  %1652 = vrot.lane.b32.xlu1 %v1633_v40, %s2463_s6 }
 0x24d   : > { %v1537_v42 = vld [vmem:[#allocation2 + $0x19] sm:$0xff]  ;;  %v1423_v43 = vpop.f32.mrf.mxu2  ;;  %1604 = vrot.lane.b32.xlu0 %v1585_v41, %s2465_s8 }
 0x24e   : > { %v1521_v45 = vld [vmem:[#allocation2 + $0x18] sm:$0xff]  ;;  %v1424_v46 = vadd.f32 %v1423_v43, %v1359_v39  ;;  %1556 = vrot.lane.b32.xlu2 %v1537_v42, %s2464_s7 }
 0x24f   : > { %1529 = vst.msk [vmem:[#allocation3 + $0x30] sm:$0xff] %vm507_vm2, %v1521_v45  ;;  %v1680_v48 = vld [vmem:[#allocation2 + $0x14] sm:$0xff] }
 0x250   : > { %1688 = vst.msk [vmem:[#allocation3 + $0x28] sm:$0xff] %vm507_vm2, %v1680_v48  ;;  %v1453_v49 = vmax.f32 %v1424_v46, 0.0 }
 0x251   : > { %v1361_v55 = vpop.f32.mrf.mxu1 }
 0x252   : > { %v1551_v50 = vpop.permute.xlu2 %1550  ;;  %1469 = vst.msk [vmem:[#allocation4 + $0x48] sm:$0xff] %vm507_vm2, %v1453_v49  ;;  %v1362_v59 = vadd.f32 %v2947_v37, %v1361_v55 }
 0x253   : > { %1574 = vst.msk [vmem:[#allocation3] sm:$0xff] %vm766_vm3, %v1551_v50 }
 0x259   : > { %v1481_v56 = vld [vmem:[#allocation4 + $0x40] ss:$2 sm:$0xff]  ;;  %v1489_v57 = vld [vmem:[#allocation4 + $0x41] ss:$2 sm:$0xff] }
 0x25a   : > { %v1497_v58 = vadd.f32 %v1489_v57, %v1481_v56 }
 0x25b   : > { %v1426_v61 = vpop.f32.mrf.mxu2 }
 0x25c   : > { %v1505_v60 = vmul.f32 0.5, %v1497_v58  ;;  %v1427_v62 = vadd.f32 %v1426_v61, %v1362_v59 }
 0x25e   : > { %1513 = vst.msk [vmem:[#allocation2 + $0x23] sm:$0xff] %vm507_vm2, %v1505_v60  ;;  %v1454_v63 = vmax.f32 %v1427_v62, 0.0 }
 0x260   : > { %1470 = vst.msk [vmem:[#allocation4 + $0x50] sm:$0xff] %vm507_vm2, %v1454_v63  ;;  %v1364_v0 = vpop.f32.mrf.mxu1 }
 0x261   : > { %v1365_v1 = vadd.f32 %v2947_v37, %v1364_v0 }
 0x263   : > { %v1429_v2 = vpop.f32.mrf.mxu2 }
 0x264   : > { %v1430_v3 = vadd.f32 %v1429_v2, %v1365_v1 }
 0x265   : > { %v1634_v4 = vld [vmem:[#allocation2 + $0x23] sm:$0xff] }
 0x266   : > { %v1586_v5 = vld [vmem:[#allocation2 + $0x22] sm:$0xff]  ;;  %1654 = vrot.lane.b32.xlu1 %v1634_v4, %s2463_s6  ;;  %v1455_v7 = vmax.f32 %v1430_v3, 0.0 }
 0x267   : > { %v1538_v27 = vld [vmem:[#allocation2 + $0x21] sm:$0xff]  ;;  %1606 = vrot.lane.b32.xlu0 %v1586_v5, %s2465_s8 }
 0x268   : > { %v1522_v6 = vld [vmem:[#allocation2 + $0x20] sm:$0xff]  ;;  %1558 = vrot.lane.b32.xlu2 %v1538_v27, %s2464_s7  ;;  %v1647_v8 = vpop.permute.xlu1 %1646  ;;  %1471 = vst.msk [vmem:[#allocation4 + $0x58] sm:$0xff] %vm507_vm2, %v1455_v7 }
 0x269   : > { %v1599_v9 = vpop.permute.xlu0 %1598  ;;  %1530 = vst.msk [vmem:[#allocation3 + $0x40] sm:$0xff] %vm507_vm2, %v1522_v6  ;;  %v1681_v10 = vld [vmem:[#allocation2 + $0x1c] sm:$0xff] }
 0x26a   : > { %1622 = vst.msk [vmem:[#allocation3] sm:$0xff] %vm863_vm4, %v1599_v9  ;;  %v3102_v38 = vld [vmem:[#allocation2 + $0x1e] sm:$0xff]  ;;  %v1742_v9 = vld [vmem:[#allocation2 + $0x6] sm:$0xff] }
 0x26b   : > { %1670 = vst.msk [vmem:[#allocation3] sm:$0xff] %vm960_vm5, %v1647_v8  ;;  %v1432_v11 = vpop.f32.mrf.mxu2  ;;  %v3104_v39 = vld [vmem:[#allocation2 + $0x1d] sm:$0xff]  ;;  %v1695_v8 = vld [vmem:[#allocation2 + $0xd] sm:$0xff] }
 0x26c   : > { %1689 = vst.msk [vmem:[#allocation3 + $0x38] sm:$0xff] %vm507_vm2, %v1681_v10  ;;  %v1694_v10 = vld [vmem:[#allocation2 + $0x5] sm:$0xff] }
 0x26e   : > { %v1367_v14 = vpop.f32.mrf.mxu1 }
 0x26f   : > { %v1482_v12 = vld [vmem:[#allocation4 + $0x50] ss:$2 sm:$0xff]  ;;  %v1490_v13 = vld [vmem:[#allocation4 + $0x51] ss:$2 sm:$0xff]  ;;  %v1368_v16 = vadd.f32 %v2947_v37, %v1367_v14 }
 0x270   : > { %v1498_v15 = vadd.f32 %v1490_v13, %v1482_v12  ;;  %v1696_v12 = vld [vmem:[#allocation2 + $0x15] sm:$0xff] }
 0x271   : > { %v1553_v17 = vpop.permute.xlu2 %1552  ;;  %v1433_v20 = vadd.f32 %v1432_v11, %v1368_v16  ;;  %v1744_v11 = vld [vmem:[#allocation2 + $0x16] sm:$0xff]  ;;  %v1743_v13 = vld [vmem:[#allocation2 + $0xe] sm:$0xff] }
 0x272   : > { %v1790_v18 = vld [vmem:[#allocation3] sm:$0xff]  ;;  %1575 = vst.msk [vmem:[#allocation3 + $0x10] sm:$0xff] %vm766_vm3, %v1553_v17  ;;  %v1506_v19 = vmul.f32 0.5, %v1498_v15 }
 0x273   : > { %1880 = vmatmul.f32.vlgmr.msrb.gmra.mxu3 %v1790_v18  ;;  %v1456_v21 = vmax.f32 %v1433_v20, 0.0  ;;  %v1435_v32 = vpop.f32.mrf.mxu2  ;;  %v2390_v20 = vld [vmem:[%s3407_s3 + $0x1b8] sm:$0xff] }
 0x274   : > { %1514 = vst.msk [vmem:[#allocation2 + $0x2b] sm:$0xff] %vm507_vm2, %v1506_v19  ;;  %1909 = vmatpush.msra.mxu3 %v2390_v20  ;;  %v3230_v20 = vld [vmem:[%s3408_s4 + $0x1] ss:$0 sm:$0xff] }
 0x275   : > { %1472 = vst.msk [vmem:[#allocation4 + $0x60] sm:$0xff] %vm507_vm2, %v1456_v21  ;;  %v2389_v21 = vld [vmem:[%s3407_s3 + $0x1b0] sm:$0xff] }
 0x276   : > { %v1370_v22 = vpop.f32.mrf.mxu1  ;;  %1910 = vmatpush.msra.mxu3 %v2389_v21 }
 0x277   : > { %v1371_v23 = vadd.f32 %v2947_v37, %v1370_v22 }
 0x279   : > { %v1436_v24 = vadd.f32 %v1435_v32, %v1371_v23 }
 0x27b   : > { %v1635_v25 = vld [vmem:[#allocation2 + $0x2b] sm:$0xff]  ;;  %v1457_v31 = vmax.f32 %v1436_v24, 0.0  ;;  %v1438_v35 = vpop.f32.mrf.mxu2 }
 0x27c   : > { %v1587_v28 = vld [vmem:[#allocation2 + $0x2a] sm:$0xff]  ;;  %1656 = vrot.lane.b32.xlu1 %v1635_v25, %s2463_s6 }
 0x27d   : > { %v1539_v30 = vld [vmem:[#allocation2 + $0x29] sm:$0xff]  ;;  %1608 = vrot.lane.b32.xlu0 %v1587_v28, %s2465_s8  ;;  %1473 = vst.msk [vmem:[#allocation4 + $0x68] sm:$0xff] %vm507_vm2, %v1457_v31 }
 0x27e   : > { %v1523_v33 = vld [vmem:[#allocation2 + $0x28] sm:$0xff]  ;;  %1560 = vrot.lane.b32.xlu2 %v1539_v30, %s2464_s7  ;;  %v1373_v29 = vpop.f32.mrf.mxu1  ;;  %v2387_v30 = vld [vmem:[%s3407_s3 + $0x1a0] sm:$0xff] }
 0x27f   : > { %1531 = vst.msk [vmem:[#allocation3 + $0x50] sm:$0xff] %vm507_vm2, %v1523_v33  ;;  %v1682_v34 = vld [vmem:[#allocation2 + $0x24] sm:$0xff]  ;;  %v1374_v40 = vadd.f32 %v2947_v37, %v1373_v29  ;;  %v2385_v29 = vld [vmem:[%s3407_s3 + $0x190] sm:$0xff] }
 0x280   : > { %v3100_v36 = vld [vmem:[#allocation2 + $0x25] sm:$0xff]  ;;  %1690 = vst.msk [vmem:[#allocation3 + $0x48] sm:$0xff] %vm507_vm2, %v1682_v34 }
 0x281   : > { %1983 = vst.msk [vmem:[#allocation2 + $0x23] sm:$0x7] %vm540_vm1, %v2462_v26  ;;  %v1439_v41 = vadd.f32 %v1438_v35, %v1374_v40  ;;  %v1746_v19 = vld [vmem:[#allocation2 + $0x26] sm:$0xff]  ;;  %v2386_v35 = vld [vmem:[%s3407_s3 + $0x198] sm:$0xff] }
 0x282   : > { %v2388_v25 = vld [vmem:[%s3407_s3 + $0x1a8] sm:$0xff] }
 0x283   : > { %v1458_v42 = vmax.f32 %v1439_v41, 0.0  ;;  %1911 = vmatpush.msra.mxu3 %v2388_v25 }
 0x284   : > { %v1483_v43 = vld [vmem:[#allocation4 + $0x60] ss:$2 sm:$0xff]  ;;  %v1491_v44 = vld [vmem:[#allocation4 + $0x61] ss:$2 sm:$0xff] }
 0x285   : > { %v1499_v45 = vadd.f32 %v1491_v44, %v1483_v43  ;;  %1474 = vst.msk [vmem:[#allocation4 + $0x70] sm:$0xff] %vm507_vm2, %v1458_v42  ;;  %1912 = vmatpush.msra.mxu3 %v2387_v30  ;;  %v2382_v43 = vld [vmem:[%s3407_s3 + $0x178] sm:$0xff] }
 0x286   : > { %v1441_v52 = vpop.f32.mrf.mxu2 }
 0x287   : > { %v1376_v46 = vpop.f32.mrf.mxu1  ;;  %v1507_v48 = vmul.f32 0.5, %v1499_v45  ;;  %v1649_v50 = vpop.permute.xlu1 %1648  ;;  %1913 = vmatpush.msra.mxu3 %v2386_v35  ;;  %v2381_v45 = vld [vmem:[%s3407_s3 + $0x170] sm:$0xff] }
 0x288   : > { %v1377_v49 = vadd.f32 %v2947_v37, %v1376_v46  ;;  %v1601_v51 = vpop.permute.xlu0 %1600  ;;  %v2380_v46 = vld [vmem:[%s3407_s3 + $0x168] sm:$0xff] }
 0x289   : > { %1623 = vst.msk [vmem:[#allocation3 + $0x10] sm:$0xff] %vm863_vm4, %v1601_v51  ;;  %1914 = vmatpush.msra.mxu3 %v2385_v29 }
 0x28a   : > { %v1555_v47 = vpop.permute.xlu2 %1554  ;;  %1515 = vst.msk [vmem:[#allocation2 + $0x33] sm:$0xff] %vm507_vm2, %v1507_v48  ;;  %v1442_v26 = vadd.f32 %v1441_v52, %v1377_v49  ;;  %v2379_v48 = vld [vmem:[%s3407_s3 + $0x160] sm:$0xff] }
 0x28b   : > { %1576 = vst.msk [vmem:[#allocation3 + $0x20] sm:$0xff] %vm766_vm3, %v1555_v47 }
 0x28c   : > { %1671 = vst.msk [vmem:[#allocation3 + $0x10] sm:$0xff] %vm960_vm5, %v1649_v50  ;;  %v1459_v53 = vmax.f32 %v1442_v26, 0.0 }
 0x28e   : > { %1475 = vst.msk [vmem:[#allocation4 + $0x78] sm:$0xff] %vm507_vm2, %v1459_v53 }
 0x291   : > { %v1636_v54 = vld [vmem:[#allocation2 + $0x33] sm:$0xff] }
 0x292   : > { %v1588_v55 = vld [vmem:[#allocation2 + $0x32] sm:$0xff]  ;;  %1658 = vrot.lane.b32.xlu1 %v1636_v54, %s2463_s6 }
 0x293   : > { %v1540_v56 = vld [vmem:[#allocation2 + $0x31] sm:$0xff]  ;;  %1610 = vrot.lane.b32.xlu0 %v1588_v55, %s2465_s8 }
 0x294   : > { %v1792_v37 = vld [vmem:[#allocation3 + $0x10] sm:$0xff]  ;;  %1562 = vrot.lane.b32.xlu2 %v1540_v56, %s2464_s7  ;;  %v1524_v57 = vld [vmem:[#allocation2 + $0x30] sm:$0xff] }
 0x295   : > { %1883 = vmatmul.f32.gmra.mxu3 %v1792_v37  ;;  %v1683_v58 = vld [vmem:[#allocation2 + $0x2c] sm:$0xff]  ;;  %1532 = vst.msk [vmem:[#allocation3 + $0x60] sm:$0xff] %vm507_vm2, %v1524_v57  ;;  %v1484_v59 = vld [vmem:[#allocation4 + $0x70] ss:$2 sm:$0xff]  ;;  %v1492_v60 = vld [vmem:[#allocation4 + $0x71] ss:$2 sm:$0xff] }
 0x296   : > { %1691 = vst.msk [vmem:[#allocation3 + $0x58] sm:$0xff] %vm507_vm2, %v1683_v58  ;;  %v1500_v61 = vadd.f32 %v1492_v60, %v1484_v59  ;;  %v1747_v17 = vld [vmem:[#allocation2 + $0x2e] sm:$0xff] }
 0x297   : > { %v1699_v18 = vld [vmem:[#allocation2 + $0x2d] sm:$0xff] }
 0x298   : > { %v1508_v62 = vmul.f32 0.5, %v1500_v61 }
 0x29a   : > { %1516 = vst.msk [vmem:[#allocation2 + $0x3b] sm:$0xff] %vm507_vm2, %v1508_v62 }
 0x2a0   : > { %v1651_v63 = vpop.permute.xlu1 %1650 }
 0x2a1   : > { %v1603_v0 = vpop.permute.xlu0 %1602  ;;  %v1637_v1 = vld [vmem:[#allocation2 + $0x3b] sm:$0xff] }
 0x2a2   : > { %1624 = vst.msk [vmem:[#allocation3 + $0x20] sm:$0xff] %vm863_vm4, %v1603_v0  ;;  %v1589_v2 = vld [vmem:[#allocation2 + $0x3a] sm:$0xff]  ;;  %1660 = vrot.lane.b32.xlu1 %v1637_v1, %s2463_s6 }
 0x2a3   : > { %1672 = vst.msk [vmem:[#allocation3 + $0x20] sm:$0xff] %vm960_vm5, %v1651_v63  ;;  %v1541_v3 = vld [vmem:[#allocation2 + $0x39] sm:$0xff]  ;;  %1612 = vrot.lane.b32.xlu0 %v1589_v2, %s2465_s8 }
 0x2a4   : > { %1564 = vrot.lane.b32.xlu2 %v1541_v3, %s2464_s7  ;;  %v1525_v4 = vld [vmem:[#allocation2 + $0x38] sm:$0xff] }
 0x2a5   : > { %v1684_v5 = vld [vmem:[#allocation2 + $0x34] sm:$0xff]  ;;  %1533 = vst.msk [vmem:[#allocation3 + $0x70] sm:$0xff] %vm507_vm2, %v1525_v4  ;;  %v1685_v27 = vld [vmem:[#allocation2 + $0x3c] sm:$0xff] }
 0x2a6   : > { %1692 = vst.msk [vmem:[#allocation3 + $0x68] sm:$0xff] %vm507_vm2, %v1684_v5  ;;  %v1701_v22 = vld [vmem:[#allocation2 + $0x3d] sm:$0xff]  ;;  %v1700_v24 = vld [vmem:[#allocation2 + $0x35] sm:$0xff] }
 0x2a7   : > { %1693 = vst.msk [vmem:[#allocation3 + $0x78] sm:$0xff] %vm507_vm2, %v1685_v27  ;;  %v1748_v23 = vld [vmem:[#allocation2 + $0x36] sm:$0xff]  ;;  %v1749_v28 = vld [vmem:[#allocation2 + $0x3e] sm:$0xff] }
 0x2a8   : > { %v1557_v6 = vpop.permute.xlu2 %1556 }
 0x2a9   : > { %1577 = vst.msk [vmem:[#allocation3 + $0x30] sm:$0xff] %vm766_vm3, %v1557_v6 }
 0x2aa   : > { %v1794_v7 = vld [vmem:[#allocation3 + $0x20] sm:$0xff]  ;;  %1712 = vrot.lane.b32.xlu1 %v1695_v8, %s2464_s7 }
 0x2ab   : > { %1886 = vmatmul.f32.gmra.mxu3 %v1794_v7  ;;  %1758 = vrot.lane.b32.xlu0 %v1742_v9, %s2465_s8 }
 0x2ac   : > { %1710 = vrot.lane.b32.xlu2 %v1694_v10, %s2464_s7 }
 0x2b2   : > { %1762 = vrot.lane.b32.xlu1 %v1744_v11, %s2465_s8 }
 0x2b3   : > { %1714 = vrot.lane.b32.xlu0 %v1696_v12, %s2464_s7 }
 0x2b4   : > { %1760 = vrot.lane.b32.xlu2 %v1743_v13, %s2465_s8 }
 0x2ba   : > { %1718 = vrot.lane.b32.xlu1 %v3100_v36, %s2464_s7 }
 0x2bb   : > { %1764 = vrot.lane.b32.xlu0 %v3102_v38, %s2465_s8  ;;  %v2384_v38 = vld [vmem:[%s3407_s3 + $0x188] sm:$0xff] }
 0x2bc   : > { %1716 = vrot.lane.b32.xlu2 %v3104_v39, %s2464_s7  ;;  %v2383_v39 = vld [vmem:[%s3407_s3 + $0x180] sm:$0xff]  ;;  %1915 = vmatpush.msra.mxu3 %v2384_v38 }
 0x2be   : > { %v1653_v14 = vpop.permute.xlu1 %1652  ;;  %1916 = vmatpush.msra.mxu3 %v2383_v39 }
 0x2bf   : > { %v1605_v15 = vpop.permute.xlu0 %1604 }
 0x2c0   : > { %1625 = vst.msk [vmem:[#allocation3 + $0x30] sm:$0xff] %vm863_vm4, %v1605_v15  ;;  %1917 = vmatpush.msra.mxu3 %v2382_v43 }
 0x2c1   : > { %1673 = vst.msk [vmem:[#allocation3 + $0x30] sm:$0xff] %vm960_vm5, %v1653_v14 }
 0x2c2   : > { %v1559_v16 = vpop.permute.xlu2 %1558  ;;  %1768 = vrot.lane.b32.xlu1 %v1747_v17, %s2465_s8  ;;  %1918 = vmatpush.msra.mxu3 %v2381_v45 }
 0x2c3   : > { %1578 = vst.msk [vmem:[#allocation3 + $0x40] sm:$0xff] %vm766_vm3, %v1559_v16  ;;  %1720 = vrot.lane.b32.xlu0 %v1699_v18, %s2464_s7 }
 0x2c4   : > { %1766 = vrot.lane.b32.xlu2 %v1746_v19, %s2465_s8  ;;  %1919 = vmatpush.msra.mxu3 %v2380_v46 }
 0x2c6   : > { %1920 = vmatpush.msra.mxu3 %v2379_v48 }
 0x2c8   : > { %v1796_v32 = vld [vmem:[#allocation3 + $0x30] sm:$0xff] }
 0x2c9   : > { %1889 = vmatmul.f32.gmra.mxu3 %v1796_v32 }
 0x2ca   : > { %1724 = vrot.lane.b32.xlu1 %v1701_v22, %s2464_s7 }
 0x2cb   : > { %1770 = vrot.lane.b32.xlu0 %v1748_v23, %s2465_s8 }
 0x2cc   : > { %1722 = vrot.lane.b32.xlu2 %v1700_v24, %s2464_s7 }
 0x2d4   : > { %1772 = vrot.lane.b32.xlu2 %v1749_v28, %s2465_s8 }
 0x2d8   : > { %v1561_v31 = vpop.permute.xlu2 %1560  ;;  %v1655_v33 = vpop.permute.xlu1 %1654 }
 0x2d9   : > { %1579 = vst.msk [vmem:[#allocation3 + $0x50] sm:$0xff] %vm766_vm3, %v1561_v31  ;;  %v1607_v34 = vpop.permute.xlu0 %1606 }
 0x2da   : > { %1626 = vst.msk [vmem:[#allocation3 + $0x40] sm:$0xff] %vm863_vm4, %v1607_v34 }
 0x2db   : > { %1674 = vst.msk [vmem:[#allocation3 + $0x40] sm:$0xff] %vm960_vm5, %v1655_v33 }
 0x2e2   : > { %v1798_v36 = vld [vmem:[#allocation3 + $0x40] sm:$0xff] }
 0x2e3   : > { %1892 = vmatmul.f32.gmra.mxu3 %v1798_v36 }
 0x2ee   : > { %v1563_v40 = vpop.permute.xlu2 %1562  ;;  %v1657_v41 = vpop.permute.xlu1 %1656 }
 0x2ef   : > { %1580 = vst.msk [vmem:[#allocation3 + $0x60] sm:$0xff] %vm766_vm3, %v1563_v40  ;;  %v1609_v42 = vpop.permute.xlu0 %1608 }
 0x2f0   : > { %1627 = vst.msk [vmem:[#allocation3 + $0x50] sm:$0xff] %vm863_vm4, %v1609_v42 }
 0x2f1   : > { %1675 = vst.msk [vmem:[#allocation3 + $0x50] sm:$0xff] %vm960_vm5, %v1657_v41 }
 0x2f6   : > { %v1881_v12 = vpop.f32.mrf.mxu3 }
 0x2f7   : > { %v1882_v21 = vadd.f32 %v3230_v20, %v1881_v12 }
 0x2f8   : > { %v1800_v44 = vld [vmem:[#allocation3 + $0x50] sm:$0xff] }
 0x2f9   : > { %1895 = vmatmul.f32.gmra.mxu3 %v1800_v44 }
 0x2fe   : > { %v1565_v47 = vpop.permute.xlu2 %1564 }
 0x2ff   : > { %1581 = vst.msk [vmem:[#allocation3 + $0x70] sm:$0xff] %vm766_vm3, %v1565_v47 }
 0x304   : > { %v1659_v49 = vpop.permute.xlu1 %1658 }
 0x305   : > { %v1611_v50 = vpop.permute.xlu0 %1610 }
 0x306   : > { %1628 = vst.msk [vmem:[#allocation3 + $0x60] sm:$0xff] %vm863_vm4, %v1611_v50  ;;  %v1711_v51 = vpop.permute.xlu2 %1710 }
 0x307   : > { %1676 = vst.msk [vmem:[#allocation3 + $0x60] sm:$0xff] %vm960_vm5, %v1659_v49 }
 0x308   : > { %1734 = vst.msk [vmem:[#allocation3 + $0x8] sm:$0xff] %vm766_vm3, %v1711_v51 }
 0x30e   : > { %v1761_v52 = vpop.permute.xlu2 %1760  ;;  %v1802_v26 = vld [vmem:[#allocation3 + $0x60] sm:$0xff] }
 0x30f   : > { %1898 = vmatmul.f32.gmra.mxu3 %v1802_v26 }
 0x314   : > { %v1661_v53 = vpop.permute.xlu1 %1660 }
 0x315   : > { %v1613_v54 = vpop.permute.xlu0 %1612 }
 0x316   : > { %1629 = vst.msk [vmem:[#allocation3 + $0x70] sm:$0xff] %vm863_vm4, %v1613_v54  ;;  %v1717_v55 = vpop.permute.xlu2 %1716 }
 0x317   : > { %1677 = vst.msk [vmem:[#allocation3 + $0x70] sm:$0xff] %vm960_vm5, %v1661_v53 }
 0x318   : > { %1737 = vst.msk [vmem:[#allocation3 + $0x38] sm:$0xff] %vm766_vm3, %v1717_v55  ;;  %v1884_v13 = vpop.f32.mrf.mxu3 }
 0x319   : > { %v1885_v24 = vadd.f32 %v3230_v20, %v1884_v13 }
 0x31c   : > { %v1713_v56 = vpop.permute.xlu1 %1712 }
 0x31d   : > { %v1759_v37 = vpop.permute.xlu0 %1758  ;;  %1735 = vst.msk [vmem:[#allocation3 + $0x18] sm:$0xff] %vm766_vm3, %v1713_v56 }
 0x31e   : > { %v1767_v57 = vpop.permute.xlu2 %1766  ;;  %v1804_v58 = vld [vmem:[#allocation3 + $0x70] sm:$0xff]  ;;  %1783 = vst.msk [vmem:[#allocation3 + $0x18] sm:$0xff] %vm863_vm4, %v1761_v52 }
 0x31f   : > { %1901 = vmatmul.f32.gmra.mxu3 %v1804_v58  ;;  %1782 = vst.msk [vmem:[#allocation3 + $0x8] sm:$0xff] %vm863_vm4, %v1759_v37  ;;  %v2414_v58 = vld [vmem:[%s3407_s3 + $0x230] sm:$0xff] }
 0x324   : > { %v1763_v59 = vpop.permute.xlu1 %1762 }
 0x325   : > { %v1715_v60 = vpop.permute.xlu0 %1714  ;;  %v1793_v1 = vld [vmem:[#allocation3 + $0x18] sm:$0xff] }
 0x326   : > { %1736 = vst.msk [vmem:[#allocation3 + $0x28] sm:$0xff] %vm766_vm3, %v1715_v60  ;;  %v1723_v61 = vpop.permute.xlu2 %1722  ;;  %v1791_v62 = vld [vmem:[#allocation3 + $0x8] sm:$0xff] }
 0x327   : > { %1784 = vst.msk [vmem:[#allocation3 + $0x28] sm:$0xff] %vm863_vm4, %v1763_v59  ;;  %2392 = vmatmul.msk.f32.vlgmr.msra.gmra.mxu3 %vm1265_vm6, %v1791_v62  ;;  %v2427_v59 = vld [vmem:[%s3407_s3 + $0x298] sm:$0xff]  ;;  %v2426_v60 = vld [vmem:[%s3407_s3 + $0x290] sm:$0xff]  ;;  %v2413_v62 = vld [vmem:[%s3407_s3 + $0x228] sm:$0xff] }
 0x328   : > { %1740 = vst.msk [vmem:[#allocation3 + $0x68] sm:$0xff] %vm766_vm3, %v1723_v61  ;;  %2207 = vmatpush.msrb.mxu1 %v2427_v59 }
 0x32a   : > { %2208 = vmatpush.msrb.mxu1 %v2426_v60  ;;  %v2418_v60 = vld [vmem:[%s3407_s3 + $0x250] sm:$0xff] }
 0x32c   : > { %v1719_v63 = vpop.permute.xlu1 %1718 }
 0x32d   : > { %v1765_v0 = vpop.permute.xlu0 %1764  ;;  %1738 = vst.msk [vmem:[#allocation3 + $0x48] sm:$0xff] %vm766_vm3, %v1719_v63 }
 0x32e   : > { %1786 = vst.msk [vmem:[#allocation3 + $0x48] sm:$0xff] %vm863_vm4, %v1767_v57  ;;  %v1795_v4 = vld [vmem:[#allocation3 + $0x28] sm:$0xff]  ;;  %v1773_v6 = vpop.permute.xlu2 %1772  ;;  %v1887_v14 = vpop.f32.mrf.mxu3  ;;  %v2415_v57 = vld [vmem:[%s3407_s3 + $0x238] sm:$0xff] }
 0x32f   : > { %1785 = vst.msk [vmem:[#allocation3 + $0x38] sm:$0xff] %vm863_vm4, %v1765_v0  ;;  %2393 = vmatmul.msk.f32.gmra.mxu3 %vm1265_vm6, %v1793_v1  ;;  %v1888_v31 = vadd.f32 %v3230_v20, %v1887_v14  ;;  %2174 = vmatpush.msrb.mxu2 %v2415_v57  ;;  %v2401_v57 = vld [vmem:[%s3407_s3 + $0x1c8] sm:$0xff] }
 0x331   : > { %2175 = vmatpush.msrb.mxu2 %v2414_v58  ;;  %v2400_v58 = vld [vmem:[%s3407_s3 + $0x1c0] sm:$0xff] }
 0x333   : > { %2176 = vmatpush.msrb.mxu2 %v2413_v62  ;;  %v2417_v62 = vld [vmem:[%s3407_s3 + $0x248] sm:$0xff] }
 0x334   : > { %v1769_v2 = vpop.permute.xlu1 %1768 }
 0x335   : > { %v1721_v3 = vpop.permute.xlu0 %1720  ;;  %v1799_v8 = vld [vmem:[#allocation3 + $0x48] sm:$0xff] }
 0x336   : > { %1739 = vst.msk [vmem:[#allocation3 + $0x58] sm:$0xff] %vm766_vm3, %v1721_v3  ;;  %v1797_v7 = vld [vmem:[#allocation3 + $0x38] sm:$0xff] }
 0x337   : > { %1787 = vst.msk [vmem:[#allocation3 + $0x58] sm:$0xff] %vm863_vm4, %v1769_v2  ;;  %2394 = vmatmul.msk.f32.gmra.mxu3 %vm1265_vm6, %v1795_v4 }
 0x33c   : > { %v1725_v5 = vpop.permute.xlu1 %1724 }
 0x33d   : > { %v1771_v27 = vpop.permute.xlu0 %1770  ;;  %1741 = vst.msk [vmem:[#allocation3 + $0x78] sm:$0xff] %vm766_vm3, %v1725_v5 }
 0x33e   : > { %1789 = vst.msk [vmem:[#allocation3 + $0x78] sm:$0xff] %vm863_vm4, %v1773_v6  ;;  %v1801_v9 = vld [vmem:[#allocation3 + $0x58] sm:$0xff] }
 0x33f   : > { %1788 = vst.msk [vmem:[#allocation3 + $0x68] sm:$0xff] %vm863_vm4, %v1771_v27  ;;  %2395 = vmatmul.msk.f32.gmra.mxu3 %vm1265_vm6, %v1797_v7  ;;  %v2412_v27 = vld [vmem:[%s3407_s3 + $0x220] sm:$0xff] }
 0x340   : > { %2177 = vmatpush.msrb.mxu2 %v2412_v27 }
 0x345   : > { %v1805_v11 = vld [vmem:[#allocation3 + $0x78] sm:$0xff] }
 0x346   : > { %v1803_v10 = vld [vmem:[#allocation3 + $0x68] sm:$0xff] }
 0x347   : > { %2396 = vmatmul.msk.f32.gmra.mxu3 %vm1265_vm6, %v1799_v8 }
 0x34c   : > { %v1890_v15 = vpop.f32.mrf.mxu3 }
 0x34d   : > { %v1891_v39 = vadd.f32 %v3230_v20, %v1890_v15 }
 0x34f   : > { %2397 = vmatmul.msk.f32.gmra.mxu3 %vm1265_vm6, %v1801_v9 }
 0x357   : > { %2398 = vmatmul.msk.f32.gmra.mxu3 %vm1265_vm6, %v1803_v10 }
 0x35f   : > { %2399 = vmatmul.msk.f32.gmra.mxu3 %vm1265_vm6, %v1805_v11 }
 0x366   : > { %v1893_v16 = vpop.f32.mrf.mxu3 }
 0x367   : > { %v1894_v44 = vadd.f32 %v3230_v20, %v1893_v16 }
 0x37c   : > { %v1896_v17 = vpop.f32.mrf.mxu3 }
 0x37d   : > { %v1897_v54 = vadd.f32 %v3230_v20, %v1896_v17  ;;  %v2425_v17 = vld [vmem:[%s3407_s3 + $0x288] sm:$0xff] }
 0x37e   : > { %2209 = vmatpush.msrb.mxu1 %v2425_v17 }
 0x392   : > { %v1899_v18 = vpop.f32.mrf.mxu3 }
 0x393   : > { %v1900_v63 = vadd.f32 %v3230_v20, %v1899_v18  ;;  %v2411_v18 = vld [vmem:[%s3407_s3 + $0x218] sm:$0xff] }
 0x394   : > { %2178 = vmatpush.msrb.mxu2 %v2411_v18 }
 0x3a2   : > { %v3225_v19 = vpop.f32.mrf.mxu3 }
 0x3a3   : > { %v1903_v11 = vadd.f32 %v3230_v20, %v3225_v19 }
 0x3aa   : > { %v1922_v32 = vpop.f32.mrf.mxu3 }
 0x3ab   : > { %v1923_v22 = vadd.f32 %v1922_v32, %v1882_v21 }
 0x3ad   : > { %v1946_v23 = vmax.f32 %v1923_v22, 0.0  ;;  %v2410_v22 = vld [vmem:[%s3407_s3 + $0x210] sm:$0xff] }
 0x3ae   : > { %2179 = vmatpush.msrb.mxu2 %v2410_v22 }
 0x3af   : > { %1954 = vst.msk [vmem:[#allocation4] sm:$0xff] %vm507_vm2, %v1946_v23  ;;  %v2424_v23 = vld [vmem:[%s3407_s3 + $0x280] sm:$0xff] }
 0x3b0   : > { %2210 = vmatpush.msrb.mxu1 %v2424_v23 }
 0x3b2   : > { %v1925_v25 = vpop.f32.mrf.mxu3 }
 0x3b3   : > { %v1926_v28 = vadd.f32 %v1925_v25, %v1885_v24  ;;  %v2409_v24 = vld [vmem:[%s3407_s3 + $0x208] sm:$0xff]  ;;  %v2423_v25 = vld [vmem:[%s3407_s3 + $0x278] sm:$0xff] }
 0x3b4   : > { %2180 = vmatpush.msrb.mxu2 %v2409_v24  ;;  %2211 = vmatpush.msrb.mxu1 %v2423_v25  ;;  %v2453_v24 = vld [vmem:[%s3408_s4 + $0x2] ss:$0 sm:$0xff] }
 0x3b5   : > { %v1947_v30 = vmax.f32 %v1926_v28, 0.0  ;;  %v2408_v28 = vld [vmem:[%s3407_s3 + $0x200] sm:$0xff] }
 0x3b6   : > { %2181 = vmatpush.msrb.mxu2 %v2408_v28 }
 0x3b7   : > { %1955 = vst.msk [vmem:[#allocation4 + $0x8] sm:$0xff] %vm507_vm2, %v1947_v30  ;;  %v2422_v30 = vld [vmem:[%s3407_s3 + $0x270] sm:$0xff] }
 0x3b8   : > { %2212 = vmatpush.msrb.mxu1 %v2422_v30 }
 0x3ba   : > { %v1928_v33 = vpop.f32.mrf.mxu3 }
 0x3bb   : > { %v1929_v34 = vadd.f32 %v1928_v33, %v1888_v31 }
 0x3bd   : > { %v1948_v35 = vmax.f32 %v1929_v34, 0.0 }
 0x3be   : > { %v1963_v29 = vld [vmem:[#allocation4] ss:$2 sm:$0xff]  ;;  %v1967_v36 = vld [vmem:[#allocation4 + $0x1] ss:$2 sm:$0xff] }
 0x3bf   : > { %v1971_v38 = vadd.f32 %v1967_v36, %v1963_v29  ;;  %1956 = vst.msk [vmem:[#allocation4 + $0x10] sm:$0xff] %vm507_vm2, %v1948_v35 }
 0x3c1   : > { %v1975_v40 = vmul.f32 0.5, %v1971_v38 }
 0x3c2   : > { %v1931_v41 = vpop.f32.mrf.mxu3 }
 0x3c3   : > { %1979 = vst.msk [vmem:[#allocation2 + $0x3] sm:$0xff] %vm507_vm2, %v1975_v40  ;;  %v1932_v42 = vadd.f32 %v1931_v41, %v1891_v39 }
 0x3c5   : > { %v1949_v43 = vmax.f32 %v1932_v42, 0.0 }
 0x3c7   : > { %1957 = vst.msk [vmem:[#allocation4 + $0x18] sm:$0xff] %vm507_vm2, %v1949_v43 }
 0x3ca   : > { %v1934_v45 = vpop.f32.mrf.mxu3  ;;  %v2040_v46 = vld [vmem:[#allocation2 + $0x3] sm:$0xff] }
 0x3cb   : > { %v2016_v47 = vld [vmem:[#allocation2 + $0x2] sm:$0xff]  ;;  %v1935_v49 = vadd.f32 %v1934_v45, %v1894_v44  ;;  %2048 = vrot.lane.b32.xlu2 %v2040_v46, %s2463_s6 }
 0x3cc   : > { %v1992_v48 = vld [vmem:[#allocation2 + $0x1] sm:$0xff]  ;;  %2024 = vrot.lane.b32.xlu1 %v2016_v47, %s2465_s8 }
 0x3cd   : > { %v1984_v50 = vld [vmem:[#allocation2] sm:$0xff]  ;;  %2000 = vrot.lane.b32.xlu0 %v1992_v48, %s2464_s7  ;;  %v1950_v51 = vmax.f32 %v1935_v49, 0.0  ;;  %v2407_v49 = vld [vmem:[%s3407_s3 + $0x1f8] sm:$0xff] }
 0x3ce   : > { %1988 = vst.msk [vmem:[#allocation3] sm:$0xff] %vm507_vm2, %v1984_v50  ;;  %v1964_v52 = vld [vmem:[#allocation4 + $0x10] ss:$2 sm:$0xff]  ;;  %v1968_v26 = vld [vmem:[#allocation4 + $0x11] ss:$2 sm:$0xff]  ;;  %v2406_v50 = vld [vmem:[%s3407_s3 + $0x1f0] sm:$0xff]  ;;  %2182 = vmatpush.msrb.mxu2 %v2407_v49 }
 0x3cf   : > { %v1972_v53 = vadd.f32 %v1968_v26, %v1964_v52  ;;  %1958 = vst.msk [vmem:[#allocation4 + $0x20] sm:$0xff] %vm507_vm2, %v1950_v51  ;;  %v2421_v51 = vld [vmem:[%s3407_s3 + $0x268] sm:$0xff] }
 0x3d0   : > { %2213 = vmatpush.msrb.mxu1 %v2421_v51  ;;  %2183 = vmatpush.msrb.mxu2 %v2406_v50  ;;  %v2405_v26 = vld [vmem:[%s3407_s3 + $0x1e8] sm:$0xff] }
 0x3d1   : > { %v1976_v55 = vmul.f32 0.5, %v1972_v53  ;;  %v2420_v53 = vld [vmem:[%s3407_s3 + $0x260] sm:$0xff] }
 0x3d2   : > { %v1937_v56 = vpop.f32.mrf.mxu3  ;;  %2184 = vmatpush.msrb.mxu2 %v2405_v26  ;;  %2214 = vmatpush.msrb.mxu1 %v2420_v53 }
 0x3d3   : > { %1980 = vst.msk [vmem:[#allocation2 + $0xb] sm:$0xff] %vm507_vm2, %v1976_v55  ;;  %v1938_v37 = vadd.f32 %v1937_v56, %v1897_v54  ;;  %v2404_v54 = vld [vmem:[%s3407_s3 + $0x1e0] sm:$0xff]  ;;  %v2403_v55 = vld [vmem:[%s3407_s3 + $0x1d8] sm:$0xff] }
 0x3d4   : > { %2185 = vmatpush.msrb.mxu2 %v2404_v54  ;;  %v2419_v56 = vld [vmem:[%s3407_s3 + $0x258] sm:$0xff] }
 0x3d5   : > { %v1951_v61 = vmax.f32 %v1938_v37, 0.0  ;;  %v2402_v37 = vld [vmem:[%s3407_s3 + $0x1d0] sm:$0xff]  ;;  %2215 = vmatpush.msrb.mxu1 %v2419_v56 }
 0x3d6   : > { %2186 = vmatpush.msrb.mxu2 %v2403_v55 }
 0x3d7   : > { %1959 = vst.msk [vmem:[#allocation4 + $0x28] sm:$0xff] %vm507_vm2, %v1951_v61  ;;  %2216 = vmatpush.msrb.mxu1 %v2418_v60 }
 0x3d8   : > { %2187 = vmatpush.msrb.mxu2 %v2402_v37 }
 0x3d9   : > { %2217 = vmatpush.msrb.mxu1 %v2417_v62 }
 0x3da   : > { %v1940_v0 = vpop.f32.mrf.mxu3  ;;  %v2072_v1 = vld [vmem:[#allocation2 + $0x5] sm:$0xff]  ;;  %2188 = vmatpush.msrb.mxu2 %v2401_v57 }
 0x3db   : > { %v2017_v2 = vld [vmem:[#allocation2 + $0xa] sm:$0xff]  ;;  %v1941_v4 = vadd.f32 %v1940_v0, %v1900_v63  ;;  %2080 = vrot.lane.b32.xlu2 %v2072_v1, %s2464_s7  ;;  %v2416_v63 = vld [vmem:[%s3407_s3 + $0x240] sm:$0xff] }
 0x3dc   : > { %v1993_v3 = vld [vmem:[#allocation2 + $0x9] sm:$0xff]  ;;  %2026 = vrot.lane.b32.xlu1 %v2017_v2, %s2465_s8  ;;  %2189 = vmatpush.msrb.mxu2 %v2400_v58 }
 0x3dd   : > { %v2064_v5 = vld [vmem:[#allocation2 + $0x4] sm:$0xff]  ;;  %2002 = vrot.lane.b32.xlu0 %v1993_v3, %s2464_s7  ;;  %v1952_v7 = vmax.f32 %v1941_v4, 0.0  ;;  %2218 = vmatpush.msrb.mxu1 %v2416_v63 }
 0x3de   : > { %2068 = vst.msk [vmem:[#allocation3 + $0x8] sm:$0xff] %vm507_vm2, %v2064_v5  ;;  %v1985_v6 = vld [vmem:[#allocation2 + $0x8] sm:$0xff] }
 0x3df   : > { %1989 = vst.msk [vmem:[#allocation3 + $0x10] sm:$0xff] %vm507_vm2, %v1985_v6  ;;  %v1965_v8 = vld [vmem:[#allocation4 + $0x20] ss:$2 sm:$0xff]  ;;  %v1969_v9 = vld [vmem:[#allocation4 + $0x21] ss:$2 sm:$0xff] }
 0x3e0   : > { %v1973_v10 = vadd.f32 %v1969_v9, %v1965_v8  ;;  %1960 = vst.msk [vmem:[#allocation4 + $0x30] sm:$0xff] %vm507_vm2, %v1952_v7  ;;  %v2096_v14 = vld [vmem:[#allocation2 + $0x6] sm:$0xff] }
 0x3e1   : > { %v2041_v16 = vld [vmem:[#allocation2 + $0xb] sm:$0xff] }
 0x3e2   : > { %v1977_v12 = vmul.f32 0.5, %v1973_v10  ;;  %v1943_v13 = vpop.f32.mrf.mxu3 }
 0x3e3   : > { %v1944_v15 = vadd.f32 %v1943_v13, %v1903_v11 }
 0x3e4   : > { %1981 = vst.msk [vmem:[#allocation2 + $0x13] sm:$0xff] %vm507_vm2, %v1977_v12  ;;  %2104 = vrot.lane.b32.xlu1 %v2096_v14, %s2465_s8 }
 0x3e5   : > { %2050 = vrot.lane.b32.xlu0 %v2041_v16, %s2463_s6  ;;  %v1953_v19 = vmax.f32 %v1944_v15, 0.0 }
 0x3e7   : > { %1961 = vst.msk [vmem:[#allocation4 + $0x38] sm:$0xff] %vm507_vm2, %v1953_v19 }
 0x3eb   : > { %v1994_v20 = vld [vmem:[#allocation2 + $0x11] sm:$0xff] }
 0x3ec   : > { %v2073_v21 = vld [vmem:[#allocation2 + $0xd] sm:$0xff]  ;;  %2004 = vrot.lane.b32.xlu2 %v1994_v20, %s2464_s7 }
 0x3ed   : > { %v2018_v32 = vld [vmem:[#allocation2 + $0x12] sm:$0xff]  ;;  %2082 = vrot.lane.b32.xlu1 %v2073_v21, %s2464_s7 }
 0x3ee   : > { %2028 = vrot.lane.b32.xlu0 %v2018_v32, %s2465_s8  ;;  %v1986_v31 = vld [vmem:[#allocation2 + $0x10] sm:$0xff]  ;;  %v1966_v33 = vld [vmem:[#allocation4 + $0x30] ss:$2 sm:$0xff]  ;;  %v1970_v34 = vld [vmem:[#allocation4 + $0x31] ss:$2 sm:$0xff] }
 0x3ef   : > { %1990 = vst.msk [vmem:[#allocation3 + $0x20] sm:$0xff] %vm507_vm2, %v1986_v31  ;;  %v2065_v35 = vld [vmem:[#allocation2 + $0xc] sm:$0xff]  ;;  %v1974_v29 = vadd.f32 %v1970_v34, %v1966_v33 }
 0x3f0   : > { %2069 = vst.msk [vmem:[#allocation3 + $0x18] sm:$0xff] %vm507_vm2, %v2065_v35  ;;  %v2042_v38 = vld [vmem:[#allocation2 + $0x13] sm:$0xff] }
 0x3f1   : > { %v1978_v36 = vmul.f32 0.5, %v1974_v29  ;;  %v2097_v39 = vld [vmem:[#allocation2 + $0xe] sm:$0xff] }
 0x3f3   : > { %1982 = vst.msk [vmem:[#allocation2 + $0x1b] sm:$0xff] %vm507_vm2, %v1978_v36 }
 0x3f4   : > { %2052 = vrot.lane.b32.xlu2 %v2042_v38, %s2463_s6 }
 0x3f6   : > { %2106 = vrot.lane.b32.xlu0 %v2097_v39, %s2465_s8 }
 0x3fa   : > { %v2019_v40 = vld [vmem:[#allocation2 + $0x1a] sm:$0xff] }
 0x3fb   : > { %v1995_v41 = vld [vmem:[#allocation2 + $0x19] sm:$0xff] }
 0x3fc   : > { %v2074_v42 = vld [vmem:[#allocation2 + $0x15] sm:$0xff]  ;;  %2030 = vrot.lane.b32.xlu2 %v2019_v40, %s2465_s8  ;;  %2006 = vrot.lane.b32.xlu1 %v1995_v41, %s2464_s7  ;;  %v2075_v48 = vld [vmem:[#allocation2 + $0x1d] sm:$0xff] }
 0x3fd   : > { %v1987_v43 = vld [vmem:[#allocation2 + $0x18] sm:$0xff] }
 0x3fe   : > { %2084 = vrot.lane.b32.xlu0 %v2074_v42, %s2464_s7  ;;  %v2066_v44 = vld [vmem:[#allocation2 + $0x14] sm:$0xff]  ;;  %1991 = vst.msk [vmem:[#allocation3 + $0x30] sm:$0xff] %vm507_vm2, %v1987_v43  ;;  %v2067_v45 = vld [vmem:[#allocation2 + $0x1c] sm:$0xff] }
 0x3ff   : > { %2070 = vst.msk [vmem:[#allocation3 + $0x28] sm:$0xff] %vm507_vm2, %v2066_v44  ;;  %v2098_v46 = vld [vmem:[#allocation2 + $0x16] sm:$0xff]  ;;  %v2099_v52 = vld [vmem:[#allocation2 + $0x1e] sm:$0xff] }
 0x400   : > { %2071 = vst.msk [vmem:[#allocation3 + $0x38] sm:$0xff] %vm507_vm2, %v2067_v45  ;;  %v2043_v47 = vld [vmem:[#allocation2 + $0x1b] sm:$0xff] }
 0x404   : > { %2108 = vrot.lane.b32.xlu2 %v2098_v46, %s2465_s8  ;;  %2054 = vrot.lane.b32.xlu1 %v2043_v47, %s2463_s6 }
 0x406   : > { %2086 = vrot.lane.b32.xlu0 %v2075_v48, %s2464_s7  ;;  %s2435_s7 = sshll.u32 %s3413_s19, 4 }
 0x407   : > { %s226_s23 = scalar_lea.vmem %s3409_s5, %s2435_s7 }
 0x40c   : > { %2110 = vrot.lane.b32.xlu1 %v2099_v52, %s2465_s8 }
 0x425   : > { %v2049_v59 = vpop.permute.xlu2 %2048 }
 0x435   : > { %v2081_v61 = vpop.permute.xlu2 %2080 }
 0x436   : > { %2092 = vst.msk [vmem:[#allocation3 + $0x8] sm:$0xff] %vm766_vm3, %v2081_v61 }
 0x43e   : > { %v2025_v0 = vpop.permute.xlu1 %2024 }
 0x43f   : > { %v2001_v1 = vpop.permute.xlu0 %2000 }
 0x440   : > { %2012 = vst.msk [vmem:[#allocation3] sm:$0xff] %vm766_vm3, %v2001_v1 }
 0x441   : > { %2036 = vst.msk [vmem:[#allocation3] sm:$0xff] %vm863_vm4, %v2025_v0 }
 0x442   : > { %2060 = vst.msk [vmem:[#allocation3] sm:$0xff] %vm960_vm5, %v2049_v59 }
 0x446   : > { %v2005_v2 = vpop.permute.xlu2 %2004 }
 0x447   : > { %2014 = vst.msk [vmem:[#allocation3 + $0x20] sm:$0xff] %vm766_vm3, %v2005_v2 }
 0x449   : > { %v2120_v3 = vld [vmem:[#allocation3] sm:$0xff] }
 0x44a   : > { %2190 = vmatmul.f32.vlgmr.msrb.gmra.mxu2 %v2120_v3 }
 0x44e   : > { %v2027_v4 = vpop.permute.xlu1 %2026  ;;  %v2053_v7 = vpop.permute.xlu2 %2052 }
 0x44f   : > { %v2003_v5 = vpop.permute.xlu0 %2002 }
 0x450   : > { %2013 = vst.msk [vmem:[#allocation3 + $0x10] sm:$0xff] %vm766_vm3, %v2003_v5 }
 0x451   : > { %2037 = vst.msk [vmem:[#allocation3 + $0x10] sm:$0xff] %vm863_vm4, %v2027_v4 }
 0x456   : > { %v2105_v27 = vpop.permute.xlu1 %2104  ;;  %v2031_v12 = vpop.permute.xlu2 %2030 }
 0x457   : > { %2116 = vst.msk [vmem:[#allocation3 + $0x8] sm:$0xff] %vm863_vm4, %v2105_v27  ;;  %v2051_v6 = vpop.permute.xlu0 %2050 }
 0x458   : > { %2061 = vst.msk [vmem:[#allocation3 + $0x10] sm:$0xff] %vm960_vm5, %v2051_v6 }
 0x45e   : > { %v2121_v9 = vld [vmem:[#allocation3 + $0x8] sm:$0xff]  ;;  %v2109_v18 = vpop.permute.xlu2 %2108 }
 0x45f   : > { %v2083_v8 = vpop.permute.xlu1 %2082  ;;  %v2122_v11 = vld [vmem:[#allocation3 + $0x10] sm:$0xff]  ;;  %2429 = vmatmul.msk.f32.vlgmr.msrb.gmra.mxu1 %vm1265_vm6, %v2121_v9 }
 0x460   : > { %2093 = vst.msk [vmem:[#allocation3 + $0x18] sm:$0xff] %vm766_vm3, %v2083_v8  ;;  %v2029_v10 = vpop.permute.xlu0 %2028  ;;  %2193 = vmatmul.f32.gmra.mxu2 %v2122_v11 }
 0x461   : > { %2038 = vst.msk [vmem:[#allocation3 + $0x20] sm:$0xff] %vm863_vm4, %v2029_v10 }
 0x462   : > { %2062 = vst.msk [vmem:[#allocation3 + $0x20] sm:$0xff] %vm960_vm5, %v2053_v7 }
 0x468   : > { %v2107_v13 = vpop.permute.xlu0 %2106 }
 0x469   : > { %2117 = vst.msk [vmem:[#allocation3 + $0x18] sm:$0xff] %vm863_vm4, %v2107_v13  ;;  %v2124_v14 = vld [vmem:[#allocation3 + $0x20] sm:$0xff] }
 0x46a   : > { %2196 = vmatmul.f32.gmra.mxu2 %v2124_v14 }
 0x46e   : > { %v2007_v15 = vpop.permute.xlu1 %2006 }
 0x46f   : > { %2015 = vst.msk [vmem:[#allocation3 + $0x30] sm:$0xff] %vm766_vm3, %v2007_v15 }
 0x470   : > { %v2085_v16 = vpop.permute.xlu0 %2084  ;;  %v2123_v17 = vld [vmem:[#allocation3 + $0x18] sm:$0xff]  ;;  %2039 = vst.msk [vmem:[#allocation3 + $0x30] sm:$0xff] %vm863_vm4, %v2031_v12 }
 0x471   : > { %2430 = vmatmul.msk.f32.gmra.mxu1 %vm1265_vm6, %v2123_v17  ;;  %2094 = vst.msk [vmem:[#allocation3 + $0x28] sm:$0xff] %vm766_vm3, %v2085_v16 }
 0x472   : > { %2118 = vst.msk [vmem:[#allocation3 + $0x28] sm:$0xff] %vm863_vm4, %v2109_v18 }
 0x476   : > { %v2055_v19 = vpop.permute.xlu1 %2054 }
 0x477   : > { %2063 = vst.msk [vmem:[#allocation3 + $0x30] sm:$0xff] %vm960_vm5, %v2055_v19 }
 0x478   : > { %v2087_v20 = vpop.permute.xlu0 %2086 }
 0x479   : > { %2095 = vst.msk [vmem:[#allocation3 + $0x38] sm:$0xff] %vm766_vm3, %v2087_v20  ;;  %v2125_v21 = vld [vmem:[#allocation3 + $0x28] sm:$0xff] }
 0x47a   : > { %2431 = vmatmul.msk.f32.gmra.mxu1 %vm1265_vm6, %v2125_v21 }
 0x47e   : > { %v2111_v32 = vpop.permute.xlu1 %2110  ;;  %v2126_v22 = vld [vmem:[#allocation3 + $0x30] sm:$0xff] }
 0x47f   : > { %2119 = vst.msk [vmem:[#allocation3 + $0x38] sm:$0xff] %vm863_vm4, %v2111_v32  ;;  %2199 = vmatmul.f32.gmra.mxu2 %v2126_v22 }
 0x486   : > { %v2127_v23 = vld [vmem:[#allocation3 + $0x38] sm:$0xff] }
 0x487   : > { %2432 = vmatmul.msk.f32.gmra.mxu1 %vm1265_vm6, %v2127_v23 }
 0x4cd   : > { %v2191_v25 = vpop.f32.mrf.mxu2 }
 0x4ce   : > { %v2192_v28 = vadd.f32 %v2453_v24, %v2191_v25 }
 0x4dc   : > { %v2220_v30 = vpop.f32.mrf.mxu1 }
 0x4dd   : > { %v2221_v31 = vadd.f32 %v2220_v30, %v2192_v28 }
 0x4df   : > { %v2232_v33 = vmax.f32 %v2221_v31, 0.0 }
 0x4e1   : > { %2236 = vst.msk [vmem:[#allocation4] sm:$0xff] %vm507_vm2, %v2232_v33 }
 0x4e3   : > { %v2194_v34 = vpop.f32.mrf.mxu2 }
 0x4e4   : > { %v2195_v35 = vadd.f32 %v2453_v24, %v2194_v34 }
 0x4ed   : > { %v2197_v39 = vpop.f32.mrf.mxu2 }
 0x4ee   : > { %v2223_v29 = vpop.f32.mrf.mxu1  ;;  %v2198_v40 = vadd.f32 %v2453_v24, %v2197_v39 }
 0x4ef   : > { %v2224_v36 = vadd.f32 %v2223_v29, %v2195_v35 }
 0x4f1   : > { %v2233_v38 = vmax.f32 %v2224_v36, 0.0 }
 0x4f3   : > { %2237 = vst.msk [vmem:[#allocation4 + $0x8] sm:$0xff] %vm507_vm2, %v2233_v38 }
 0x4f7   : > { %v2226_v41 = vpop.f32.mrf.mxu1 }
 0x4f8   : > { %v2227_v42 = vadd.f32 %v2226_v41, %v2198_v40 }
 0x4fa   : > { %v2240_v43 = vld [vmem:[#allocation4] ss:$2 sm:$0xff]  ;;  %v2242_v44 = vld [vmem:[#allocation4 + $0x1] ss:$2 sm:$0xff]  ;;  %v2234_v46 = vmax.f32 %v2227_v42, 0.0 }
 0x4fb   : > { %v2244_v45 = vadd.f32 %v2242_v44, %v2240_v43 }
 0x4fc   : > { %2238 = vst.msk [vmem:[#allocation4 + $0x10] sm:$0xff] %vm507_vm2, %v2234_v46 }
 0x4fd   : > { %v2246_v47 = vmul.f32 0.5, %v2244_v45 }
 0x4ff   : > { %2249 = vst.msk [vmem:[%s226_s23] sm:$0xff] %vm2248_vm7, %v2246_v47 }
 0x502   : > { %v2200_v48 = vpop.f32.mrf.mxu2 }
 0x503   : > { %v2201_v49 = vadd.f32 %v2453_v24, %v2200_v48 }
 0x504   : > { %v2229_v50 = vpop.f32.mrf.mxu1 }
 0x505   : > { %v2230_v51 = vadd.f32 %v2229_v50, %v2201_v49 }
 0x507   : > { %v2235_v52 = vmax.f32 %v2230_v51, 0.0 }
 0x509   : > { %2239 = vst.msk [vmem:[#allocation4 + $0x18] sm:$0xff] %vm507_vm2, %v2235_v52 }
 0x510   : > { %v2241_v26 = vld [vmem:[#allocation4 + $0x10] ss:$2 sm:$0xff]  ;;  %v2243_v53 = vld [vmem:[#allocation4 + $0x11] ss:$2 sm:$0xff] }
 0x511   : > { %v2245_v54 = vadd.f32 %v2243_v53, %v2241_v26 }
 0x513   : > { %v2247_v55 = vmul.f32 0.5, %v2245_v54 }
 0x515   : > { %2250 = vst.msk [vmem:[%s226_s23 + $0x8] sm:$0xff] %vm2248_vm7, %v2247_v55 }
 0x516 PF: > { %s15_s18 = sadd.s32 1, %s2460_s18  }
 0x517   : > { %p12_p5 = scmp.ge.s32.totalorder %s15_s18, 4  }
 0x519   :  { %14 = sbr.rel (!%p12_p5) target bundleno = 1 (0x1), region = 105 }

</bundles_post_ra>
